<compile_context>
chip_gen: v5e
topology: v5e:2x2
jax: 0.10.0
libtpu: 0.0.40
codegen_flags: <defaults>
</compile_context>

<pallas_src>
import jax
import jax.numpy as jnp
from jax.experimental import pallas as pl
from jax.experimental.pallas import tpu as pltpu


# Layer table: (name, fan_in, fan_out), packed in this order into one flat
# f32 buffer that the kernel reads from SMEM.
_LAYERS = (
    ("mu1", 4, 8), ("mu2", 8, 4),      # encodermu
    ("sg1", 4, 8), ("sg2", 8, 4),      # encodersigma
    ("d1", 4, 8), ("d2", 8, 4), ("d3", 4, 2),   # decoder
)


def _layer_offsets():
    offs, off = {}, 0
    for name, n_in, n_out in _LAYERS:
        offs[name] = (off, off + n_in * n_out, n_in, n_out)
        off += n_in * n_out + n_out
    return offs, off


_OFFSETS, _THETA_SIZE = _layer_offsets()   # 238 packed f32 scalars


def pack_params(params):
    """Pack all weights/biases into one flat f32 vector (kernel SMEM input)."""
    pieces = []
    for name, _, _ in _LAYERS:
        pieces.append(params[f"w_{name}"].astype(jnp.float32).reshape(-1))
        pieces.append(params[f"b_{name}"].astype(jnp.float32).reshape(-1))
    return jnp.concatenate(pieces)


def _make_vae_kernel(cps, compute_dtype):
    """Kernel factory: cps = chunks (of 8 sublanes x lane-width) per grid step."""
    cd = jnp.dtype(compute_dtype)
    f32 = jnp.dtype(jnp.float32)

    def kernel(theta_ref, state_ref, noise_ref, out_ref):
        # Hoist all 238 SMEM scalar reads out of the chunk loop (read once per
        # kernel invocation; reused by every chunk).
        th32 = [theta_ref[t] for t in range(_THETA_SIZE)]
        th = th32 if cd == f32 else [t.astype(cd) for t in th32]

        def layer(rows, name, act=None, theta=th):
            # out[j] = act(sum_k w[k, j] * rows[k] + b[j]) as rank-1 VPU FMAs.
            w_off, b_off, n_in, n_out = _OFFSETS[name]
            outs = []
            for j in range(n_out):
                acc = rows[0] * theta[w_off + j]
                for k in range(1, n_in):
                    acc = acc + rows[k] * theta[w_off + k * n_out + j]
                acc = acc + theta[b_off + j]
                outs.append(act(acc) if act is not None else acc)
            return outs

        relu = lambda v: jnp.maximum(v, 0.0)

        # Fully-unrolled inner loop over (8 sublane x lane-width) batch chunks
        # (equivalent to lax.fori_loop(..., unroll=True) with static indices).
        for c in range(cps):
            rows_sl = slice(c * 8, c * 8 + 8)
            x_rows = [state_ref[k, rows_sl, :].astype(cd) for k in range(4)]

            # Resequenced: mu path, then sigma path (keeps live vregs low).
            h = layer(x_rows, "mu1", relu)       # 8 rows, dies after mu
            mu = layer(h, "mu2")                 # 4 rows
            h = layer(x_rows, "sg1", relu)       # 8 rows, dies after sigma
            sigma = layer(h, "sg2")              # 4 rows

            # Load the N(1,1) noise only right before its use.
            eps = [noise_ref[k, rows_sl, :].astype(cd) for k in range(4)]
            sample = [mu[k] + eps[k] * sigma[k] for k in range(4)]

            h = layer(sample, "d1", relu)
            h = layer(h, "d2", relu)
            # Final 4->2 layer + tanh in f32 (safe on all gens, f32 output).
            h32 = [v.astype(jnp.float32) for v in h]
            a = layer(h32, "d3", jnp.tanh, theta=th32)

            out_ref[0, rows_sl, :] = a[0]
            out_ref[1, rows_sl, :] = a[1]

    return kernel


def vae_actiongenerate_fm(state_fm, noise_fm, params, *, chunk_lanes=256,
                          max_chunks_per_step=8, compute_dtype=jnp.float32):
    """Feature-major API (no wrapper transposes).

    state_fm, noise_fm: [4, B] f32 (noise = samples of N(1, 1)).
    Returns [2, B] f32.
    """
    F, B = state_fm.shape
    assert F == 4, "VAE_actiongenerate expects 4 state features"
    theta = pack_params(params)

    chunk_batch = 8 * chunk_lanes                       # batch elems per chunk
    total_chunks = pl.cdiv(B, chunk_batch)
    if total_chunks <= 1:
        cps = 1
    else:
        # >= 2 grid steps so ("parallel",) can use both v7x TensorCores.
        cps = max(1, min(max_chunks_per_step, total_chunks // 2))
    G = pl.cdiv(total_chunks, cps)
    padded_chunks = G * cps
    Bp = padded_chunks * chunk_batch
    rows = Bp // chunk_lanes                            # = padded_chunks * 8

    def to_blocks(a):
        a = a.astype(jnp.float32)
        a = jnp.pad(a, ((0, 0), (0, Bp - B)))           # pad batch (tail wasted)
        return a.reshape(F, rows, chunk_lanes)          # pure reshape, no copy pass

    state_b = to_blocks(state_fm)
    noise_b = to_blocks(noise_fm)

    kernel = _make_vae_kernel(cps, compute_dtype)
    out_b = pl.pallas_call(
        kernel,
        out_shape=jax.ShapeDtypeStruct((2, rows, chunk_lanes), jnp.float32),
        grid=(G,),
        in_specs=[
            pl.BlockSpec(memory_space=pltpu.MemorySpace.SMEM),         # packed weights
            pl.BlockSpec((4, 8 * cps, chunk_lanes), lambda i: (0, i, 0)),
            pl.BlockSpec((4, 8 * cps, chunk_lanes), lambda i: (0, i, 0)),
        ],
        out_specs=pl.BlockSpec((2, 8 * cps, chunk_lanes), lambda i: (0, i, 0)),
        compiler_params=pltpu.CompilerParams(
            dimension_semantics=("parallel",),
        ),
    )(theta, state_b, noise_b)

    return out_b.reshape(2, Bp)[:, :B]


def vae_actiongenerate(state, noise, params, **kwargs):
    """PyTorch-parity API: state/noise [B, 4] -> action [B, 2].

    Note: pays one HBM transpose on the way in and out; use
    vae_actiongenerate_fm with feature-major arrays to avoid them.
    """
    out_fm = vae_actiongenerate_fm(state.T, noise.T, params, **kwargs)
    return out_fm.T


def init_params(key):
    """PyTorch-default-style init; weights stored [in, out], biases [out]."""
    layer_dims = {
        "mu1": (4, 8), "mu2": (8, 4),
        "sg1": (4, 8), "sg2": (8, 4),
        "d1": (4, 8), "d2": (8, 4), "d3": (4, 2),
    }
    params = {}
    keys = jax.random.split(key, 2 * len(layer_dims))
    for i, (name, (fan_in, fan_out)) in enumerate(layer_dims.items()):
        bound = 1.0 / float(fan_in) ** 0.5
        params[f"w_{name}"] = jax.random.uniform(
            keys[2 * i], (fan_in, fan_out), jnp.float32, -bound, bound)
        params[f"b_{name}"] = jax.random.uniform(
            keys[2 * i + 1], (fan_out,), jnp.float32, -bound, bound)
    return params


def vae_reference(state, noise, params):
    """Pure-JAX reference of the PyTorch forward (for correctness check)."""
    lin = lambda x, w, b: x @ w + b
    relu = jax.nn.relu
    h = relu(lin(state, params["w_mu1"], params["b_mu1"]))
    mu = lin(h, params["w_mu2"], params["b_mu2"])
    h = relu(lin(state, params["w_sg1"], params["b_sg1"]))
    sigma = lin(h, params["w_sg2"], params["b_sg2"])
    sample = mu + noise * sigma
    h = relu(lin(sample, params["w_d1"], params["b_d1"]))
    h = relu(lin(h, params["w_d2"], params["b_d2"]))
    return jnp.tanh(lin(h, params["w_d3"], params["b_d3"]))


if __name__ == "__main__":
    key = jax.random.PRNGKey(0)
    k_params, k_s1, k_n1, k_s2, k_n2 = jax.random.split(key, 5)
    params = init_params(k_params)

    # 1) Small smoke test (single grid step, batch-major PyTorch-style API).
    B = 8
    state = jax.random.normal(k_s1, (B, 4), dtype=jnp.float32)
    noise = 1.0 + jax.random.normal(k_n1, (B, 4), dtype=jnp.float32)  # N(1,1)
    out = vae_actiongenerate(state, noise, params)
    jax.block_until_ready(out)
    ref = vae_reference(state, noise, params)
    assert out.shape == (B, 2) and out.dtype == jnp.float32
    assert bool(jnp.allclose(out, ref, atol=1e-5, rtol=1e-5))
    assert bool(jnp.all(jnp.abs(out) <= 1.0))  # tanh range

    # 2) Multi-step grid: B not a multiple of the chunk, cps=2, G=3 (padded
    #    tail chunks are computed and discarded).
    B2 = 9000
    state2 = jax.random.normal(k_s2, (B2, 4), dtype=jnp.float32)
    noise2 = 1.0 + jax.random.normal(k_n2, (B2, 4), dtype=jnp.float32)
    out2 = vae_actiongenerate(state2, noise2, params)
    jax.block_until_ready(out2)
    ref2 = vae_reference(state2, noise2, params)
    assert out2.shape == (B2, 2)
    assert bool(jnp.allclose(out2, ref2, atol=1e-5, rtol=1e-5))

    # 3) Feature-major API (no wrapper transposes) + bf16 compute fast path
    #    (v6e/v7x); intermediates bf16, final layer/tanh/output f32 -> loose tol.
    out3 = vae_actiongenerate_fm(state2.T, noise2.T, params,
                                 compute_dtype=jnp.bfloat16)
    jax.block_until_ready(out3)
    assert out3.shape == (2, B2) and out3.dtype == jnp.float32
    assert bool(jnp.allclose(out3.T, ref2, atol=5e-2, rtol=0.0))

    print("KERNEL_OK")
</pallas_src>

<mosaic_0001>
module attributes {stable_mosaic.version = 11 : i64} {
  func.func @kernel(%arg0: i32, %arg1: memref<238xf32, #tpu.memory_space<smem>>, %arg2: memref<4x8x256xf32, #tpu.memory_space<vmem>>, %arg3: memref<4x8x256xf32, #tpu.memory_space<vmem>>, %arg4: memref<2x8x256xf32, #tpu.memory_space<vmem>>) attributes {dimension_semantics = [#tpu.dimension_semantics<parallel>], iteration_bounds = array<i64: 1>, scalar_prefetch = 0 : i64, scratch_operands = 0 : i64, tpu.core_type = #tpu.core_type<tc>, window_params = [{transform_indices = @transform_0, window_bounds = array<i64: 238>}, {transform_indices = @transform_1, window_bounds = array<i64: 4, 8, 256>}, {transform_indices = @transform_2, window_bounds = array<i64: 4, 8, 256>}, {transform_indices = @transform_3, window_bounds = array<i64: 2, 8, 256>}]} {
    %c0 = arith.constant 0 : index
    %0 = memref.load %arg1[%c0] : memref<238xf32, #tpu.memory_space<smem>>
    %c1 = arith.constant 1 : index
    %1 = memref.load %arg1[%c1] : memref<238xf32, #tpu.memory_space<smem>>
    %c2 = arith.constant 2 : index
    %2 = memref.load %arg1[%c2] : memref<238xf32, #tpu.memory_space<smem>>
    %c3 = arith.constant 3 : index
    %3 = memref.load %arg1[%c3] : memref<238xf32, #tpu.memory_space<smem>>
    %c4 = arith.constant 4 : index
    %4 = memref.load %arg1[%c4] : memref<238xf32, #tpu.memory_space<smem>>
    %c5 = arith.constant 5 : index
    %5 = memref.load %arg1[%c5] : memref<238xf32, #tpu.memory_space<smem>>
    %c6 = arith.constant 6 : index
    %6 = memref.load %arg1[%c6] : memref<238xf32, #tpu.memory_space<smem>>
    %c7 = arith.constant 7 : index
    %7 = memref.load %arg1[%c7] : memref<238xf32, #tpu.memory_space<smem>>
    %c8 = arith.constant 8 : index
    %8 = memref.load %arg1[%c8] : memref<238xf32, #tpu.memory_space<smem>>
    %c9 = arith.constant 9 : index
    %9 = memref.load %arg1[%c9] : memref<238xf32, #tpu.memory_space<smem>>
    %c10 = arith.constant 10 : index
    %10 = memref.load %arg1[%c10] : memref<238xf32, #tpu.memory_space<smem>>
    %c11 = arith.constant 11 : index
    %11 = memref.load %arg1[%c11] : memref<238xf32, #tpu.memory_space<smem>>
    %c12 = arith.constant 12 : index
    %12 = memref.load %arg1[%c12] : memref<238xf32, #tpu.memory_space<smem>>
    %c13 = arith.constant 13 : index
    %13 = memref.load %arg1[%c13] : memref<238xf32, #tpu.memory_space<smem>>
    %c14 = arith.constant 14 : index
    %14 = memref.load %arg1[%c14] : memref<238xf32, #tpu.memory_space<smem>>
    %c15 = arith.constant 15 : index
    %15 = memref.load %arg1[%c15] : memref<238xf32, #tpu.memory_space<smem>>
    %c16 = arith.constant 16 : index
    %16 = memref.load %arg1[%c16] : memref<238xf32, #tpu.memory_space<smem>>
    %c17 = arith.constant 17 : index
    %17 = memref.load %arg1[%c17] : memref<238xf32, #tpu.memory_space<smem>>
    %c18 = arith.constant 18 : index
    %18 = memref.load %arg1[%c18] : memref<238xf32, #tpu.memory_space<smem>>
    %c19 = arith.constant 19 : index
    %19 = memref.load %arg1[%c19] : memref<238xf32, #tpu.memory_space<smem>>
    %c20 = arith.constant 20 : index
    %20 = memref.load %arg1[%c20] : memref<238xf32, #tpu.memory_space<smem>>
    %c21 = arith.constant 21 : index
    %21 = memref.load %arg1[%c21] : memref<238xf32, #tpu.memory_space<smem>>
    %c22 = arith.constant 22 : index
    %22 = memref.load %arg1[%c22] : memref<238xf32, #tpu.memory_space<smem>>
    %c23 = arith.constant 23 : index
    %23 = memref.load %arg1[%c23] : memref<238xf32, #tpu.memory_space<smem>>
    %c24 = arith.constant 24 : index
    %24 = memref.load %arg1[%c24] : memref<238xf32, #tpu.memory_space<smem>>
    %c25 = arith.constant 25 : index
    %25 = memref.load %arg1[%c25] : memref<238xf32, #tpu.memory_space<smem>>
    %c26 = arith.constant 26 : index
    %26 = memref.load %arg1[%c26] : memref<238xf32, #tpu.memory_space<smem>>
    %c27 = arith.constant 27 : index
    %27 = memref.load %arg1[%c27] : memref<238xf32, #tpu.memory_space<smem>>
    %c28 = arith.constant 28 : index
    %28 = memref.load %arg1[%c28] : memref<238xf32, #tpu.memory_space<smem>>
    %c29 = arith.constant 29 : index
    %29 = memref.load %arg1[%c29] : memref<238xf32, #tpu.memory_space<smem>>
    %c30 = arith.constant 30 : index
    %30 = memref.load %arg1[%c30] : memref<238xf32, #tpu.memory_space<smem>>
    %c31 = arith.constant 31 : index
    %31 = memref.load %arg1[%c31] : memref<238xf32, #tpu.memory_space<smem>>
    %c32 = arith.constant 32 : index
    %32 = memref.load %arg1[%c32] : memref<238xf32, #tpu.memory_space<smem>>
    %c33 = arith.constant 33 : index
    %33 = memref.load %arg1[%c33] : memref<238xf32, #tpu.memory_space<smem>>
    %c34 = arith.constant 34 : index
    %34 = memref.load %arg1[%c34] : memref<238xf32, #tpu.memory_space<smem>>
    %c35 = arith.constant 35 : index
    %35 = memref.load %arg1[%c35] : memref<238xf32, #tpu.memory_space<smem>>
    %c36 = arith.constant 36 : index
    %36 = memref.load %arg1[%c36] : memref<238xf32, #tpu.memory_space<smem>>
    %c37 = arith.constant 37 : index
    %37 = memref.load %arg1[%c37] : memref<238xf32, #tpu.memory_space<smem>>
    %c38 = arith.constant 38 : index
    %38 = memref.load %arg1[%c38] : memref<238xf32, #tpu.memory_space<smem>>
    %c39 = arith.constant 39 : index
    %39 = memref.load %arg1[%c39] : memref<238xf32, #tpu.memory_space<smem>>
    %c40 = arith.constant 40 : index
    %40 = memref.load %arg1[%c40] : memref<238xf32, #tpu.memory_space<smem>>
    %c41 = arith.constant 41 : index
    %41 = memref.load %arg1[%c41] : memref<238xf32, #tpu.memory_space<smem>>
    %c42 = arith.constant 42 : index
    %42 = memref.load %arg1[%c42] : memref<238xf32, #tpu.memory_space<smem>>
    %c43 = arith.constant 43 : index
    %43 = memref.load %arg1[%c43] : memref<238xf32, #tpu.memory_space<smem>>
    %c44 = arith.constant 44 : index
    %44 = memref.load %arg1[%c44] : memref<238xf32, #tpu.memory_space<smem>>
    %c45 = arith.constant 45 : index
    %45 = memref.load %arg1[%c45] : memref<238xf32, #tpu.memory_space<smem>>
    %c46 = arith.constant 46 : index
    %46 = memref.load %arg1[%c46] : memref<238xf32, #tpu.memory_space<smem>>
    %c47 = arith.constant 47 : index
    %47 = memref.load %arg1[%c47] : memref<238xf32, #tpu.memory_space<smem>>
    %c48 = arith.constant 48 : index
    %48 = memref.load %arg1[%c48] : memref<238xf32, #tpu.memory_space<smem>>
    %c49 = arith.constant 49 : index
    %49 = memref.load %arg1[%c49] : memref<238xf32, #tpu.memory_space<smem>>
    %c50 = arith.constant 50 : index
    %50 = memref.load %arg1[%c50] : memref<238xf32, #tpu.memory_space<smem>>
    %c51 = arith.constant 51 : index
    %51 = memref.load %arg1[%c51] : memref<238xf32, #tpu.memory_space<smem>>
    %c52 = arith.constant 52 : index
    %52 = memref.load %arg1[%c52] : memref<238xf32, #tpu.memory_space<smem>>
    %c53 = arith.constant 53 : index
    %53 = memref.load %arg1[%c53] : memref<238xf32, #tpu.memory_space<smem>>
    %c54 = arith.constant 54 : index
    %54 = memref.load %arg1[%c54] : memref<238xf32, #tpu.memory_space<smem>>
    %c55 = arith.constant 55 : index
    %55 = memref.load %arg1[%c55] : memref<238xf32, #tpu.memory_space<smem>>
    %c56 = arith.constant 56 : index
    %56 = memref.load %arg1[%c56] : memref<238xf32, #tpu.memory_space<smem>>
    %c57 = arith.constant 57 : index
    %57 = memref.load %arg1[%c57] : memref<238xf32, #tpu.memory_space<smem>>
    %c58 = arith.constant 58 : index
    %58 = memref.load %arg1[%c58] : memref<238xf32, #tpu.memory_space<smem>>
    %c59 = arith.constant 59 : index
    %59 = memref.load %arg1[%c59] : memref<238xf32, #tpu.memory_space<smem>>
    %c60 = arith.constant 60 : index
    %60 = memref.load %arg1[%c60] : memref<238xf32, #tpu.memory_space<smem>>
    %c61 = arith.constant 61 : index
    %61 = memref.load %arg1[%c61] : memref<238xf32, #tpu.memory_space<smem>>
    %c62 = arith.constant 62 : index
    %62 = memref.load %arg1[%c62] : memref<238xf32, #tpu.memory_space<smem>>
    %c63 = arith.constant 63 : index
    %63 = memref.load %arg1[%c63] : memref<238xf32, #tpu.memory_space<smem>>
    %c64 = arith.constant 64 : index
    %64 = memref.load %arg1[%c64] : memref<238xf32, #tpu.memory_space<smem>>
    %c65 = arith.constant 65 : index
    %65 = memref.load %arg1[%c65] : memref<238xf32, #tpu.memory_space<smem>>
    %c66 = arith.constant 66 : index
    %66 = memref.load %arg1[%c66] : memref<238xf32, #tpu.memory_space<smem>>
    %c67 = arith.constant 67 : index
    %67 = memref.load %arg1[%c67] : memref<238xf32, #tpu.memory_space<smem>>
    %c68 = arith.constant 68 : index
    %68 = memref.load %arg1[%c68] : memref<238xf32, #tpu.memory_space<smem>>
    %c69 = arith.constant 69 : index
    %69 = memref.load %arg1[%c69] : memref<238xf32, #tpu.memory_space<smem>>
    %c70 = arith.constant 70 : index
    %70 = memref.load %arg1[%c70] : memref<238xf32, #tpu.memory_space<smem>>
    %c71 = arith.constant 71 : index
    %71 = memref.load %arg1[%c71] : memref<238xf32, #tpu.memory_space<smem>>
    %c72 = arith.constant 72 : index
    %72 = memref.load %arg1[%c72] : memref<238xf32, #tpu.memory_space<smem>>
    %c73 = arith.constant 73 : index
    %73 = memref.load %arg1[%c73] : memref<238xf32, #tpu.memory_space<smem>>
    %c74 = arith.constant 74 : index
    %74 = memref.load %arg1[%c74] : memref<238xf32, #tpu.memory_space<smem>>
    %c75 = arith.constant 75 : index
    %75 = memref.load %arg1[%c75] : memref<238xf32, #tpu.memory_space<smem>>
    %c76 = arith.constant 76 : index
    %76 = memref.load %arg1[%c76] : memref<238xf32, #tpu.memory_space<smem>>
    %c77 = arith.constant 77 : index
    %77 = memref.load %arg1[%c77] : memref<238xf32, #tpu.memory_space<smem>>
    %c78 = arith.constant 78 : index
    %78 = memref.load %arg1[%c78] : memref<238xf32, #tpu.memory_space<smem>>
    %c79 = arith.constant 79 : index
    %79 = memref.load %arg1[%c79] : memref<238xf32, #tpu.memory_space<smem>>
    %c80 = arith.constant 80 : index
    %80 = memref.load %arg1[%c80] : memref<238xf32, #tpu.memory_space<smem>>
    %c81 = arith.constant 81 : index
    %81 = memref.load %arg1[%c81] : memref<238xf32, #tpu.memory_space<smem>>
    %c82 = arith.constant 82 : index
    %82 = memref.load %arg1[%c82] : memref<238xf32, #tpu.memory_space<smem>>
    %c83 = arith.constant 83 : index
    %83 = memref.load %arg1[%c83] : memref<238xf32, #tpu.memory_space<smem>>
    %c84 = arith.constant 84 : index
    %84 = memref.load %arg1[%c84] : memref<238xf32, #tpu.memory_space<smem>>
    %c85 = arith.constant 85 : index
    %85 = memref.load %arg1[%c85] : memref<238xf32, #tpu.memory_space<smem>>
    %c86 = arith.constant 86 : index
    %86 = memref.load %arg1[%c86] : memref<238xf32, #tpu.memory_space<smem>>
    %c87 = arith.constant 87 : index
    %87 = memref.load %arg1[%c87] : memref<238xf32, #tpu.memory_space<smem>>
    %c88 = arith.constant 88 : index
    %88 = memref.load %arg1[%c88] : memref<238xf32, #tpu.memory_space<smem>>
    %c89 = arith.constant 89 : index
    %89 = memref.load %arg1[%c89] : memref<238xf32, #tpu.memory_space<smem>>
    %c90 = arith.constant 90 : index
    %90 = memref.load %arg1[%c90] : memref<238xf32, #tpu.memory_space<smem>>
    %c91 = arith.constant 91 : index
    %91 = memref.load %arg1[%c91] : memref<238xf32, #tpu.memory_space<smem>>
    %c92 = arith.constant 92 : index
    %92 = memref.load %arg1[%c92] : memref<238xf32, #tpu.memory_space<smem>>
    %c93 = arith.constant 93 : index
    %93 = memref.load %arg1[%c93] : memref<238xf32, #tpu.memory_space<smem>>
    %c94 = arith.constant 94 : index
    %94 = memref.load %arg1[%c94] : memref<238xf32, #tpu.memory_space<smem>>
    %c95 = arith.constant 95 : index
    %95 = memref.load %arg1[%c95] : memref<238xf32, #tpu.memory_space<smem>>
    %c96 = arith.constant 96 : index
    %96 = memref.load %arg1[%c96] : memref<238xf32, #tpu.memory_space<smem>>
    %c97 = arith.constant 97 : index
    %97 = memref.load %arg1[%c97] : memref<238xf32, #tpu.memory_space<smem>>
    %c98 = arith.constant 98 : index
    %98 = memref.load %arg1[%c98] : memref<238xf32, #tpu.memory_space<smem>>
    %c99 = arith.constant 99 : index
    %99 = memref.load %arg1[%c99] : memref<238xf32, #tpu.memory_space<smem>>
    %c100 = arith.constant 100 : index
    %100 = memref.load %arg1[%c100] : memref<238xf32, #tpu.memory_space<smem>>
    %c101 = arith.constant 101 : index
    %101 = memref.load %arg1[%c101] : memref<238xf32, #tpu.memory_space<smem>>
    %c102 = arith.constant 102 : index
    %102 = memref.load %arg1[%c102] : memref<238xf32, #tpu.memory_space<smem>>
    %c103 = arith.constant 103 : index
    %103 = memref.load %arg1[%c103] : memref<238xf32, #tpu.memory_space<smem>>
    %c104 = arith.constant 104 : index
    %104 = memref.load %arg1[%c104] : memref<238xf32, #tpu.memory_space<smem>>
    %c105 = arith.constant 105 : index
    %105 = memref.load %arg1[%c105] : memref<238xf32, #tpu.memory_space<smem>>
    %c106 = arith.constant 106 : index
    %106 = memref.load %arg1[%c106] : memref<238xf32, #tpu.memory_space<smem>>
    %c107 = arith.constant 107 : index
    %107 = memref.load %arg1[%c107] : memref<238xf32, #tpu.memory_space<smem>>
    %c108 = arith.constant 108 : index
    %108 = memref.load %arg1[%c108] : memref<238xf32, #tpu.memory_space<smem>>
    %c109 = arith.constant 109 : index
    %109 = memref.load %arg1[%c109] : memref<238xf32, #tpu.memory_space<smem>>
    %c110 = arith.constant 110 : index
    %110 = memref.load %arg1[%c110] : memref<238xf32, #tpu.memory_space<smem>>
    %c111 = arith.constant 111 : index
    %111 = memref.load %arg1[%c111] : memref<238xf32, #tpu.memory_space<smem>>
    %c112 = arith.constant 112 : index
    %112 = memref.load %arg1[%c112] : memref<238xf32, #tpu.memory_space<smem>>
    %c113 = arith.constant 113 : index
    %113 = memref.load %arg1[%c113] : memref<238xf32, #tpu.memory_space<smem>>
    %c114 = arith.constant 114 : index
    %114 = memref.load %arg1[%c114] : memref<238xf32, #tpu.memory_space<smem>>
    %c115 = arith.constant 115 : index
    %115 = memref.load %arg1[%c115] : memref<238xf32, #tpu.memory_space<smem>>
    %c116 = arith.constant 116 : index
    %116 = memref.load %arg1[%c116] : memref<238xf32, #tpu.memory_space<smem>>
    %c117 = arith.constant 117 : index
    %117 = memref.load %arg1[%c117] : memref<238xf32, #tpu.memory_space<smem>>
    %c118 = arith.constant 118 : index
    %118 = memref.load %arg1[%c118] : memref<238xf32, #tpu.memory_space<smem>>
    %c119 = arith.constant 119 : index
    %119 = memref.load %arg1[%c119] : memref<238xf32, #tpu.memory_space<smem>>
    %c120 = arith.constant 120 : index
    %120 = memref.load %arg1[%c120] : memref<238xf32, #tpu.memory_space<smem>>
    %c121 = arith.constant 121 : index
    %121 = memref.load %arg1[%c121] : memref<238xf32, #tpu.memory_space<smem>>
    %c122 = arith.constant 122 : index
    %122 = memref.load %arg1[%c122] : memref<238xf32, #tpu.memory_space<smem>>
    %c123 = arith.constant 123 : index
    %123 = memref.load %arg1[%c123] : memref<238xf32, #tpu.memory_space<smem>>
    %c124 = arith.constant 124 : index
    %124 = memref.load %arg1[%c124] : memref<238xf32, #tpu.memory_space<smem>>
    %c125 = arith.constant 125 : index
    %125 = memref.load %arg1[%c125] : memref<238xf32, #tpu.memory_space<smem>>
    %c126 = arith.constant 126 : index
    %126 = memref.load %arg1[%c126] : memref<238xf32, #tpu.memory_space<smem>>
    %c127 = arith.constant 127 : index
    %127 = memref.load %arg1[%c127] : memref<238xf32, #tpu.memory_space<smem>>
    %c128 = arith.constant 128 : index
    %128 = memref.load %arg1[%c128] : memref<238xf32, #tpu.memory_space<smem>>
    %c129 = arith.constant 129 : index
    %129 = memref.load %arg1[%c129] : memref<238xf32, #tpu.memory_space<smem>>
    %c130 = arith.constant 130 : index
    %130 = memref.load %arg1[%c130] : memref<238xf32, #tpu.memory_space<smem>>
    %c131 = arith.constant 131 : index
    %131 = memref.load %arg1[%c131] : memref<238xf32, #tpu.memory_space<smem>>
    %c132 = arith.constant 132 : index
    %132 = memref.load %arg1[%c132] : memref<238xf32, #tpu.memory_space<smem>>
    %c133 = arith.constant 133 : index
    %133 = memref.load %arg1[%c133] : memref<238xf32, #tpu.memory_space<smem>>
    %c134 = arith.constant 134 : index
    %134 = memref.load %arg1[%c134] : memref<238xf32, #tpu.memory_space<smem>>
    %c135 = arith.constant 135 : index
    %135 = memref.load %arg1[%c135] : memref<238xf32, #tpu.memory_space<smem>>
    %c136 = arith.constant 136 : index
    %136 = memref.load %arg1[%c136] : memref<238xf32, #tpu.memory_space<smem>>
    %c137 = arith.constant 137 : index
    %137 = memref.load %arg1[%c137] : memref<238xf32, #tpu.memory_space<smem>>
    %c138 = arith.constant 138 : index
    %138 = memref.load %arg1[%c138] : memref<238xf32, #tpu.memory_space<smem>>
    %c139 = arith.constant 139 : index
    %139 = memref.load %arg1[%c139] : memref<238xf32, #tpu.memory_space<smem>>
    %c140 = arith.constant 140 : index
    %140 = memref.load %arg1[%c140] : memref<238xf32, #tpu.memory_space<smem>>
    %c141 = arith.constant 141 : index
    %141 = memref.load %arg1[%c141] : memref<238xf32, #tpu.memory_space<smem>>
    %c142 = arith.constant 142 : index
    %142 = memref.load %arg1[%c142] : memref<238xf32, #tpu.memory_space<smem>>
    %c143 = arith.constant 143 : index
    %143 = memref.load %arg1[%c143] : memref<238xf32, #tpu.memory_space<smem>>
    %c144 = arith.constant 144 : index
    %144 = memref.load %arg1[%c144] : memref<238xf32, #tpu.memory_space<smem>>
    %c145 = arith.constant 145 : index
    %145 = memref.load %arg1[%c145] : memref<238xf32, #tpu.memory_space<smem>>
    %c146 = arith.constant 146 : index
    %146 = memref.load %arg1[%c146] : memref<238xf32, #tpu.memory_space<smem>>
    %c147 = arith.constant 147 : index
    %147 = memref.load %arg1[%c147] : memref<238xf32, #tpu.memory_space<smem>>
    %c148 = arith.constant 148 : index
    %148 = memref.load %arg1[%c148] : memref<238xf32, #tpu.memory_space<smem>>
    %c149 = arith.constant 149 : index
    %149 = memref.load %arg1[%c149] : memref<238xf32, #tpu.memory_space<smem>>
    %c150 = arith.constant 150 : index
    %150 = memref.load %arg1[%c150] : memref<238xf32, #tpu.memory_space<smem>>
    %c151 = arith.constant 151 : index
    %151 = memref.load %arg1[%c151] : memref<238xf32, #tpu.memory_space<smem>>
    %c152 = arith.constant 152 : index
    %152 = memref.load %arg1[%c152] : memref<238xf32, #tpu.memory_space<smem>>
    %c153 = arith.constant 153 : index
    %153 = memref.load %arg1[%c153] : memref<238xf32, #tpu.memory_space<smem>>
    %c154 = arith.constant 154 : index
    %154 = memref.load %arg1[%c154] : memref<238xf32, #tpu.memory_space<smem>>
    %c155 = arith.constant 155 : index
    %155 = memref.load %arg1[%c155] : memref<238xf32, #tpu.memory_space<smem>>
    %c156 = arith.constant 156 : index
    %156 = memref.load %arg1[%c156] : memref<238xf32, #tpu.memory_space<smem>>
    %c157 = arith.constant 157 : index
    %157 = memref.load %arg1[%c157] : memref<238xf32, #tpu.memory_space<smem>>
    %c158 = arith.constant 158 : index
    %158 = memref.load %arg1[%c158] : memref<238xf32, #tpu.memory_space<smem>>
    %c159 = arith.constant 159 : index
    %159 = memref.load %arg1[%c159] : memref<238xf32, #tpu.memory_space<smem>>
    %c160 = arith.constant 160 : index
    %160 = memref.load %arg1[%c160] : memref<238xf32, #tpu.memory_space<smem>>
    %c161 = arith.constant 161 : index
    %161 = memref.load %arg1[%c161] : memref<238xf32, #tpu.memory_space<smem>>
    %c162 = arith.constant 162 : index
    %162 = memref.load %arg1[%c162] : memref<238xf32, #tpu.memory_space<smem>>
    %c163 = arith.constant 163 : index
    %163 = memref.load %arg1[%c163] : memref<238xf32, #tpu.memory_space<smem>>
    %c164 = arith.constant 164 : index
    %164 = memref.load %arg1[%c164] : memref<238xf32, #tpu.memory_space<smem>>
    %c165 = arith.constant 165 : index
    %165 = memref.load %arg1[%c165] : memref<238xf32, #tpu.memory_space<smem>>
    %c166 = arith.constant 166 : index
    %166 = memref.load %arg1[%c166] : memref<238xf32, #tpu.memory_space<smem>>
    %c167 = arith.constant 167 : index
    %167 = memref.load %arg1[%c167] : memref<238xf32, #tpu.memory_space<smem>>
    %c168 = arith.constant 168 : index
    %168 = memref.load %arg1[%c168] : memref<238xf32, #tpu.memory_space<smem>>
    %c169 = arith.constant 169 : index
    %169 = memref.load %arg1[%c169] : memref<238xf32, #tpu.memory_space<smem>>
    %c170 = arith.constant 170 : index
    %170 = memref.load %arg1[%c170] : memref<238xf32, #tpu.memory_space<smem>>
    %c171 = arith.constant 171 : index
    %171 = memref.load %arg1[%c171] : memref<238xf32, #tpu.memory_space<smem>>
    %c172 = arith.constant 172 : index
    %172 = memref.load %arg1[%c172] : memref<238xf32, #tpu.memory_space<smem>>
    %c173 = arith.constant 173 : index
    %173 = memref.load %arg1[%c173] : memref<238xf32, #tpu.memory_space<smem>>
    %c174 = arith.constant 174 : index
    %174 = memref.load %arg1[%c174] : memref<238xf32, #tpu.memory_space<smem>>
    %c175 = arith.constant 175 : index
    %175 = memref.load %arg1[%c175] : memref<238xf32, #tpu.memory_space<smem>>
    %c176 = arith.constant 176 : index
    %176 = memref.load %arg1[%c176] : memref<238xf32, #tpu.memory_space<smem>>
    %c177 = arith.constant 177 : index
    %177 = memref.load %arg1[%c177] : memref<238xf32, #tpu.memory_space<smem>>
    %c178 = arith.constant 178 : index
    %178 = memref.load %arg1[%c178] : memref<238xf32, #tpu.memory_space<smem>>
    %c179 = arith.constant 179 : index
    %179 = memref.load %arg1[%c179] : memref<238xf32, #tpu.memory_space<smem>>
    %c180 = arith.constant 180 : index
    %180 = memref.load %arg1[%c180] : memref<238xf32, #tpu.memory_space<smem>>
    %c181 = arith.constant 181 : index
    %181 = memref.load %arg1[%c181] : memref<238xf32, #tpu.memory_space<smem>>
    %c182 = arith.constant 182 : index
    %182 = memref.load %arg1[%c182] : memref<238xf32, #tpu.memory_space<smem>>
    %c183 = arith.constant 183 : index
    %183 = memref.load %arg1[%c183] : memref<238xf32, #tpu.memory_space<smem>>
    %c184 = arith.constant 184 : index
    %184 = memref.load %arg1[%c184] : memref<238xf32, #tpu.memory_space<smem>>
    %c185 = arith.constant 185 : index
    %185 = memref.load %arg1[%c185] : memref<238xf32, #tpu.memory_space<smem>>
    %c186 = arith.constant 186 : index
    %186 = memref.load %arg1[%c186] : memref<238xf32, #tpu.memory_space<smem>>
    %c187 = arith.constant 187 : index
    %187 = memref.load %arg1[%c187] : memref<238xf32, #tpu.memory_space<smem>>
    %c188 = arith.constant 188 : index
    %188 = memref.load %arg1[%c188] : memref<238xf32, #tpu.memory_space<smem>>
    %c189 = arith.constant 189 : index
    %189 = memref.load %arg1[%c189] : memref<238xf32, #tpu.memory_space<smem>>
    %c190 = arith.constant 190 : index
    %190 = memref.load %arg1[%c190] : memref<238xf32, #tpu.memory_space<smem>>
    %c191 = arith.constant 191 : index
    %191 = memref.load %arg1[%c191] : memref<238xf32, #tpu.memory_space<smem>>
    %c192 = arith.constant 192 : index
    %192 = memref.load %arg1[%c192] : memref<238xf32, #tpu.memory_space<smem>>
    %c193 = arith.constant 193 : index
    %193 = memref.load %arg1[%c193] : memref<238xf32, #tpu.memory_space<smem>>
    %c194 = arith.constant 194 : index
    %194 = memref.load %arg1[%c194] : memref<238xf32, #tpu.memory_space<smem>>
    %c195 = arith.constant 195 : index
    %195 = memref.load %arg1[%c195] : memref<238xf32, #tpu.memory_space<smem>>
    %c196 = arith.constant 196 : index
    %196 = memref.load %arg1[%c196] : memref<238xf32, #tpu.memory_space<smem>>
    %c197 = arith.constant 197 : index
    %197 = memref.load %arg1[%c197] : memref<238xf32, #tpu.memory_space<smem>>
    %c198 = arith.constant 198 : index
    %198 = memref.load %arg1[%c198] : memref<238xf32, #tpu.memory_space<smem>>
    %c199 = arith.constant 199 : index
    %199 = memref.load %arg1[%c199] : memref<238xf32, #tpu.memory_space<smem>>
    %c200 = arith.constant 200 : index
    %200 = memref.load %arg1[%c200] : memref<238xf32, #tpu.memory_space<smem>>
    %c201 = arith.constant 201 : index
    %201 = memref.load %arg1[%c201] : memref<238xf32, #tpu.memory_space<smem>>
    %c202 = arith.constant 202 : index
    %202 = memref.load %arg1[%c202] : memref<238xf32, #tpu.memory_space<smem>>
    %c203 = arith.constant 203 : index
    %203 = memref.load %arg1[%c203] : memref<238xf32, #tpu.memory_space<smem>>
    %c204 = arith.constant 204 : index
    %204 = memref.load %arg1[%c204] : memref<238xf32, #tpu.memory_space<smem>>
    %c205 = arith.constant 205 : index
    %205 = memref.load %arg1[%c205] : memref<238xf32, #tpu.memory_space<smem>>
    %c206 = arith.constant 206 : index
    %206 = memref.load %arg1[%c206] : memref<238xf32, #tpu.memory_space<smem>>
    %c207 = arith.constant 207 : index
    %207 = memref.load %arg1[%c207] : memref<238xf32, #tpu.memory_space<smem>>
    %c208 = arith.constant 208 : index
    %208 = memref.load %arg1[%c208] : memref<238xf32, #tpu.memory_space<smem>>
    %c209 = arith.constant 209 : index
    %209 = memref.load %arg1[%c209] : memref<238xf32, #tpu.memory_space<smem>>
    %c210 = arith.constant 210 : index
    %210 = memref.load %arg1[%c210] : memref<238xf32, #tpu.memory_space<smem>>
    %c211 = arith.constant 211 : index
    %211 = memref.load %arg1[%c211] : memref<238xf32, #tpu.memory_space<smem>>
    %c212 = arith.constant 212 : index
    %212 = memref.load %arg1[%c212] : memref<238xf32, #tpu.memory_space<smem>>
    %c213 = arith.constant 213 : index
    %213 = memref.load %arg1[%c213] : memref<238xf32, #tpu.memory_space<smem>>
    %c214 = arith.constant 214 : index
    %214 = memref.load %arg1[%c214] : memref<238xf32, #tpu.memory_space<smem>>
    %c215 = arith.constant 215 : index
    %215 = memref.load %arg1[%c215] : memref<238xf32, #tpu.memory_space<smem>>
    %c216 = arith.constant 216 : index
    %216 = memref.load %arg1[%c216] : memref<238xf32, #tpu.memory_space<smem>>
    %c217 = arith.constant 217 : index
    %217 = memref.load %arg1[%c217] : memref<238xf32, #tpu.memory_space<smem>>
    %c218 = arith.constant 218 : index
    %218 = memref.load %arg1[%c218] : memref<238xf32, #tpu.memory_space<smem>>
    %c219 = arith.constant 219 : index
    %219 = memref.load %arg1[%c219] : memref<238xf32, #tpu.memory_space<smem>>
    %c220 = arith.constant 220 : index
    %220 = memref.load %arg1[%c220] : memref<238xf32, #tpu.memory_space<smem>>
    %c221 = arith.constant 221 : index
    %221 = memref.load %arg1[%c221] : memref<238xf32, #tpu.memory_space<smem>>
    %c222 = arith.constant 222 : index
    %222 = memref.load %arg1[%c222] : memref<238xf32, #tpu.memory_space<smem>>
    %c223 = arith.constant 223 : index
    %223 = memref.load %arg1[%c223] : memref<238xf32, #tpu.memory_space<smem>>
    %c224 = arith.constant 224 : index
    %224 = memref.load %arg1[%c224] : memref<238xf32, #tpu.memory_space<smem>>
    %c225 = arith.constant 225 : index
    %225 = memref.load %arg1[%c225] : memref<238xf32, #tpu.memory_space<smem>>
    %c226 = arith.constant 226 : index
    %226 = memref.load %arg1[%c226] : memref<238xf32, #tpu.memory_space<smem>>
    %c227 = arith.constant 227 : index
    %227 = memref.load %arg1[%c227] : memref<238xf32, #tpu.memory_space<smem>>
    %c228 = arith.constant 228 : index
    %228 = memref.load %arg1[%c228] : memref<238xf32, #tpu.memory_space<smem>>
    %c229 = arith.constant 229 : index
    %229 = memref.load %arg1[%c229] : memref<238xf32, #tpu.memory_space<smem>>
    %c230 = arith.constant 230 : index
    %230 = memref.load %arg1[%c230] : memref<238xf32, #tpu.memory_space<smem>>
    %c231 = arith.constant 231 : index
    %231 = memref.load %arg1[%c231] : memref<238xf32, #tpu.memory_space<smem>>
    %c232 = arith.constant 232 : index
    %232 = memref.load %arg1[%c232] : memref<238xf32, #tpu.memory_space<smem>>
    %c233 = arith.constant 233 : index
    %233 = memref.load %arg1[%c233] : memref<238xf32, #tpu.memory_space<smem>>
    %c234 = arith.constant 234 : index
    %234 = memref.load %arg1[%c234] : memref<238xf32, #tpu.memory_space<smem>>
    %c235 = arith.constant 235 : index
    %235 = memref.load %arg1[%c235] : memref<238xf32, #tpu.memory_space<smem>>
    %c236 = arith.constant 236 : index
    %236 = memref.load %arg1[%c236] : memref<238xf32, #tpu.memory_space<smem>>
    %c237 = arith.constant 237 : index
    %237 = memref.load %arg1[%c237] : memref<238xf32, #tpu.memory_space<smem>>
    %c0_0 = arith.constant 0 : index
    %c0_1 = arith.constant 0 : index
    %c0_2 = arith.constant 0 : index
    %238 = vector.load %arg2[%c0_0, %c0_1, %c0_2] : memref<4x8x256xf32, #tpu.memory_space<vmem>>, vector<1x8x256xf32>
    %239 = vector.shape_cast %238 : vector<1x8x256xf32> to vector<8x256xf32>
    %c1_3 = arith.constant 1 : index
    %c0_4 = arith.constant 0 : index
    %c0_5 = arith.constant 0 : index
    %240 = vector.load %arg2[%c1_3, %c0_4, %c0_5] : memref<4x8x256xf32, #tpu.memory_space<vmem>>, vector<1x8x256xf32>
    %241 = vector.shape_cast %240 : vector<1x8x256xf32> to vector<8x256xf32>
    %c2_6 = arith.constant 2 : index
    %c0_7 = arith.constant 0 : index
    %c0_8 = arith.constant 0 : index
    %242 = vector.load %arg2[%c2_6, %c0_7, %c0_8] : memref<4x8x256xf32, #tpu.memory_space<vmem>>, vector<1x8x256xf32>
    %243 = vector.shape_cast %242 : vector<1x8x256xf32> to vector<8x256xf32>
    %c3_9 = arith.constant 3 : index
    %c0_10 = arith.constant 0 : index
    %c0_11 = arith.constant 0 : index
    %244 = vector.load %arg2[%c3_9, %c0_10, %c0_11] : memref<4x8x256xf32, #tpu.memory_space<vmem>>, vector<1x8x256xf32>
    %245 = vector.shape_cast %244 : vector<1x8x256xf32> to vector<8x256xf32>
    %246 = vector.broadcast %0 : f32 to vector<8x256xf32>
    %247 = arith.mulf %239, %246 : vector<8x256xf32>
    %248 = vector.broadcast %8 : f32 to vector<8x256xf32>
    %249 = arith.mulf %241, %248 : vector<8x256xf32>
    %250 = arith.addf %247, %249 : vector<8x256xf32>
    %251 = vector.broadcast %16 : f32 to vector<8x256xf32>
    %252 = arith.mulf %243, %251 : vector<8x256xf32>
    %253 = arith.addf %250, %252 : vector<8x256xf32>
    %254 = vector.broadcast %24 : f32 to vector<8x256xf32>
    %255 = arith.mulf %245, %254 : vector<8x256xf32>
    %256 = arith.addf %253, %255 : vector<8x256xf32>
    %257 = vector.broadcast %32 : f32 to vector<8x256xf32>
    %258 = arith.addf %256, %257 : vector<8x256xf32>
    %cst = arith.constant 0.000000e+00 : f32
    %259 = vector.broadcast %cst : f32 to vector<8x256xf32>
    %260 = arith.maximumf %258, %259 : vector<8x256xf32>
    %261 = vector.broadcast %1 : f32 to vector<8x256xf32>
    %262 = arith.mulf %239, %261 : vector<8x256xf32>
    %263 = vector.broadcast %9 : f32 to vector<8x256xf32>
    %264 = arith.mulf %241, %263 : vector<8x256xf32>
    %265 = arith.addf %262, %264 : vector<8x256xf32>
    %266 = vector.broadcast %17 : f32 to vector<8x256xf32>
    %267 = arith.mulf %243, %266 : vector<8x256xf32>
    %268 = arith.addf %265, %267 : vector<8x256xf32>
    %269 = vector.broadcast %25 : f32 to vector<8x256xf32>
    %270 = arith.mulf %245, %269 : vector<8x256xf32>
    %271 = arith.addf %268, %270 : vector<8x256xf32>
    %272 = vector.broadcast %33 : f32 to vector<8x256xf32>
    %273 = arith.addf %271, %272 : vector<8x256xf32>
    %cst_12 = arith.constant 0.000000e+00 : f32
    %274 = vector.broadcast %cst_12 : f32 to vector<8x256xf32>
    %275 = arith.maximumf %273, %274 : vector<8x256xf32>
    %276 = vector.broadcast %2 : f32 to vector<8x256xf32>
    %277 = arith.mulf %239, %276 : vector<8x256xf32>
    %278 = vector.broadcast %10 : f32 to vector<8x256xf32>
    %279 = arith.mulf %241, %278 : vector<8x256xf32>
    %280 = arith.addf %277, %279 : vector<8x256xf32>
    %281 = vector.broadcast %18 : f32 to vector<8x256xf32>
    %282 = arith.mulf %243, %281 : vector<8x256xf32>
    %283 = arith.addf %280, %282 : vector<8x256xf32>
    %284 = vector.broadcast %26 : f32 to vector<8x256xf32>
    %285 = arith.mulf %245, %284 : vector<8x256xf32>
    %286 = arith.addf %283, %285 : vector<8x256xf32>
    %287 = vector.broadcast %34 : f32 to vector<8x256xf32>
    %288 = arith.addf %286, %287 : vector<8x256xf32>
    %cst_13 = arith.constant 0.000000e+00 : f32
    %289 = vector.broadcast %cst_13 : f32 to vector<8x256xf32>
    %290 = arith.maximumf %288, %289 : vector<8x256xf32>
    %291 = vector.broadcast %3 : f32 to vector<8x256xf32>
    %292 = arith.mulf %239, %291 : vector<8x256xf32>
    %293 = vector.broadcast %11 : f32 to vector<8x256xf32>
    %294 = arith.mulf %241, %293 : vector<8x256xf32>
    %295 = arith.addf %292, %294 : vector<8x256xf32>
    %296 = vector.broadcast %19 : f32 to vector<8x256xf32>
    %297 = arith.mulf %243, %296 : vector<8x256xf32>
    %298 = arith.addf %295, %297 : vector<8x256xf32>
    %299 = vector.broadcast %27 : f32 to vector<8x256xf32>
    %300 = arith.mulf %245, %299 : vector<8x256xf32>
    %301 = arith.addf %298, %300 : vector<8x256xf32>
    %302 = vector.broadcast %35 : f32 to vector<8x256xf32>
    %303 = arith.addf %301, %302 : vector<8x256xf32>
    %cst_14 = arith.constant 0.000000e+00 : f32
    %304 = vector.broadcast %cst_14 : f32 to vector<8x256xf32>
    %305 = arith.maximumf %303, %304 : vector<8x256xf32>
    %306 = vector.broadcast %4 : f32 to vector<8x256xf32>
    %307 = arith.mulf %239, %306 : vector<8x256xf32>
    %308 = vector.broadcast %12 : f32 to vector<8x256xf32>
    %309 = arith.mulf %241, %308 : vector<8x256xf32>
    %310 = arith.addf %307, %309 : vector<8x256xf32>
    %311 = vector.broadcast %20 : f32 to vector<8x256xf32>
    %312 = arith.mulf %243, %311 : vector<8x256xf32>
    %313 = arith.addf %310, %312 : vector<8x256xf32>
    %314 = vector.broadcast %28 : f32 to vector<8x256xf32>
    %315 = arith.mulf %245, %314 : vector<8x256xf32>
    %316 = arith.addf %313, %315 : vector<8x256xf32>
    %317 = vector.broadcast %36 : f32 to vector<8x256xf32>
    %318 = arith.addf %316, %317 : vector<8x256xf32>
    %cst_15 = arith.constant 0.000000e+00 : f32
    %319 = vector.broadcast %cst_15 : f32 to vector<8x256xf32>
    %320 = arith.maximumf %318, %319 : vector<8x256xf32>
    %321 = vector.broadcast %5 : f32 to vector<8x256xf32>
    %322 = arith.mulf %239, %321 : vector<8x256xf32>
    %323 = vector.broadcast %13 : f32 to vector<8x256xf32>
    %324 = arith.mulf %241, %323 : vector<8x256xf32>
    %325 = arith.addf %322, %324 : vector<8x256xf32>
    %326 = vector.broadcast %21 : f32 to vector<8x256xf32>
    %327 = arith.mulf %243, %326 : vector<8x256xf32>
    %328 = arith.addf %325, %327 : vector<8x256xf32>
    %329 = vector.broadcast %29 : f32 to vector<8x256xf32>
    %330 = arith.mulf %245, %329 : vector<8x256xf32>
    %331 = arith.addf %328, %330 : vector<8x256xf32>
    %332 = vector.broadcast %37 : f32 to vector<8x256xf32>
    %333 = arith.addf %331, %332 : vector<8x256xf32>
    %cst_16 = arith.constant 0.000000e+00 : f32
    %334 = vector.broadcast %cst_16 : f32 to vector<8x256xf32>
    %335 = arith.maximumf %333, %334 : vector<8x256xf32>
    %336 = vector.broadcast %6 : f32 to vector<8x256xf32>
    %337 = arith.mulf %239, %336 : vector<8x256xf32>
    %338 = vector.broadcast %14 : f32 to vector<8x256xf32>
    %339 = arith.mulf %241, %338 : vector<8x256xf32>
    %340 = arith.addf %337, %339 : vector<8x256xf32>
    %341 = vector.broadcast %22 : f32 to vector<8x256xf32>
    %342 = arith.mulf %243, %341 : vector<8x256xf32>
    %343 = arith.addf %340, %342 : vector<8x256xf32>
    %344 = vector.broadcast %30 : f32 to vector<8x256xf32>
    %345 = arith.mulf %245, %344 : vector<8x256xf32>
    %346 = arith.addf %343, %345 : vector<8x256xf32>
    %347 = vector.broadcast %38 : f32 to vector<8x256xf32>
    %348 = arith.addf %346, %347 : vector<8x256xf32>
    %cst_17 = arith.constant 0.000000e+00 : f32
    %349 = vector.broadcast %cst_17 : f32 to vector<8x256xf32>
    %350 = arith.maximumf %348, %349 : vector<8x256xf32>
    %351 = vector.broadcast %7 : f32 to vector<8x256xf32>
    %352 = arith.mulf %239, %351 : vector<8x256xf32>
    %353 = vector.broadcast %15 : f32 to vector<8x256xf32>
    %354 = arith.mulf %241, %353 : vector<8x256xf32>
    %355 = arith.addf %352, %354 : vector<8x256xf32>
    %356 = vector.broadcast %23 : f32 to vector<8x256xf32>
    %357 = arith.mulf %243, %356 : vector<8x256xf32>
    %358 = arith.addf %355, %357 : vector<8x256xf32>
    %359 = vector.broadcast %31 : f32 to vector<8x256xf32>
    %360 = arith.mulf %245, %359 : vector<8x256xf32>
    %361 = arith.addf %358, %360 : vector<8x256xf32>
    %362 = vector.broadcast %39 : f32 to vector<8x256xf32>
    %363 = arith.addf %361, %362 : vector<8x256xf32>
    %cst_18 = arith.constant 0.000000e+00 : f32
    %364 = vector.broadcast %cst_18 : f32 to vector<8x256xf32>
    %365 = arith.maximumf %363, %364 : vector<8x256xf32>
    %366 = vector.broadcast %40 : f32 to vector<8x256xf32>
    %367 = arith.mulf %260, %366 : vector<8x256xf32>
    %368 = vector.broadcast %44 : f32 to vector<8x256xf32>
    %369 = arith.mulf %275, %368 : vector<8x256xf32>
    %370 = arith.addf %367, %369 : vector<8x256xf32>
    %371 = vector.broadcast %48 : f32 to vector<8x256xf32>
    %372 = arith.mulf %290, %371 : vector<8x256xf32>
    %373 = arith.addf %370, %372 : vector<8x256xf32>
    %374 = vector.broadcast %52 : f32 to vector<8x256xf32>
    %375 = arith.mulf %305, %374 : vector<8x256xf32>
    %376 = arith.addf %373, %375 : vector<8x256xf32>
    %377 = vector.broadcast %56 : f32 to vector<8x256xf32>
    %378 = arith.mulf %320, %377 : vector<8x256xf32>
    %379 = arith.addf %376, %378 : vector<8x256xf32>
    %380 = vector.broadcast %60 : f32 to vector<8x256xf32>
    %381 = arith.mulf %335, %380 : vector<8x256xf32>
    %382 = arith.addf %379, %381 : vector<8x256xf32>
    %383 = vector.broadcast %64 : f32 to vector<8x256xf32>
    %384 = arith.mulf %350, %383 : vector<8x256xf32>
    %385 = arith.addf %382, %384 : vector<8x256xf32>
    %386 = vector.broadcast %68 : f32 to vector<8x256xf32>
    %387 = arith.mulf %365, %386 : vector<8x256xf32>
    %388 = arith.addf %385, %387 : vector<8x256xf32>
    %389 = vector.broadcast %72 : f32 to vector<8x256xf32>
    %390 = arith.addf %388, %389 : vector<8x256xf32>
    %391 = vector.broadcast %41 : f32 to vector<8x256xf32>
    %392 = arith.mulf %260, %391 : vector<8x256xf32>
    %393 = vector.broadcast %45 : f32 to vector<8x256xf32>
    %394 = arith.mulf %275, %393 : vector<8x256xf32>
    %395 = arith.addf %392, %394 : vector<8x256xf32>
    %396 = vector.broadcast %49 : f32 to vector<8x256xf32>
    %397 = arith.mulf %290, %396 : vector<8x256xf32>
    %398 = arith.addf %395, %397 : vector<8x256xf32>
    %399 = vector.broadcast %53 : f32 to vector<8x256xf32>
    %400 = arith.mulf %305, %399 : vector<8x256xf32>
    %401 = arith.addf %398, %400 : vector<8x256xf32>
    %402 = vector.broadcast %57 : f32 to vector<8x256xf32>
    %403 = arith.mulf %320, %402 : vector<8x256xf32>
    %404 = arith.addf %401, %403 : vector<8x256xf32>
    %405 = vector.broadcast %61 : f32 to vector<8x256xf32>
    %406 = arith.mulf %335, %405 : vector<8x256xf32>
    %407 = arith.addf %404, %406 : vector<8x256xf32>
    %408 = vector.broadcast %65 : f32 to vector<8x256xf32>
    %409 = arith.mulf %350, %408 : vector<8x256xf32>
    %410 = arith.addf %407, %409 : vector<8x256xf32>
    %411 = vector.broadcast %69 : f32 to vector<8x256xf32>
    %412 = arith.mulf %365, %411 : vector<8x256xf32>
    %413 = arith.addf %410, %412 : vector<8x256xf32>
    %414 = vector.broadcast %73 : f32 to vector<8x256xf32>
    %415 = arith.addf %413, %414 : vector<8x256xf32>
    %416 = vector.broadcast %42 : f32 to vector<8x256xf32>
    %417 = arith.mulf %260, %416 : vector<8x256xf32>
    %418 = vector.broadcast %46 : f32 to vector<8x256xf32>
    %419 = arith.mulf %275, %418 : vector<8x256xf32>
    %420 = arith.addf %417, %419 : vector<8x256xf32>
    %421 = vector.broadcast %50 : f32 to vector<8x256xf32>
    %422 = arith.mulf %290, %421 : vector<8x256xf32>
    %423 = arith.addf %420, %422 : vector<8x256xf32>
    %424 = vector.broadcast %54 : f32 to vector<8x256xf32>
    %425 = arith.mulf %305, %424 : vector<8x256xf32>
    %426 = arith.addf %423, %425 : vector<8x256xf32>
    %427 = vector.broadcast %58 : f32 to vector<8x256xf32>
    %428 = arith.mulf %320, %427 : vector<8x256xf32>
    %429 = arith.addf %426, %428 : vector<8x256xf32>
    %430 = vector.broadcast %62 : f32 to vector<8x256xf32>
    %431 = arith.mulf %335, %430 : vector<8x256xf32>
    %432 = arith.addf %429, %431 : vector<8x256xf32>
    %433 = vector.broadcast %66 : f32 to vector<8x256xf32>
    %434 = arith.mulf %350, %433 : vector<8x256xf32>
    %435 = arith.addf %432, %434 : vector<8x256xf32>
    %436 = vector.broadcast %70 : f32 to vector<8x256xf32>
    %437 = arith.mulf %365, %436 : vector<8x256xf32>
    %438 = arith.addf %435, %437 : vector<8x256xf32>
    %439 = vector.broadcast %74 : f32 to vector<8x256xf32>
    %440 = arith.addf %438, %439 : vector<8x256xf32>
    %441 = vector.broadcast %43 : f32 to vector<8x256xf32>
    %442 = arith.mulf %260, %441 : vector<8x256xf32>
    %443 = vector.broadcast %47 : f32 to vector<8x256xf32>
    %444 = arith.mulf %275, %443 : vector<8x256xf32>
    %445 = arith.addf %442, %444 : vector<8x256xf32>
    %446 = vector.broadcast %51 : f32 to vector<8x256xf32>
    %447 = arith.mulf %290, %446 : vector<8x256xf32>
    %448 = arith.addf %445, %447 : vector<8x256xf32>
    %449 = vector.broadcast %55 : f32 to vector<8x256xf32>
    %450 = arith.mulf %305, %449 : vector<8x256xf32>
    %451 = arith.addf %448, %450 : vector<8x256xf32>
    %452 = vector.broadcast %59 : f32 to vector<8x256xf32>
    %453 = arith.mulf %320, %452 : vector<8x256xf32>
    %454 = arith.addf %451, %453 : vector<8x256xf32>
    %455 = vector.broadcast %63 : f32 to vector<8x256xf32>
    %456 = arith.mulf %335, %455 : vector<8x256xf32>
    %457 = arith.addf %454, %456 : vector<8x256xf32>
    %458 = vector.broadcast %67 : f32 to vector<8x256xf32>
    %459 = arith.mulf %350, %458 : vector<8x256xf32>
    %460 = arith.addf %457, %459 : vector<8x256xf32>
    %461 = vector.broadcast %71 : f32 to vector<8x256xf32>
    %462 = arith.mulf %365, %461 : vector<8x256xf32>
    %463 = arith.addf %460, %462 : vector<8x256xf32>
    %464 = vector.broadcast %75 : f32 to vector<8x256xf32>
    %465 = arith.addf %463, %464 : vector<8x256xf32>
    %466 = vector.broadcast %76 : f32 to vector<8x256xf32>
    %467 = arith.mulf %239, %466 : vector<8x256xf32>
    %468 = vector.broadcast %84 : f32 to vector<8x256xf32>
    %469 = arith.mulf %241, %468 : vector<8x256xf32>
    %470 = arith.addf %467, %469 : vector<8x256xf32>
    %471 = vector.broadcast %92 : f32 to vector<8x256xf32>
    %472 = arith.mulf %243, %471 : vector<8x256xf32>
    %473 = arith.addf %470, %472 : vector<8x256xf32>
    %474 = vector.broadcast %100 : f32 to vector<8x256xf32>
    %475 = arith.mulf %245, %474 : vector<8x256xf32>
    %476 = arith.addf %473, %475 : vector<8x256xf32>
    %477 = vector.broadcast %108 : f32 to vector<8x256xf32>
    %478 = arith.addf %476, %477 : vector<8x256xf32>
    %cst_19 = arith.constant 0.000000e+00 : f32
    %479 = vector.broadcast %cst_19 : f32 to vector<8x256xf32>
    %480 = arith.maximumf %478, %479 : vector<8x256xf32>
    %481 = vector.broadcast %77 : f32 to vector<8x256xf32>
    %482 = arith.mulf %239, %481 : vector<8x256xf32>
    %483 = vector.broadcast %85 : f32 to vector<8x256xf32>
    %484 = arith.mulf %241, %483 : vector<8x256xf32>
    %485 = arith.addf %482, %484 : vector<8x256xf32>
    %486 = vector.broadcast %93 : f32 to vector<8x256xf32>
    %487 = arith.mulf %243, %486 : vector<8x256xf32>
    %488 = arith.addf %485, %487 : vector<8x256xf32>
    %489 = vector.broadcast %101 : f32 to vector<8x256xf32>
    %490 = arith.mulf %245, %489 : vector<8x256xf32>
    %491 = arith.addf %488, %490 : vector<8x256xf32>
    %492 = vector.broadcast %109 : f32 to vector<8x256xf32>
    %493 = arith.addf %491, %492 : vector<8x256xf32>
    %cst_20 = arith.constant 0.000000e+00 : f32
    %494 = vector.broadcast %cst_20 : f32 to vector<8x256xf32>
    %495 = arith.maximumf %493, %494 : vector<8x256xf32>
    %496 = vector.broadcast %78 : f32 to vector<8x256xf32>
    %497 = arith.mulf %239, %496 : vector<8x256xf32>
    %498 = vector.broadcast %86 : f32 to vector<8x256xf32>
    %499 = arith.mulf %241, %498 : vector<8x256xf32>
    %500 = arith.addf %497, %499 : vector<8x256xf32>
    %501 = vector.broadcast %94 : f32 to vector<8x256xf32>
    %502 = arith.mulf %243, %501 : vector<8x256xf32>
    %503 = arith.addf %500, %502 : vector<8x256xf32>
    %504 = vector.broadcast %102 : f32 to vector<8x256xf32>
    %505 = arith.mulf %245, %504 : vector<8x256xf32>
    %506 = arith.addf %503, %505 : vector<8x256xf32>
    %507 = vector.broadcast %110 : f32 to vector<8x256xf32>
    %508 = arith.addf %506, %507 : vector<8x256xf32>
    %cst_21 = arith.constant 0.000000e+00 : f32
    %509 = vector.broadcast %cst_21 : f32 to vector<8x256xf32>
    %510 = arith.maximumf %508, %509 : vector<8x256xf32>
    %511 = vector.broadcast %79 : f32 to vector<8x256xf32>
    %512 = arith.mulf %239, %511 : vector<8x256xf32>
    %513 = vector.broadcast %87 : f32 to vector<8x256xf32>
    %514 = arith.mulf %241, %513 : vector<8x256xf32>
    %515 = arith.addf %512, %514 : vector<8x256xf32>
    %516 = vector.broadcast %95 : f32 to vector<8x256xf32>
    %517 = arith.mulf %243, %516 : vector<8x256xf32>
    %518 = arith.addf %515, %517 : vector<8x256xf32>
    %519 = vector.broadcast %103 : f32 to vector<8x256xf32>
    %520 = arith.mulf %245, %519 : vector<8x256xf32>
    %521 = arith.addf %518, %520 : vector<8x256xf32>
    %522 = vector.broadcast %111 : f32 to vector<8x256xf32>
    %523 = arith.addf %521, %522 : vector<8x256xf32>
    %cst_22 = arith.constant 0.000000e+00 : f32
    %524 = vector.broadcast %cst_22 : f32 to vector<8x256xf32>
    %525 = arith.maximumf %523, %524 : vector<8x256xf32>
    %526 = vector.broadcast %80 : f32 to vector<8x256xf32>
    %527 = arith.mulf %239, %526 : vector<8x256xf32>
    %528 = vector.broadcast %88 : f32 to vector<8x256xf32>
    %529 = arith.mulf %241, %528 : vector<8x256xf32>
    %530 = arith.addf %527, %529 : vector<8x256xf32>
    %531 = vector.broadcast %96 : f32 to vector<8x256xf32>
    %532 = arith.mulf %243, %531 : vector<8x256xf32>
    %533 = arith.addf %530, %532 : vector<8x256xf32>
    %534 = vector.broadcast %104 : f32 to vector<8x256xf32>
    %535 = arith.mulf %245, %534 : vector<8x256xf32>
    %536 = arith.addf %533, %535 : vector<8x256xf32>
    %537 = vector.broadcast %112 : f32 to vector<8x256xf32>
    %538 = arith.addf %536, %537 : vector<8x256xf32>
    %cst_23 = arith.constant 0.000000e+00 : f32
    %539 = vector.broadcast %cst_23 : f32 to vector<8x256xf32>
    %540 = arith.maximumf %538, %539 : vector<8x256xf32>
    %541 = vector.broadcast %81 : f32 to vector<8x256xf32>
    %542 = arith.mulf %239, %541 : vector<8x256xf32>
    %543 = vector.broadcast %89 : f32 to vector<8x256xf32>
    %544 = arith.mulf %241, %543 : vector<8x256xf32>
    %545 = arith.addf %542, %544 : vector<8x256xf32>
    %546 = vector.broadcast %97 : f32 to vector<8x256xf32>
    %547 = arith.mulf %243, %546 : vector<8x256xf32>
    %548 = arith.addf %545, %547 : vector<8x256xf32>
    %549 = vector.broadcast %105 : f32 to vector<8x256xf32>
    %550 = arith.mulf %245, %549 : vector<8x256xf32>
    %551 = arith.addf %548, %550 : vector<8x256xf32>
    %552 = vector.broadcast %113 : f32 to vector<8x256xf32>
    %553 = arith.addf %551, %552 : vector<8x256xf32>
    %cst_24 = arith.constant 0.000000e+00 : f32
    %554 = vector.broadcast %cst_24 : f32 to vector<8x256xf32>
    %555 = arith.maximumf %553, %554 : vector<8x256xf32>
    %556 = vector.broadcast %82 : f32 to vector<8x256xf32>
    %557 = arith.mulf %239, %556 : vector<8x256xf32>
    %558 = vector.broadcast %90 : f32 to vector<8x256xf32>
    %559 = arith.mulf %241, %558 : vector<8x256xf32>
    %560 = arith.addf %557, %559 : vector<8x256xf32>
    %561 = vector.broadcast %98 : f32 to vector<8x256xf32>
    %562 = arith.mulf %243, %561 : vector<8x256xf32>
    %563 = arith.addf %560, %562 : vector<8x256xf32>
    %564 = vector.broadcast %106 : f32 to vector<8x256xf32>
    %565 = arith.mulf %245, %564 : vector<8x256xf32>
    %566 = arith.addf %563, %565 : vector<8x256xf32>
    %567 = vector.broadcast %114 : f32 to vector<8x256xf32>
    %568 = arith.addf %566, %567 : vector<8x256xf32>
    %cst_25 = arith.constant 0.000000e+00 : f32
    %569 = vector.broadcast %cst_25 : f32 to vector<8x256xf32>
    %570 = arith.maximumf %568, %569 : vector<8x256xf32>
    %571 = vector.broadcast %83 : f32 to vector<8x256xf32>
    %572 = arith.mulf %239, %571 : vector<8x256xf32>
    %573 = vector.broadcast %91 : f32 to vector<8x256xf32>
    %574 = arith.mulf %241, %573 : vector<8x256xf32>
    %575 = arith.addf %572, %574 : vector<8x256xf32>
    %576 = vector.broadcast %99 : f32 to vector<8x256xf32>
    %577 = arith.mulf %243, %576 : vector<8x256xf32>
    %578 = arith.addf %575, %577 : vector<8x256xf32>
    %579 = vector.broadcast %107 : f32 to vector<8x256xf32>
    %580 = arith.mulf %245, %579 : vector<8x256xf32>
    %581 = arith.addf %578, %580 : vector<8x256xf32>
    %582 = vector.broadcast %115 : f32 to vector<8x256xf32>
    %583 = arith.addf %581, %582 : vector<8x256xf32>
    %cst_26 = arith.constant 0.000000e+00 : f32
    %584 = vector.broadcast %cst_26 : f32 to vector<8x256xf32>
    %585 = arith.maximumf %583, %584 : vector<8x256xf32>
    %586 = vector.broadcast %116 : f32 to vector<8x256xf32>
    %587 = arith.mulf %480, %586 : vector<8x256xf32>
    %588 = vector.broadcast %120 : f32 to vector<8x256xf32>
    %589 = arith.mulf %495, %588 : vector<8x256xf32>
    %590 = arith.addf %587, %589 : vector<8x256xf32>
    %591 = vector.broadcast %124 : f32 to vector<8x256xf32>
    %592 = arith.mulf %510, %591 : vector<8x256xf32>
    %593 = arith.addf %590, %592 : vector<8x256xf32>
    %594 = vector.broadcast %128 : f32 to vector<8x256xf32>
    %595 = arith.mulf %525, %594 : vector<8x256xf32>
    %596 = arith.addf %593, %595 : vector<8x256xf32>
    %597 = vector.broadcast %132 : f32 to vector<8x256xf32>
    %598 = arith.mulf %540, %597 : vector<8x256xf32>
    %599 = arith.addf %596, %598 : vector<8x256xf32>
    %600 = vector.broadcast %136 : f32 to vector<8x256xf32>
    %601 = arith.mulf %555, %600 : vector<8x256xf32>
    %602 = arith.addf %599, %601 : vector<8x256xf32>
    %603 = vector.broadcast %140 : f32 to vector<8x256xf32>
    %604 = arith.mulf %570, %603 : vector<8x256xf32>
    %605 = arith.addf %602, %604 : vector<8x256xf32>
    %606 = vector.broadcast %144 : f32 to vector<8x256xf32>
    %607 = arith.mulf %585, %606 : vector<8x256xf32>
    %608 = arith.addf %605, %607 : vector<8x256xf32>
    %609 = vector.broadcast %148 : f32 to vector<8x256xf32>
    %610 = arith.addf %608, %609 : vector<8x256xf32>
    %611 = vector.broadcast %117 : f32 to vector<8x256xf32>
    %612 = arith.mulf %480, %611 : vector<8x256xf32>
    %613 = vector.broadcast %121 : f32 to vector<8x256xf32>
    %614 = arith.mulf %495, %613 : vector<8x256xf32>
    %615 = arith.addf %612, %614 : vector<8x256xf32>
    %616 = vector.broadcast %125 : f32 to vector<8x256xf32>
    %617 = arith.mulf %510, %616 : vector<8x256xf32>
    %618 = arith.addf %615, %617 : vector<8x256xf32>
    %619 = vector.broadcast %129 : f32 to vector<8x256xf32>
    %620 = arith.mulf %525, %619 : vector<8x256xf32>
    %621 = arith.addf %618, %620 : vector<8x256xf32>
    %622 = vector.broadcast %133 : f32 to vector<8x256xf32>
    %623 = arith.mulf %540, %622 : vector<8x256xf32>
    %624 = arith.addf %621, %623 : vector<8x256xf32>
    %625 = vector.broadcast %137 : f32 to vector<8x256xf32>
    %626 = arith.mulf %555, %625 : vector<8x256xf32>
    %627 = arith.addf %624, %626 : vector<8x256xf32>
    %628 = vector.broadcast %141 : f32 to vector<8x256xf32>
    %629 = arith.mulf %570, %628 : vector<8x256xf32>
    %630 = arith.addf %627, %629 : vector<8x256xf32>
    %631 = vector.broadcast %145 : f32 to vector<8x256xf32>
    %632 = arith.mulf %585, %631 : vector<8x256xf32>
    %633 = arith.addf %630, %632 : vector<8x256xf32>
    %634 = vector.broadcast %149 : f32 to vector<8x256xf32>
    %635 = arith.addf %633, %634 : vector<8x256xf32>
    %636 = vector.broadcast %118 : f32 to vector<8x256xf32>
    %637 = arith.mulf %480, %636 : vector<8x256xf32>
    %638 = vector.broadcast %122 : f32 to vector<8x256xf32>
    %639 = arith.mulf %495, %638 : vector<8x256xf32>
    %640 = arith.addf %637, %639 : vector<8x256xf32>
    %641 = vector.broadcast %126 : f32 to vector<8x256xf32>
    %642 = arith.mulf %510, %641 : vector<8x256xf32>
    %643 = arith.addf %640, %642 : vector<8x256xf32>
    %644 = vector.broadcast %130 : f32 to vector<8x256xf32>
    %645 = arith.mulf %525, %644 : vector<8x256xf32>
    %646 = arith.addf %643, %645 : vector<8x256xf32>
    %647 = vector.broadcast %134 : f32 to vector<8x256xf32>
    %648 = arith.mulf %540, %647 : vector<8x256xf32>
    %649 = arith.addf %646, %648 : vector<8x256xf32>
    %650 = vector.broadcast %138 : f32 to vector<8x256xf32>
    %651 = arith.mulf %555, %650 : vector<8x256xf32>
    %652 = arith.addf %649, %651 : vector<8x256xf32>
    %653 = vector.broadcast %142 : f32 to vector<8x256xf32>
    %654 = arith.mulf %570, %653 : vector<8x256xf32>
    %655 = arith.addf %652, %654 : vector<8x256xf32>
    %656 = vector.broadcast %146 : f32 to vector<8x256xf32>
    %657 = arith.mulf %585, %656 : vector<8x256xf32>
    %658 = arith.addf %655, %657 : vector<8x256xf32>
    %659 = vector.broadcast %150 : f32 to vector<8x256xf32>
    %660 = arith.addf %658, %659 : vector<8x256xf32>
    %661 = vector.broadcast %119 : f32 to vector<8x256xf32>
    %662 = arith.mulf %480, %661 : vector<8x256xf32>
    %663 = vector.broadcast %123 : f32 to vector<8x256xf32>
    %664 = arith.mulf %495, %663 : vector<8x256xf32>
    %665 = arith.addf %662, %664 : vector<8x256xf32>
    %666 = vector.broadcast %127 : f32 to vector<8x256xf32>
    %667 = arith.mulf %510, %666 : vector<8x256xf32>
    %668 = arith.addf %665, %667 : vector<8x256xf32>
    %669 = vector.broadcast %131 : f32 to vector<8x256xf32>
    %670 = arith.mulf %525, %669 : vector<8x256xf32>
    %671 = arith.addf %668, %670 : vector<8x256xf32>
    %672 = vector.broadcast %135 : f32 to vector<8x256xf32>
    %673 = arith.mulf %540, %672 : vector<8x256xf32>
    %674 = arith.addf %671, %673 : vector<8x256xf32>
    %675 = vector.broadcast %139 : f32 to vector<8x256xf32>
    %676 = arith.mulf %555, %675 : vector<8x256xf32>
    %677 = arith.addf %674, %676 : vector<8x256xf32>
    %678 = vector.broadcast %143 : f32 to vector<8x256xf32>
    %679 = arith.mulf %570, %678 : vector<8x256xf32>
    %680 = arith.addf %677, %679 : vector<8x256xf32>
    %681 = vector.broadcast %147 : f32 to vector<8x256xf32>
    %682 = arith.mulf %585, %681 : vector<8x256xf32>
    %683 = arith.addf %680, %682 : vector<8x256xf32>
    %684 = vector.broadcast %151 : f32 to vector<8x256xf32>
    %685 = arith.addf %683, %684 : vector<8x256xf32>
    %c0_27 = arith.constant 0 : index
    %c0_28 = arith.constant 0 : index
    %c0_29 = arith.constant 0 : index
    %686 = vector.load %arg3[%c0_27, %c0_28, %c0_29] : memref<4x8x256xf32, #tpu.memory_space<vmem>>, vector<1x8x256xf32>
    %687 = vector.shape_cast %686 : vector<1x8x256xf32> to vector<8x256xf32>
    %c1_30 = arith.constant 1 : index
    %c0_31 = arith.constant 0 : index
    %c0_32 = arith.constant 0 : index
    %688 = vector.load %arg3[%c1_30, %c0_31, %c0_32] : memref<4x8x256xf32, #tpu.memory_space<vmem>>, vector<1x8x256xf32>
    %689 = vector.shape_cast %688 : vector<1x8x256xf32> to vector<8x256xf32>
    %c2_33 = arith.constant 2 : index
    %c0_34 = arith.constant 0 : index
    %c0_35 = arith.constant 0 : index
    %690 = vector.load %arg3[%c2_33, %c0_34, %c0_35] : memref<4x8x256xf32, #tpu.memory_space<vmem>>, vector<1x8x256xf32>
    %691 = vector.shape_cast %690 : vector<1x8x256xf32> to vector<8x256xf32>
    %c3_36 = arith.constant 3 : index
    %c0_37 = arith.constant 0 : index
    %c0_38 = arith.constant 0 : index
    %692 = vector.load %arg3[%c3_36, %c0_37, %c0_38] : memref<4x8x256xf32, #tpu.memory_space<vmem>>, vector<1x8x256xf32>
    %693 = vector.shape_cast %692 : vector<1x8x256xf32> to vector<8x256xf32>
    %694 = arith.mulf %687, %610 : vector<8x256xf32>
    %695 = arith.addf %390, %694 : vector<8x256xf32>
    %696 = arith.mulf %689, %635 : vector<8x256xf32>
    %697 = arith.addf %415, %696 : vector<8x256xf32>
    %698 = arith.mulf %691, %660 : vector<8x256xf32>
    %699 = arith.addf %440, %698 : vector<8x256xf32>
    %700 = arith.mulf %693, %685 : vector<8x256xf32>
    %701 = arith.addf %465, %700 : vector<8x256xf32>
    %702 = vector.broadcast %152 : f32 to vector<8x256xf32>
    %703 = arith.mulf %695, %702 : vector<8x256xf32>
    %704 = vector.broadcast %160 : f32 to vector<8x256xf32>
    %705 = arith.mulf %697, %704 : vector<8x256xf32>
    %706 = arith.addf %703, %705 : vector<8x256xf32>
    %707 = vector.broadcast %168 : f32 to vector<8x256xf32>
    %708 = arith.mulf %699, %707 : vector<8x256xf32>
    %709 = arith.addf %706, %708 : vector<8x256xf32>
    %710 = vector.broadcast %176 : f32 to vector<8x256xf32>
    %711 = arith.mulf %701, %710 : vector<8x256xf32>
    %712 = arith.addf %709, %711 : vector<8x256xf32>
    %713 = vector.broadcast %184 : f32 to vector<8x256xf32>
    %714 = arith.addf %712, %713 : vector<8x256xf32>
    %cst_39 = arith.constant 0.000000e+00 : f32
    %715 = vector.broadcast %cst_39 : f32 to vector<8x256xf32>
    %716 = arith.maximumf %714, %715 : vector<8x256xf32>
    %717 = vector.broadcast %153 : f32 to vector<8x256xf32>
    %718 = arith.mulf %695, %717 : vector<8x256xf32>
    %719 = vector.broadcast %161 : f32 to vector<8x256xf32>
    %720 = arith.mulf %697, %719 : vector<8x256xf32>
    %721 = arith.addf %718, %720 : vector<8x256xf32>
    %722 = vector.broadcast %169 : f32 to vector<8x256xf32>
    %723 = arith.mulf %699, %722 : vector<8x256xf32>
    %724 = arith.addf %721, %723 : vector<8x256xf32>
    %725 = vector.broadcast %177 : f32 to vector<8x256xf32>
    %726 = arith.mulf %701, %725 : vector<8x256xf32>
    %727 = arith.addf %724, %726 : vector<8x256xf32>
    %728 = vector.broadcast %185 : f32 to vector<8x256xf32>
    %729 = arith.addf %727, %728 : vector<8x256xf32>
    %cst_40 = arith.constant 0.000000e+00 : f32
    %730 = vector.broadcast %cst_40 : f32 to vector<8x256xf32>
    %731 = arith.maximumf %729, %730 : vector<8x256xf32>
    %732 = vector.broadcast %154 : f32 to vector<8x256xf32>
    %733 = arith.mulf %695, %732 : vector<8x256xf32>
    %734 = vector.broadcast %162 : f32 to vector<8x256xf32>
    %735 = arith.mulf %697, %734 : vector<8x256xf32>
    %736 = arith.addf %733, %735 : vector<8x256xf32>
    %737 = vector.broadcast %170 : f32 to vector<8x256xf32>
    %738 = arith.mulf %699, %737 : vector<8x256xf32>
    %739 = arith.addf %736, %738 : vector<8x256xf32>
    %740 = vector.broadcast %178 : f32 to vector<8x256xf32>
    %741 = arith.mulf %701, %740 : vector<8x256xf32>
    %742 = arith.addf %739, %741 : vector<8x256xf32>
    %743 = vector.broadcast %186 : f32 to vector<8x256xf32>
    %744 = arith.addf %742, %743 : vector<8x256xf32>
    %cst_41 = arith.constant 0.000000e+00 : f32
    %745 = vector.broadcast %cst_41 : f32 to vector<8x256xf32>
    %746 = arith.maximumf %744, %745 : vector<8x256xf32>
    %747 = vector.broadcast %155 : f32 to vector<8x256xf32>
    %748 = arith.mulf %695, %747 : vector<8x256xf32>
    %749 = vector.broadcast %163 : f32 to vector<8x256xf32>
    %750 = arith.mulf %697, %749 : vector<8x256xf32>
    %751 = arith.addf %748, %750 : vector<8x256xf32>
    %752 = vector.broadcast %171 : f32 to vector<8x256xf32>
    %753 = arith.mulf %699, %752 : vector<8x256xf32>
    %754 = arith.addf %751, %753 : vector<8x256xf32>
    %755 = vector.broadcast %179 : f32 to vector<8x256xf32>
    %756 = arith.mulf %701, %755 : vector<8x256xf32>
    %757 = arith.addf %754, %756 : vector<8x256xf32>
    %758 = vector.broadcast %187 : f32 to vector<8x256xf32>
    %759 = arith.addf %757, %758 : vector<8x256xf32>
    %cst_42 = arith.constant 0.000000e+00 : f32
    %760 = vector.broadcast %cst_42 : f32 to vector<8x256xf32>
    %761 = arith.maximumf %759, %760 : vector<8x256xf32>
    %762 = vector.broadcast %156 : f32 to vector<8x256xf32>
    %763 = arith.mulf %695, %762 : vector<8x256xf32>
    %764 = vector.broadcast %164 : f32 to vector<8x256xf32>
    %765 = arith.mulf %697, %764 : vector<8x256xf32>
    %766 = arith.addf %763, %765 : vector<8x256xf32>
    %767 = vector.broadcast %172 : f32 to vector<8x256xf32>
    %768 = arith.mulf %699, %767 : vector<8x256xf32>
    %769 = arith.addf %766, %768 : vector<8x256xf32>
    %770 = vector.broadcast %180 : f32 to vector<8x256xf32>
    %771 = arith.mulf %701, %770 : vector<8x256xf32>
    %772 = arith.addf %769, %771 : vector<8x256xf32>
    %773 = vector.broadcast %188 : f32 to vector<8x256xf32>
    %774 = arith.addf %772, %773 : vector<8x256xf32>
    %cst_43 = arith.constant 0.000000e+00 : f32
    %775 = vector.broadcast %cst_43 : f32 to vector<8x256xf32>
    %776 = arith.maximumf %774, %775 : vector<8x256xf32>
    %777 = vector.broadcast %157 : f32 to vector<8x256xf32>
    %778 = arith.mulf %695, %777 : vector<8x256xf32>
    %779 = vector.broadcast %165 : f32 to vector<8x256xf32>
    %780 = arith.mulf %697, %779 : vector<8x256xf32>
    %781 = arith.addf %778, %780 : vector<8x256xf32>
    %782 = vector.broadcast %173 : f32 to vector<8x256xf32>
    %783 = arith.mulf %699, %782 : vector<8x256xf32>
    %784 = arith.addf %781, %783 : vector<8x256xf32>
    %785 = vector.broadcast %181 : f32 to vector<8x256xf32>
    %786 = arith.mulf %701, %785 : vector<8x256xf32>
    %787 = arith.addf %784, %786 : vector<8x256xf32>
    %788 = vector.broadcast %189 : f32 to vector<8x256xf32>
    %789 = arith.addf %787, %788 : vector<8x256xf32>
    %cst_44 = arith.constant 0.000000e+00 : f32
    %790 = vector.broadcast %cst_44 : f32 to vector<8x256xf32>
    %791 = arith.maximumf %789, %790 : vector<8x256xf32>
    %792 = vector.broadcast %158 : f32 to vector<8x256xf32>
    %793 = arith.mulf %695, %792 : vector<8x256xf32>
    %794 = vector.broadcast %166 : f32 to vector<8x256xf32>
    %795 = arith.mulf %697, %794 : vector<8x256xf32>
    %796 = arith.addf %793, %795 : vector<8x256xf32>
    %797 = vector.broadcast %174 : f32 to vector<8x256xf32>
    %798 = arith.mulf %699, %797 : vector<8x256xf32>
    %799 = arith.addf %796, %798 : vector<8x256xf32>
    %800 = vector.broadcast %182 : f32 to vector<8x256xf32>
    %801 = arith.mulf %701, %800 : vector<8x256xf32>
    %802 = arith.addf %799, %801 : vector<8x256xf32>
    %803 = vector.broadcast %190 : f32 to vector<8x256xf32>
    %804 = arith.addf %802, %803 : vector<8x256xf32>
    %cst_45 = arith.constant 0.000000e+00 : f32
    %805 = vector.broadcast %cst_45 : f32 to vector<8x256xf32>
    %806 = arith.maximumf %804, %805 : vector<8x256xf32>
    %807 = vector.broadcast %159 : f32 to vector<8x256xf32>
    %808 = arith.mulf %695, %807 : vector<8x256xf32>
    %809 = vector.broadcast %167 : f32 to vector<8x256xf32>
    %810 = arith.mulf %697, %809 : vector<8x256xf32>
    %811 = arith.addf %808, %810 : vector<8x256xf32>
    %812 = vector.broadcast %175 : f32 to vector<8x256xf32>
    %813 = arith.mulf %699, %812 : vector<8x256xf32>
    %814 = arith.addf %811, %813 : vector<8x256xf32>
    %815 = vector.broadcast %183 : f32 to vector<8x256xf32>
    %816 = arith.mulf %701, %815 : vector<8x256xf32>
    %817 = arith.addf %814, %816 : vector<8x256xf32>
    %818 = vector.broadcast %191 : f32 to vector<8x256xf32>
    %819 = arith.addf %817, %818 : vector<8x256xf32>
    %cst_46 = arith.constant 0.000000e+00 : f32
    %820 = vector.broadcast %cst_46 : f32 to vector<8x256xf32>
    %821 = arith.maximumf %819, %820 : vector<8x256xf32>
    %822 = vector.broadcast %192 : f32 to vector<8x256xf32>
    %823 = arith.mulf %716, %822 : vector<8x256xf32>
    %824 = vector.broadcast %196 : f32 to vector<8x256xf32>
    %825 = arith.mulf %731, %824 : vector<8x256xf32>
    %826 = arith.addf %823, %825 : vector<8x256xf32>
    %827 = vector.broadcast %200 : f32 to vector<8x256xf32>
    %828 = arith.mulf %746, %827 : vector<8x256xf32>
    %829 = arith.addf %826, %828 : vector<8x256xf32>
    %830 = vector.broadcast %204 : f32 to vector<8x256xf32>
    %831 = arith.mulf %761, %830 : vector<8x256xf32>
    %832 = arith.addf %829, %831 : vector<8x256xf32>
    %833 = vector.broadcast %208 : f32 to vector<8x256xf32>
    %834 = arith.mulf %776, %833 : vector<8x256xf32>
    %835 = arith.addf %832, %834 : vector<8x256xf32>
    %836 = vector.broadcast %212 : f32 to vector<8x256xf32>
    %837 = arith.mulf %791, %836 : vector<8x256xf32>
    %838 = arith.addf %835, %837 : vector<8x256xf32>
    %839 = vector.broadcast %216 : f32 to vector<8x256xf32>
    %840 = arith.mulf %806, %839 : vector<8x256xf32>
    %841 = arith.addf %838, %840 : vector<8x256xf32>
    %842 = vector.broadcast %220 : f32 to vector<8x256xf32>
    %843 = arith.mulf %821, %842 : vector<8x256xf32>
    %844 = arith.addf %841, %843 : vector<8x256xf32>
    %845 = vector.broadcast %224 : f32 to vector<8x256xf32>
    %846 = arith.addf %844, %845 : vector<8x256xf32>
    %cst_47 = arith.constant 0.000000e+00 : f32
    %847 = vector.broadcast %cst_47 : f32 to vector<8x256xf32>
    %848 = arith.maximumf %846, %847 : vector<8x256xf32>
    %849 = vector.broadcast %193 : f32 to vector<8x256xf32>
    %850 = arith.mulf %716, %849 : vector<8x256xf32>
    %851 = vector.broadcast %197 : f32 to vector<8x256xf32>
    %852 = arith.mulf %731, %851 : vector<8x256xf32>
    %853 = arith.addf %850, %852 : vector<8x256xf32>
    %854 = vector.broadcast %201 : f32 to vector<8x256xf32>
    %855 = arith.mulf %746, %854 : vector<8x256xf32>
    %856 = arith.addf %853, %855 : vector<8x256xf32>
    %857 = vector.broadcast %205 : f32 to vector<8x256xf32>
    %858 = arith.mulf %761, %857 : vector<8x256xf32>
    %859 = arith.addf %856, %858 : vector<8x256xf32>
    %860 = vector.broadcast %209 : f32 to vector<8x256xf32>
    %861 = arith.mulf %776, %860 : vector<8x256xf32>
    %862 = arith.addf %859, %861 : vector<8x256xf32>
    %863 = vector.broadcast %213 : f32 to vector<8x256xf32>
    %864 = arith.mulf %791, %863 : vector<8x256xf32>
    %865 = arith.addf %862, %864 : vector<8x256xf32>
    %866 = vector.broadcast %217 : f32 to vector<8x256xf32>
    %867 = arith.mulf %806, %866 : vector<8x256xf32>
    %868 = arith.addf %865, %867 : vector<8x256xf32>
    %869 = vector.broadcast %221 : f32 to vector<8x256xf32>
    %870 = arith.mulf %821, %869 : vector<8x256xf32>
    %871 = arith.addf %868, %870 : vector<8x256xf32>
    %872 = vector.broadcast %225 : f32 to vector<8x256xf32>
    %873 = arith.addf %871, %872 : vector<8x256xf32>
    %cst_48 = arith.constant 0.000000e+00 : f32
    %874 = vector.broadcast %cst_48 : f32 to vector<8x256xf32>
    %875 = arith.maximumf %873, %874 : vector<8x256xf32>
    %876 = vector.broadcast %194 : f32 to vector<8x256xf32>
    %877 = arith.mulf %716, %876 : vector<8x256xf32>
    %878 = vector.broadcast %198 : f32 to vector<8x256xf32>
    %879 = arith.mulf %731, %878 : vector<8x256xf32>
    %880 = arith.addf %877, %879 : vector<8x256xf32>
    %881 = vector.broadcast %202 : f32 to vector<8x256xf32>
    %882 = arith.mulf %746, %881 : vector<8x256xf32>
    %883 = arith.addf %880, %882 : vector<8x256xf32>
    %884 = vector.broadcast %206 : f32 to vector<8x256xf32>
    %885 = arith.mulf %761, %884 : vector<8x256xf32>
    %886 = arith.addf %883, %885 : vector<8x256xf32>
    %887 = vector.broadcast %210 : f32 to vector<8x256xf32>
    %888 = arith.mulf %776, %887 : vector<8x256xf32>
    %889 = arith.addf %886, %888 : vector<8x256xf32>
    %890 = vector.broadcast %214 : f32 to vector<8x256xf32>
    %891 = arith.mulf %791, %890 : vector<8x256xf32>
    %892 = arith.addf %889, %891 : vector<8x256xf32>
    %893 = vector.broadcast %218 : f32 to vector<8x256xf32>
    %894 = arith.mulf %806, %893 : vector<8x256xf32>
    %895 = arith.addf %892, %894 : vector<8x256xf32>
    %896 = vector.broadcast %222 : f32 to vector<8x256xf32>
    %897 = arith.mulf %821, %896 : vector<8x256xf32>
    %898 = arith.addf %895, %897 : vector<8x256xf32>
    %899 = vector.broadcast %226 : f32 to vector<8x256xf32>
    %900 = arith.addf %898, %899 : vector<8x256xf32>
    %cst_49 = arith.constant 0.000000e+00 : f32
    %901 = vector.broadcast %cst_49 : f32 to vector<8x256xf32>
    %902 = arith.maximumf %900, %901 : vector<8x256xf32>
    %903 = vector.broadcast %195 : f32 to vector<8x256xf32>
    %904 = arith.mulf %716, %903 : vector<8x256xf32>
    %905 = vector.broadcast %199 : f32 to vector<8x256xf32>
    %906 = arith.mulf %731, %905 : vector<8x256xf32>
    %907 = arith.addf %904, %906 : vector<8x256xf32>
    %908 = vector.broadcast %203 : f32 to vector<8x256xf32>
    %909 = arith.mulf %746, %908 : vector<8x256xf32>
    %910 = arith.addf %907, %909 : vector<8x256xf32>
    %911 = vector.broadcast %207 : f32 to vector<8x256xf32>
    %912 = arith.mulf %761, %911 : vector<8x256xf32>
    %913 = arith.addf %910, %912 : vector<8x256xf32>
    %914 = vector.broadcast %211 : f32 to vector<8x256xf32>
    %915 = arith.mulf %776, %914 : vector<8x256xf32>
    %916 = arith.addf %913, %915 : vector<8x256xf32>
    %917 = vector.broadcast %215 : f32 to vector<8x256xf32>
    %918 = arith.mulf %791, %917 : vector<8x256xf32>
    %919 = arith.addf %916, %918 : vector<8x256xf32>
    %920 = vector.broadcast %219 : f32 to vector<8x256xf32>
    %921 = arith.mulf %806, %920 : vector<8x256xf32>
    %922 = arith.addf %919, %921 : vector<8x256xf32>
    %923 = vector.broadcast %223 : f32 to vector<8x256xf32>
    %924 = arith.mulf %821, %923 : vector<8x256xf32>
    %925 = arith.addf %922, %924 : vector<8x256xf32>
    %926 = vector.broadcast %227 : f32 to vector<8x256xf32>
    %927 = arith.addf %925, %926 : vector<8x256xf32>
    %cst_50 = arith.constant 0.000000e+00 : f32
    %928 = vector.broadcast %cst_50 : f32 to vector<8x256xf32>
    %929 = arith.maximumf %927, %928 : vector<8x256xf32>
    %930 = vector.broadcast %228 : f32 to vector<8x256xf32>
    %931 = arith.mulf %848, %930 : vector<8x256xf32>
    %932 = vector.broadcast %230 : f32 to vector<8x256xf32>
    %933 = arith.mulf %875, %932 : vector<8x256xf32>
    %934 = arith.addf %931, %933 : vector<8x256xf32>
    %935 = vector.broadcast %232 : f32 to vector<8x256xf32>
    %936 = arith.mulf %902, %935 : vector<8x256xf32>
    %937 = arith.addf %934, %936 : vector<8x256xf32>
    %938 = vector.broadcast %234 : f32 to vector<8x256xf32>
    %939 = arith.mulf %929, %938 : vector<8x256xf32>
    %940 = arith.addf %937, %939 : vector<8x256xf32>
    %941 = vector.broadcast %236 : f32 to vector<8x256xf32>
    %942 = arith.addf %940, %941 : vector<8x256xf32>
    %943 = math.tanh %942 : vector<8x256xf32>
    %944 = vector.broadcast %229 : f32 to vector<8x256xf32>
    %945 = arith.mulf %848, %944 : vector<8x256xf32>
    %946 = vector.broadcast %231 : f32 to vector<8x256xf32>
    %947 = arith.mulf %875, %946 : vector<8x256xf32>
    %948 = arith.addf %945, %947 : vector<8x256xf32>
    %949 = vector.broadcast %233 : f32 to vector<8x256xf32>
    %950 = arith.mulf %902, %949 : vector<8x256xf32>
    %951 = arith.addf %948, %950 : vector<8x256xf32>
    %952 = vector.broadcast %235 : f32 to vector<8x256xf32>
    %953 = arith.mulf %929, %952 : vector<8x256xf32>
    %954 = arith.addf %951, %953 : vector<8x256xf32>
    %955 = vector.broadcast %237 : f32 to vector<8x256xf32>
    %956 = arith.addf %954, %955 : vector<8x256xf32>
    %957 = math.tanh %956 : vector<8x256xf32>
    %c0_51 = arith.constant 0 : index
    %c0_52 = arith.constant 0 : index
    %c0_53 = arith.constant 0 : index
    %958 = vector.load %arg4[%c0_51, %c0_52, %c0_53] : memref<2x8x256xf32, #tpu.memory_space<vmem>>, vector<1x8x256xf32>
    %959 = vector.shape_cast %958 : vector<1x8x256xf32> to vector<8x256xf32>
    %960 = vector.shape_cast %943 : vector<8x256xf32> to vector<1x8x256xf32>
    tpu.vector_store %arg4[%c0_51, %c0_52, %c0_53], %960 {strides = array<i32>} : memref<2x8x256xf32, #tpu.memory_space<vmem>>, vector<1x8x256xf32>,
    %c1_54 = arith.constant 1 : index
    %c0_55 = arith.constant 0 : index
    %c0_56 = arith.constant 0 : index
    %961 = vector.load %arg4[%c1_54, %c0_55, %c0_56] : memref<2x8x256xf32, #tpu.memory_space<vmem>>, vector<1x8x256xf32>
    %962 = vector.shape_cast %961 : vector<1x8x256xf32> to vector<8x256xf32>
    %963 = vector.shape_cast %957 : vector<8x256xf32> to vector<1x8x256xf32>
    tpu.vector_store %arg4[%c1_54, %c0_55, %c0_56], %963 {strides = array<i32>} : memref<2x8x256xf32, #tpu.memory_space<vmem>>, vector<1x8x256xf32>,
    return
  }
  func.func @transform_0(%arg0: i32) -> i32 {
    %c0_i32 = arith.constant 0 : i32
    %c0_i32_0 = arith.constant 0 : i32
    return %c0_i32 : i32
  }
  func.func @transform_1(%arg0: i32) -> (i32, i32, i32) {
    %c0_i32 = arith.constant 0 : i32
    %c0_i32_0 = arith.constant 0 : i32
    %c0_i32_1 = arith.constant 0 : i32
    return %c0_i32, %arg0, %c0_i32_0 : i32, i32, i32
  }
  func.func @transform_2(%arg0: i32) -> (i32, i32, i32) {
    %c0_i32 = arith.constant 0 : i32
    %c0_i32_0 = arith.constant 0 : i32
    %c0_i32_1 = arith.constant 0 : i32
    return %c0_i32, %arg0, %c0_i32_0 : i32, i32, i32
  }
  func.func @transform_3(%arg0: i32) -> (i32, i32, i32) {
    %c0_i32 = arith.constant 0 : i32
    %c0_i32_0 = arith.constant 0 : i32
    %c0_i32_1 = arith.constant 0 : i32
    return %c0_i32, %arg0, %c0_i32_0 : i32, i32, i32
  }
}

</mosaic_0001>

<bundles_post_ra>
// kernel: tpu_custom_call.1
= control target key start
LH: loop header
LB: loop body
LE: loop exit
PB: predicated region body
PF: predicated region fallthrough
CT: control target
= control target key end

     0   :  { %8 = vsyncpa [#allocation5], 0  ;;  %s3148_s0 = inlined_call_operand.hbm [shape: f32[238], index: 0, kind: input, shape index: {}]   ;;  %s3149_s1 = inlined_call_operand.hbm [shape: f32[4,8,256], index: 1, kind: input, shape index: {}]   ;;  %s3150_s2 = inlined_call_operand.hbm [shape: f32[4,8,256], index: 2, kind: input, shape index: {}]   ;;  %s3151_s3 = inlined_call_operand.hbm [shape: f32[2,8,256], index: 3, kind: output, shape index: {}]  }
   0x1   :  { %9 = vsyncpa [#allocation3], 0 }
   0x2   :  { %10 = vsyncpa [#allocation8], 0 }
   0x3   :  { %11 = vsyncpa [#allocation4], 0  ;;  %s17_s14 = sshll.u32 %s3148_s0, 4  ;;  %s25_s17 = sshll.u32 %s3149_s1, 4  ;;  %s18_s14 = int_to_ptr.hbm [resolvable:$true] %s17_s14  ;;  %s26_s17 = int_to_ptr.hbm [resolvable:$true] %s25_s17 }
   0x4   :  { %s1811_s18 = smov [#allocation2]   ;;  %s1812_s19 = smov [#allocation6]  }
   0x5   :  { %20 = dma.hbm_to_smem %s18_s14, 32, %s1811_s18, [#allocation5]  }
   0x6   :  { %s27_s20 = sshll.u32 %s1812_s19, 4  ;;  %s1813_s21 = smov 256   ;;  %s28_s20 = int_to_ptr.vmem [resolvable:$true] %s27_s20 }
   0x7   :  { %s1814_s22 = smov 16   ;;  %s38_s0 = sshll.u32 %s3150_s2, 4  ;;  %s39_s0 = int_to_ptr.hbm [resolvable:$true] %s38_s0 }
   0x8   :  { %33 = dma.hbm_to_vmem [thread:$0]  %s26_s17, 1024, %s28_s20, [#allocation3], %s1813_s21, %s1813_s21, %s1814_s22  }
   0x9   :  { %s1815_s25 = smov [#allocation7]  }
   0xa   :  { %s40_s26 = sshll.u32 %s1815_s25, 4  ;;  %s41_s26 = int_to_ptr.vmem [resolvable:$true] %s40_s26 }
   0xb   :  { %46 = dma.hbm_to_vmem [thread:$0]  %s39_s0, 1024, %s41_s26, [#allocation8], %s1813_s21, %s1813_s21, %s1814_s22  }
   0xc   :  { %1803 = dma.done.wait [#allocation5], 32  }
   0xd   :  { %1804 = vsyncadd [#allocation5], 4294967264 }
   0xe   :  { %1805 = dma.done.wait [#allocation3], 1024  }
   0xf   :  { %1806 = vsyncadd [#allocation3], 4294966272 }
  0x10   :  { %1807 = dma.done.wait [#allocation8], 1024  }
  0x11   :  { %1808 = vsyncadd [#allocation8], 4294966272 }
  0x12   :  { %59 = sfence }
  0x13   :  { %s60_s1 = sld [smem:[#allocation2]]  ;;  %v1864_v0 = vld [vmem:[#allocation6] sm:$0xff]  ;;  %v1868_v1 = vld [vmem:[#allocation6 + $0x8] sm:$0xff]  ;;  %v1870_v2 = vld [vmem:[#allocation6 + $0x10] sm:$0xff] }
  0x14   :  { %s1460_s27 = sld [smem:[#allocation2 + $0x1]]  ;;  %v1872_v3 = vld [vmem:[#allocation6 + $0x18] sm:$0xff]  ;;  %v1881_v12 = vld [vmem:[#allocation6 + $0x20] sm:$0xff]  ;;  %v1883_v13 = vld [vmem:[#allocation6 + $0x28] sm:$0xff] }
  0x15   :  { %s1467_s28 = sld [smem:[#allocation2 + $0x8]]  ;;  %v1894_v22 = vld [vmem:[#allocation6 + $0x30] sm:$0xff]  ;;  %v1896_v23 = vld [vmem:[#allocation6 + $0x38] sm:$0xff] }
  0x16   :  { %s1852_s29 = sld [smem:[#allocation2 + $0x9]] }
  0x17   :  { %s1475_s2 = sld [smem:[#allocation2 + $0x10]] }
  0x18   :  { %s1854_s30 = sld [smem:[#allocation2 + $0x11]] }
  0x19   :  { %s1856_s4 = sld [smem:[#allocation2 + $0x18]]  ;;  %v309_v4 = vstv %s60_s1 }
  0x1a   :  { %s1858_s5 = sld [smem:[#allocation2 + $0x2]]  ;;  %v332_v6 = vstv %s1460_s27  ;;  %v310_v8 = vmul.f32 %v309_v4, %v1864_v0  ;;  %v311_v9 = vmul.f32 %v309_v4, %v1868_v1 }
  0x1b   :  { %s1860_s6 = sld [smem:[#allocation2 + $0x19]]  ;;  %v312_v5 = vstv %s1467_s28  ;;  %v333_v15 = vmul.f32 %v332_v6, %v1864_v0  ;;  %v334_v16 = vmul.f32 %v332_v6, %v1868_v1 }
  0x1c   :  { %s1862_s7 = sld [smem:[#allocation2 + $0x20]]  ;;  %v335_v7 = vstv %s1852_s29  ;;  %v313_v10 = vmul.f32 %v312_v5, %v1870_v2  ;;  %v314_v11 = vmul.f32 %v312_v5, %v1872_v3 }
  0x1d   :  { %s1866_s8 = sld [smem:[#allocation2 + $0x21]]  ;;  %v317_v14 = vstv %s1475_s2  ;;  %v336_v17 = vmul.f32 %v335_v7, %v1870_v2  ;;  %v337_v25 = vmul.f32 %v335_v7, %v1872_v3 }
  0x1e   :  { %s1875_s9 = sld [smem:[#allocation2 + $0xa]]  ;;  %v315_v18 = vadd.f32 %v313_v10, %v310_v8  ;;  %v316_v19 = vadd.f32 %v314_v11, %v311_v9  ;;  %v318_v20 = vmul.f32 %v317_v14, %v1881_v12  ;;  %v319_v21 = vmul.f32 %v317_v14, %v1883_v13 }
  0x1f   :  { %s1888_s10 = sld [smem:[#allocation2 + $0x12]]  ;;  %v322_v24 = vstv %s1856_s4  ;;  %v338_v26 = vadd.f32 %v336_v17, %v333_v15  ;;  %v340_v27 = vstv %s1854_s30  ;;  %v339_v32 = vadd.f32 %v337_v25, %v334_v16 }
  0x20   :  { %s1892_s11 = sld [smem:[#allocation2 + $0x1a]]  ;;  %v320_v28 = vadd.f32 %v318_v20, %v315_v18  ;;  %v321_v29 = vadd.f32 %v319_v21, %v316_v19  ;;  %v323_v30 = vmul.f32 %v322_v24, %v1894_v22  ;;  %v324_v31 = vmul.f32 %v322_v24, %v1896_v23 }
  0x21   :  { %s1901_s12 = sld [smem:[#allocation2 + $0x3]]  ;;  %v341_v33 = vmul.f32 %v340_v27, %v1881_v12  ;;  %v342_v34 = vmul.f32 %v340_v27, %v1883_v13  ;;  %v345_v35 = vstv %s1860_s6  ;;  %v355_v46 = vstv %s1858_s5 }
  0x22   :  { %s1905_s13 = sld [smem:[#allocation2 + $0xb]]  ;;  %v325_v36 = vadd.f32 %v323_v30, %v320_v28  ;;  %v326_v37 = vadd.f32 %v324_v31, %v321_v29  ;;  %v346_v38 = vmul.f32 %v345_v35, %v1894_v22  ;;  %v347_v39 = vmul.f32 %v345_v35, %v1896_v23 }
  0x23   :  { %s1910_s14 = sld [smem:[#allocation2 + $0x22]]  ;;  %v327_v40 = vstv %s1862_s7  ;;  %v343_v41 = vadd.f32 %v341_v33, %v338_v26  ;;  %v344_v42 = vadd.f32 %v342_v34, %v339_v32  ;;  %v350_v43 = vstv %s1866_s8 }
  0x24   :  { %s1914_s15 = sld [smem:[#allocation2 + $0x13]]  ;;  %v328_v44 = vadd.f32 %v327_v40, %v325_v36  ;;  %v329_v45 = vadd.f32 %v327_v40, %v326_v37  ;;  %v358_v47 = vstv %s1875_s9  ;;  %v356_v50 = vmul.f32 %v355_v46, %v1864_v0 }
  0x25   :  { %s1918_s16 = sld [smem:[#allocation2 + $0x1b]]  ;;  %v348_v48 = vadd.f32 %v346_v38, %v343_v41  ;;  %v349_v49 = vadd.f32 %v347_v39, %v344_v42  ;;  %v357_v51 = vmul.f32 %v355_v46, %v1868_v1  ;;  %v359_v54 = vmul.f32 %v358_v47, %v1870_v2 }
  0x26   :  { %s1922_s17 = sld [smem:[#allocation2 + $0x23]]  ;;  %v1928_v52 = vmax.f32 %v328_v44, 0.0  ;;  %v1930_v53 = vmax.f32 %v329_v45, 0.0  ;;  %v360_v55 = vmul.f32 %v358_v47, %v1872_v3  ;;  %v363_v58 = vstv %s1888_s10 }
  0x27   :  { %s1926_s18 = sld [smem:[#allocation2 + $0x4]]  ;;  %v351_v56 = vadd.f32 %v350_v43, %v348_v48  ;;  %v352_v57 = vadd.f32 %v350_v43, %v349_v49  ;;  %v368_v59 = vstv %s1892_s11  ;;  %v361_v60 = vadd.f32 %v359_v54, %v356_v50 }
  0x28   :  { %s1934_s19 = sld [smem:[#allocation2 + $0xc]]  ;;  %v362_v61 = vadd.f32 %v360_v55, %v357_v51  ;;  %v364_v62 = vmul.f32 %v363_v58, %v1881_v12  ;;  %v365_v63 = vmul.f32 %v363_v58, %v1883_v13  ;;  %v369_v6 = vmul.f32 %v368_v59, %v1894_v22 }
  0x29   :  { %s1940_s20 = sld [smem:[#allocation2 + $0x14]]  ;;  %v1942_v4 = vmax.f32 %v351_v56, 0.0  ;;  %v1944_v5 = vmax.f32 %v352_v57, 0.0  ;;  %v370_v7 = vmul.f32 %v368_v59, %v1896_v23  ;;  %v373_v10 = vstv %s1910_s14 }
  0x2a   :  { %s1948_s23 = sld [smem:[#allocation2 + $0x1c]]  ;;  %v366_v8 = vadd.f32 %v364_v62, %v361_v60  ;;  %v367_v9 = vadd.f32 %v365_v63, %v362_v61  ;;  %v378_v11 = vstv %s1901_s12  ;;  %v381_v16 = vstv %s1905_s13 }
  0x2b   :  { %v379_v14 = vmul.f32 %v378_v11, %v1864_v0  ;;  %v380_v15 = vmul.f32 %v378_v11, %v1868_v1  ;;  %v386_v17 = vstv %s1914_s15  ;;  %s1956_s24 = sld [smem:[#allocation2 + $0x5]]  ;;  %v382_v20 = vmul.f32 %v381_v16, %v1870_v2 }
  0x2c   :  { %v371_v18 = vadd.f32 %v369_v6, %v366_v8  ;;  %v372_v19 = vadd.f32 %v370_v7, %v367_v9  ;;  %v383_v21 = vmul.f32 %v381_v16, %v1872_v3  ;;  %s1960_s0 = sld [smem:[#allocation2 + $0x24]]  ;;  %v387_v24 = vmul.f32 %v386_v17, %v1881_v12 }
  0x2d   :  { %v388_v25 = vmul.f32 %v386_v17, %v1883_v13  ;;  %v391_v26 = vstv %s1918_s16  ;;  %v396_v27 = vstv %s1922_s17  ;;  %s1966_s25 = sld [smem:[#allocation2 + $0xd]]  ;;  %v384_v30 = vadd.f32 %v382_v20, %v379_v14 }
  0x2e   :  { %v374_v28 = vadd.f32 %v373_v10, %v371_v18  ;;  %v375_v29 = vadd.f32 %v373_v10, %v372_v19  ;;  %v385_v31 = vadd.f32 %v383_v21, %v380_v15  ;;  %s1968_s26 = sld [smem:[#allocation2 + $0x15]]  ;;  %v392_v32 = vmul.f32 %v391_v26, %v1894_v22 }
  0x2f   :  { %v393_v33 = vmul.f32 %v391_v26, %v1896_v23  ;;  %v401_v34 = vstv %s1926_s18  ;;  %v404_v35 = vstv %s1934_s19  ;;  %s1974_s1 = sld [smem:[#allocation2 + $0x1d]]  ;;  %v389_v38 = vadd.f32 %v387_v24, %v384_v30 }
  0x30   :  { %v1976_v36 = vmax.f32 %v374_v28, 0.0  ;;  %v1978_v37 = vmax.f32 %v375_v29, 0.0  ;;  %v390_v39 = vadd.f32 %v388_v25, %v385_v31  ;;  %s1980_s27 = sld [smem:[#allocation2 + $0x25]]  ;;  %v402_v40 = vmul.f32 %v401_v34, %v1864_v0 }
  0x31   :  { %v403_v41 = vmul.f32 %v401_v34, %v1868_v1  ;;  %v405_v42 = vmul.f32 %v404_v35, %v1870_v2  ;;  %v406_v43 = vmul.f32 %v404_v35, %v1872_v3  ;;  %s1986_s28 = sld [smem:[#allocation2 + $0x6]]  ;;  %v394_v44 = vadd.f32 %v392_v32, %v389_v38 }
  0x32   :  { %v395_v45 = vadd.f32 %v393_v33, %v390_v39  ;;  %v409_v46 = vstv %s1940_s20  ;;  %v414_v47 = vstv %s1948_s23  ;;  %s1990_s29 = sld [smem:[#allocation2 + $0xe]]  ;;  %v419_v60 = vstv %s1960_s0 }
  0x33   :  { %v407_v48 = vadd.f32 %v405_v42, %v402_v40  ;;  %v408_v49 = vadd.f32 %v406_v43, %v403_v41  ;;  %v410_v50 = vmul.f32 %v409_v46, %v1881_v12  ;;  %v411_v51 = vmul.f32 %v409_v46, %v1883_v13  ;;  %s1994_s2 = sld [smem:[#allocation2 + $0x16]] }
  0x34   :  { %v397_v54 = vadd.f32 %v396_v27, %v394_v44  ;;  %v398_v55 = vadd.f32 %v396_v27, %v395_v45  ;;  %v415_v56 = vmul.f32 %v414_v47, %v1894_v22  ;;  %v416_v57 = vmul.f32 %v414_v47, %v1896_v23  ;;  %s1998_s30 = sld [smem:[#allocation2 + $0x1e]] }
  0x35   :  { %v412_v58 = vadd.f32 %v410_v50, %v407_v48  ;;  %v413_v59 = vadd.f32 %v411_v51, %v408_v49  ;;  %v424_v61 = vstv %s1956_s24  ;;  %s2008_s4 = sld [smem:[#allocation2 + $0x7]]  ;;  %v427_v10 = vstv %s1966_s25 }
  0x36   :  { %v2002_v62 = vmax.f32 %v397_v54, 0.0  ;;  %v2004_v63 = vmax.f32 %v398_v55, 0.0  ;;  %v425_v6 = vmul.f32 %v424_v61, %v1864_v0  ;;  %v426_v7 = vmul.f32 %v424_v61, %v1868_v1  ;;  %s2012_s5 = sld [smem:[#allocation2 + $0x26]] }
  0x37   :  { %v417_v8 = vadd.f32 %v415_v56, %v412_v58  ;;  %v418_v9 = vadd.f32 %v416_v57, %v413_v59  ;;  %v432_v11 = vstv %s1968_s26  ;;  %v428_v14 = vmul.f32 %v427_v10, %v1870_v2  ;;  %s2018_s6 = sld [smem:[#allocation2 + $0xf]] }
  0x38   :  { %v429_v15 = vmul.f32 %v427_v10, %v1872_v3  ;;  %v433_v16 = vmul.f32 %v432_v11, %v1881_v12  ;;  %v434_v17 = vmul.f32 %v432_v11, %v1883_v13  ;;  %v437_v20 = vstv %s1974_s1  ;;  %s2022_s7 = sld [smem:[#allocation2 + $0x17]] }
  0x39   :  { %v420_v18 = vadd.f32 %v419_v60, %v417_v8  ;;  %v421_v19 = vadd.f32 %v419_v60, %v418_v9  ;;  %v442_v21 = vstv %s1980_s27  ;;  %v430_v24 = vadd.f32 %v428_v14, %v425_v6  ;;  %s2026_s8 = sld [smem:[#allocation2 + $0x1f]] }
  0x3a   :  { %v431_v25 = vadd.f32 %v429_v15, %v426_v7  ;;  %v438_v26 = vmul.f32 %v437_v20, %v1894_v22  ;;  %v439_v27 = vmul.f32 %v437_v20, %v1896_v23  ;;  %v447_v30 = vstv %s1986_s28  ;;  %s2034_s9 = sld [smem:[#allocation2 + $0x27]] }
  0x3b   :  { %v2028_v28 = vmax.f32 %v420_v18, 0.0  ;;  %v2030_v29 = vmax.f32 %v421_v19, 0.0  ;;  %v450_v31 = vstv %s1990_s29  ;;  %v435_v32 = vadd.f32 %v433_v16, %v430_v24  ;;  %s2038_s10 = sld [smem:[#allocation2 + $0x28]] }
  0x3c   :  { %v436_v33 = vadd.f32 %v434_v17, %v431_v25  ;;  %v448_v34 = vmul.f32 %v447_v30, %v1864_v0  ;;  %v449_v35 = vmul.f32 %v447_v30, %v1868_v1  ;;  %v451_v38 = vmul.f32 %v450_v31, %v1870_v2  ;;  %s2044_s11 = sld [smem:[#allocation2 + $0x2c]] }
  0x3d   :  { %v452_v39 = vmul.f32 %v450_v31, %v1872_v3  ;;  %v455_v40 = vstv %s1994_s2  ;;  %v460_v41 = vstv %s1998_s30  ;;  %v440_v42 = vadd.f32 %v438_v26, %v435_v32  ;;  %s2050_s12 = sld [smem:[#allocation2 + $0x30]] }
  0x3e   :  { %v441_v43 = vadd.f32 %v439_v27, %v436_v33  ;;  %v456_v44 = vmul.f32 %v455_v40, %v1881_v12  ;;  %v457_v45 = vmul.f32 %v455_v40, %v1883_v13  ;;  %v453_v46 = vadd.f32 %v451_v38, %v448_v34  ;;  %s2054_s13 = sld [smem:[#allocation2 + $0x34]] }
  0x3f   :  { %v454_v47 = vadd.f32 %v452_v39, %v449_v35  ;;  %v461_v48 = vmul.f32 %v460_v41, %v1894_v22  ;;  %v462_v49 = vmul.f32 %v460_v41, %v1896_v23  ;;  %v443_v50 = vadd.f32 %v442_v21, %v440_v42  ;;  %s2058_s14 = sld [smem:[#allocation2 + $0x29]] }
  0x40   :  { %v444_v51 = vadd.f32 %v442_v21, %v441_v43  ;;  %v465_v54 = vstv %s2012_s5  ;;  %v470_v55 = vstv %s2008_s4  ;;  %v458_v56 = vadd.f32 %v456_v44, %v453_v46  ;;  %s2066_s15 = sld [smem:[#allocation2 + $0x38]] }
  0x41   :  { %v459_v57 = vadd.f32 %v457_v45, %v454_v47  ;;  %v471_v58 = vmul.f32 %v470_v55, %v1864_v0  ;;  %v472_v59 = vmul.f32 %v470_v55, %v1868_v1  ;;  %v2060_v60 = vmax.f32 %v443_v50, 0.0  ;;  %s2070_s16 = sld [smem:[#allocation2 + $0x3c]] }
  0x42   :  { %v2062_v61 = vmax.f32 %v444_v51, 0.0  ;;  %v473_v6 = vstv %s2018_s6  ;;  %v478_v7 = vstv %s2022_s7  ;;  %v463_v8 = vadd.f32 %v461_v48, %v458_v56  ;;  %s2076_s17 = sld [smem:[#allocation2 + $0x40]] }
  0x43   :  { %v464_v9 = vadd.f32 %v462_v49, %v459_v57  ;;  %v474_v10 = vmul.f32 %v473_v6, %v1870_v2  ;;  %v475_v11 = vmul.f32 %v473_v6, %v1872_v3  ;;  %v479_v14 = vmul.f32 %v478_v7, %v1881_v12  ;;  %s2078_s18 = sld [smem:[#allocation2 + $0x44]] }
  0x44   :  { %v480_v15 = vmul.f32 %v478_v7, %v1883_v13  ;;  %v483_v16 = vstv %s2026_s8  ;;  %v488_v17 = vstv %s2034_s9  ;;  %v466_v18 = vadd.f32 %v465_v54, %v463_v8  ;;  %s2084_s19 = sld [smem:[#allocation2 + $0x48]] }
  0x45   :  { %v467_v19 = vadd.f32 %v465_v54, %v464_v9  ;;  %v476_v20 = vadd.f32 %v474_v10, %v471_v58  ;;  %v477_v21 = vadd.f32 %v475_v11, %v472_v59  ;;  %v484_v24 = vmul.f32 %v483_v16, %v1894_v22  ;;  %s2094_s20 = sld [smem:[#allocation2 + $0x2d]] }
  0x46   :  { %v485_v25 = vmul.f32 %v483_v16, %v1896_v23  ;;  %v493_v26 = vstv %s2038_s10  ;;  %v496_v27 = vstv %s2044_s11  ;;  %v2086_v30 = vmax.f32 %v466_v18, 0.0  ;;  %s2098_s23 = sld [smem:[#allocation2 + $0x31]] }
  0x47   :  { %v2088_v31 = vmax.f32 %v467_v19, 0.0  ;;  %v481_v32 = vadd.f32 %v479_v14, %v476_v20  ;;  %v482_v33 = vadd.f32 %v480_v15, %v477_v21  ;;  %v494_v34 = vmul.f32 %v493_v26, %v1928_v52  ;;  %s2102_s24 = sld [smem:[#allocation2 + $0x35]] }
  0x48   :  { %v495_v35 = vmul.f32 %v493_v26, %v1930_v53  ;;  %v497_v38 = vmul.f32 %v496_v27, %v1942_v4  ;;  %v498_v39 = vmul.f32 %v496_v27, %v1944_v5  ;;  %v501_v42 = vstv %s2050_s12  ;;  %s2106_s0 = sld [smem:[#allocation2 + $0x39]] }
  0x49   :  { %v486_v40 = vadd.f32 %v484_v24, %v481_v32  ;;  %v487_v41 = vadd.f32 %v485_v25, %v482_v33  ;;  %v506_v43 = vstv %s2054_s13  ;;  %v502_v46 = vmul.f32 %v501_v42, %v1976_v36  ;;  %s2110_s25 = sld [smem:[#allocation2 + $0x2a]] }
  0x4a   :  { %v499_v44 = vadd.f32 %v497_v38, %v494_v34  ;;  %v500_v45 = vadd.f32 %v498_v39, %v495_v35  ;;  %v503_v47 = vmul.f32 %v501_v42, %v1978_v37  ;;  %v507_v50 = vmul.f32 %v506_v43, %v2002_v62  ;;  %s2118_s26 = sld [smem:[#allocation2 + $0x3d]] }
  0x4b   :  { %v489_v48 = vadd.f32 %v488_v17, %v486_v40  ;;  %v490_v49 = vadd.f32 %v488_v17, %v487_v41  ;;  %v508_v51 = vmul.f32 %v506_v43, %v2004_v63  ;;  %v511_v56 = vstv %s2066_s15  ;;  %s2122_s1 = sld [smem:[#allocation2 + $0x41]] }
  0x4c   :  { %v504_v54 = vadd.f32 %v502_v46, %v499_v44  ;;  %v505_v55 = vadd.f32 %v503_v47, %v500_v45  ;;  %v516_v57 = vstv %s2070_s16  ;;  %v512_v6 = vmul.f32 %v511_v56, %v2028_v28  ;;  %s2128_s27 = sld [smem:[#allocation2 + $0x2e]] }
  0x4d   :  { %v2112_v58 = vmax.f32 %v489_v48, 0.0  ;;  %v2114_v59 = vmax.f32 %v490_v49, 0.0  ;;  %v513_v7 = vmul.f32 %v511_v56, %v2030_v29  ;;  %v517_v10 = vmul.f32 %v516_v57, %v2060_v60  ;;  %s2132_s28 = sld [smem:[#allocation2 + $0x45]] }
  0x4e   :  { %v509_v8 = vadd.f32 %v507_v50, %v504_v54  ;;  %v510_v9 = vadd.f32 %v508_v51, %v505_v55  ;;  %v518_v11 = vmul.f32 %v516_v57, %v2062_v61  ;;  %v521_v14 = vstv %s2076_s17  ;;  %s2138_s29 = sld [smem:[#allocation2 + $0x49]] }
  0x4f   :  { %v526_v15 = vstv %s2078_s18  ;;  %v531_v16 = vstv %s2084_s19  ;;  %v534_v17 = vstv %s2058_s14  ;;  %v522_v20 = vmul.f32 %v521_v14, %v2086_v30  ;;  %s2146_s2 = sld [smem:[#allocation2 + $0x32]] }
  0x50   :  { %v514_v18 = vadd.f32 %v512_v6, %v509_v8  ;;  %v515_v19 = vadd.f32 %v513_v7, %v510_v9  ;;  %v523_v21 = vmul.f32 %v521_v14, %v2088_v31  ;;  %v527_v24 = vmul.f32 %v526_v15, %v2112_v58  ;;  %s2150_s30 = sld [smem:[#allocation2 + $0x36]] }
  0x51   :  { %v528_v25 = vmul.f32 %v526_v15, %v2114_v59  ;;  %v535_v26 = vmul.f32 %v534_v17, %v1928_v52  ;;  %v536_v27 = vmul.f32 %v534_v17, %v1930_v53  ;;  %v537_v34 = vstv %s2094_s20  ;;  %s2154_s4 = sld [smem:[#allocation2 + $0x2b]] }
  0x52   :  { %v519_v32 = vadd.f32 %v517_v10, %v514_v18  ;;  %v520_v33 = vadd.f32 %v518_v11, %v515_v19  ;;  %v542_v35 = vstv %s2098_s23  ;;  %v538_v38 = vmul.f32 %v537_v34, %v1942_v4  ;;  %s2158_s5 = sld [smem:[#allocation2 + $0x3a]] }
  0x53   :  { %v539_v39 = vmul.f32 %v537_v34, %v1944_v5  ;;  %v543_v40 = vmul.f32 %v542_v35, %v1976_v36  ;;  %v544_v41 = vmul.f32 %v542_v35, %v1978_v37  ;;  %v547_v44 = vstv %s2102_s24  ;;  %s2162_s6 = sld [smem:[#allocation2 + $0x3e]] }
  0x54   :  { %v524_v42 = vadd.f32 %v522_v20, %v519_v32  ;;  %v525_v43 = vadd.f32 %v523_v21, %v520_v33  ;;  %v552_v45 = vstv %s2106_s0  ;;  %v540_v46 = vadd.f32 %v538_v38, %v535_v26  ;;  %s2170_s7 = sld [smem:[#allocation2 + $0x2f]] }
  0x55   :  { %v541_v47 = vadd.f32 %v539_v39, %v536_v27  ;;  %v548_v48 = vmul.f32 %v547_v44, %v2002_v62  ;;  %v549_v49 = vmul.f32 %v547_v44, %v2004_v63  ;;  %v553_v54 = vmul.f32 %v552_v45, %v2028_v28  ;;  %s2174_s8 = sld [smem:[#allocation2 + $0x42]] }
  0x56   :  { %v529_v50 = vadd.f32 %v527_v24, %v524_v42  ;;  %v530_v51 = vadd.f32 %v528_v25, %v525_v43  ;;  %v554_v55 = vmul.f32 %v552_v45, %v2030_v29  ;;  %v545_v56 = vadd.f32 %v543_v40, %v540_v46  ;;  %s2180_s9 = sld [smem:[#allocation2 + $0x46]] }
  0x57   :  { %v546_v57 = vadd.f32 %v544_v41, %v541_v47  ;;  %v557_v6 = vstv %s2118_s26  ;;  %v562_v7 = vstv %s2122_s1  ;;  %v567_v19 = vstv %s2132_s28  ;;  %s2184_s10 = sld [smem:[#allocation2 + $0x33]] }
  0x58   :  { %v2164_v8 = vadd.f32 %v531_v16, %v529_v50  ;;  %v2166_v9 = vadd.f32 %v531_v16, %v530_v51  ;;  %v558_v10 = vmul.f32 %v557_v6, %v2060_v60  ;;  %v559_v11 = vmul.f32 %v557_v6, %v2062_v61  ;;  %s2190_s11 = sld [smem:[#allocation2 + $0x4a]] }
  0x59   :  { %v550_v14 = vadd.f32 %v548_v48, %v545_v56  ;;  %v551_v15 = vadd.f32 %v549_v49, %v546_v57  ;;  %v563_v17 = vmul.f32 %v562_v7, %v2086_v30  ;;  %v564_v18 = vmul.f32 %v562_v7, %v2088_v31  ;;  %s2194_s12 = sld [smem:[#allocation2 + $0x37]] }
  0x5a   :  { %v572_v20 = vstv %s2138_s29  ;;  %v575_v21 = vstv %s2110_s25  ;;  %v578_v16 = vstv %s2128_s27  ;;  %v568_v26 = vmul.f32 %v567_v19, %v2112_v58  ;;  %s2198_s13 = sld [smem:[#allocation2 + $0x3b]] }
  0x5b   :  { %v555_v24 = vadd.f32 %v553_v54, %v550_v14  ;;  %v556_v25 = vadd.f32 %v554_v55, %v551_v15  ;;  %v569_v27 = vmul.f32 %v567_v19, %v2114_v59  ;;  %v576_v32 = vmul.f32 %v575_v21, %v1928_v52  ;;  %s2206_s14 = sld [smem:[#allocation2 + $0x3f]] }
  0x5c   :  { %v577_v33 = vmul.f32 %v575_v21, %v1930_v53  ;;  %v579_v34 = vmul.f32 %v578_v16, %v1942_v4  ;;  %v580_v35 = vmul.f32 %v578_v16, %v1944_v5  ;;  %v583_v40 = vstv %s2146_s2  ;;  %s2210_s15 = sld [smem:[#allocation2 + $0x43]] }
  0x5d   :  { %v560_v38 = vadd.f32 %v558_v10, %v555_v24  ;;  %v561_v39 = vadd.f32 %v559_v11, %v556_v25  ;;  %v588_v41 = vstv %s2150_s30  ;;  %v584_v44 = vmul.f32 %v583_v40, %v1976_v36  ;;  %s2218_s16 = sld [smem:[#allocation2 + $0x47]] }
  0x5e   :  { %v581_v42 = vadd.f32 %v579_v34, %v576_v32  ;;  %v582_v43 = vadd.f32 %v580_v35, %v577_v33  ;;  %v585_v45 = vmul.f32 %v583_v40, %v1978_v37  ;;  %v589_v48 = vmul.f32 %v588_v41, %v2002_v62  ;;  %s2222_s17 = sld [smem:[#allocation2 + $0x4b]] }
  0x5f   :  { %v565_v46 = vadd.f32 %v563_v17, %v560_v38  ;;  %v566_v47 = vadd.f32 %v564_v18, %v561_v39  ;;  %v590_v49 = vmul.f32 %v588_v41, %v2004_v63  ;;  %v593_v54 = vstv %s2158_s5  ;;  %s2228_s18 = sld [smem:[#allocation2 + $0x4c]] }
  0x60   :  { %v586_v50 = vadd.f32 %v584_v44, %v581_v42  ;;  %v587_v51 = vadd.f32 %v585_v45, %v582_v43  ;;  %v598_v55 = vstv %s2162_s6  ;;  %v594_v6 = vmul.f32 %v593_v54, %v2028_v28  ;;  %s2232_s19 = sld [smem:[#allocation2 + $0x54]] }
  0x61   :  { %v570_v56 = vadd.f32 %v568_v26, %v565_v46  ;;  %v571_v57 = vadd.f32 %v569_v27, %v566_v47  ;;  %v595_v7 = vmul.f32 %v593_v54, %v2030_v29  ;;  %v599_v14 = vmul.f32 %v598_v55, %v2060_v60  ;;  %s2238_s20 = sld [smem:[#allocation2 + $0x5c]] }
  0x62   :  { %v591_v10 = vadd.f32 %v589_v48, %v586_v50  ;;  %v592_v11 = vadd.f32 %v590_v49, %v587_v51  ;;  %v600_v15 = vmul.f32 %v598_v55, %v2062_v61  ;;  %v603_v19 = vstv %s2174_s8  ;;  %s2242_s23 = sld [smem:[#allocation2 + $0x64]] }
  0x63   :  { %v2212_v17 = vadd.f32 %v572_v20, %v570_v56  ;;  %v2214_v18 = vadd.f32 %v572_v20, %v571_v57  ;;  %v608_v21 = vstv %s2180_s9  ;;  %v604_v25 = vmul.f32 %v603_v19, %v2086_v30  ;;  %s2248_s24 = sld [smem:[#allocation2 + $0x4d]] }
  0x64   :  { %v596_v16 = vadd.f32 %v594_v6, %v591_v10  ;;  %v597_v24 = vadd.f32 %v595_v7, %v592_v11  ;;  %v605_v26 = vmul.f32 %v603_v19, %v2088_v31  ;;  %v609_v27 = vmul.f32 %v608_v21, %v2112_v58  ;;  %s2254_s0 = sld [smem:[#allocation2 + $0x6c]] }
  0x65   :  { %v610_v20 = vmul.f32 %v608_v21, %v2114_v59  ;;  %v613_v32 = vstv %s2190_s11  ;;  %v616_v33 = vstv %s2154_s4  ;;  %v619_v40 = vstv %s2170_s7  ;;  %s2260_s25 = sld [smem:[#allocation2 + $0x55]] }
  0x66   :  { %v601_v34 = vadd.f32 %v599_v14, %v596_v16  ;;  %v602_v35 = vadd.f32 %v600_v15, %v597_v24  ;;  %v617_v38 = vmul.f32 %v616_v33, %v1928_v52  ;;  %v618_v39 = vmul.f32 %v616_v33, %v1930_v53  ;;  %s2266_s26 = sld [smem:[#allocation2 + $0x5d]] }
  0x67   :  { %v624_v41 = vstv %s2184_s10  ;;  %v629_v42 = vstv %s2194_s12  ;;  %v634_v43 = vstv %s2198_s13  ;;  %v620_v46 = vmul.f32 %v619_v40, %v1942_v4  ;;  %s2270_s1 = sld [smem:[#allocation2 + $0x4e]] }
  0x68   :  { %v606_v44 = vadd.f32 %v604_v25, %v601_v34  ;;  %v607_v45 = vadd.f32 %v605_v26, %v602_v35  ;;  %v621_v47 = vmul.f32 %v619_v40, %v1944_v5  ;;  %v625_v52 = vmul.f32 %v624_v41, %v1976_v36  ;;  %s2276_s27 = sld [smem:[#allocation2 + $0x56]] }
  0x69   :  { %v626_v53 = vmul.f32 %v624_v41, %v1978_v37  ;;  %v630_v48 = vmul.f32 %v629_v42, %v2002_v62  ;;  %v631_v49 = vmul.f32 %v629_v42, %v2004_v63  ;;  %v622_v54 = vadd.f32 %v620_v46, %v617_v38  ;;  %s2280_s28 = sld [smem:[#allocation2 + $0x65]] }
  0x6a   :  { %v611_v50 = vadd.f32 %v609_v27, %v606_v44  ;;  %v612_v51 = vadd.f32 %v610_v20, %v607_v45  ;;  %v623_v55 = vadd.f32 %v621_v47, %v618_v39  ;;  %v635_v4 = vmul.f32 %v634_v43, %v2028_v28  ;;  %s2286_s29 = sld [smem:[#allocation2 + $0x6d]] }
  0x6b   :  { %v636_v5 = vmul.f32 %v634_v43, %v2030_v29  ;;  %v639_v56 = vstv %s2206_s14  ;;  %v644_v36 = vstv %s2210_s15  ;;  %v627_v63 = vadd.f32 %v625_v52, %v622_v54  ;;  %s2292_s2 = sld [smem:[#allocation2 + $0x5e]] }
  0x6c   :  { %v2256_v37 = vadd.f32 %v613_v32, %v611_v50  ;;  %v2258_v62 = vadd.f32 %v613_v32, %v612_v51  ;;  %v628_v57 = vadd.f32 %v626_v53, %v623_v55  ;;  %v640_v28 = vmul.f32 %v639_v56, %v2060_v60  ;;  %s2296_s30 = sld [smem:[#allocation2 + $0x66]] }
  0x6d   :  { %v641_v29 = vmul.f32 %v639_v56, %v2062_v61  ;;  %v645_v6 = vmul.f32 %v644_v36, %v2086_v30  ;;  %v646_v7 = vmul.f32 %v644_v36, %v2088_v31  ;;  %v632_v10 = vadd.f32 %v630_v48, %v627_v63  ;;  %s2302_s4 = sld [smem:[#allocation2 + $0x4f]] }
  0x6e   :  { %v633_v11 = vadd.f32 %v631_v49, %v628_v57  ;;  %v649_v14 = vstv %s2218_s16  ;;  %v654_v15 = vstv %s2222_s17  ;;  %v657_v21 = vstv %s2228_s18  ;;  %s2306_s5 = sld [smem:[#allocation2 + $0x6e]] }
  0x6f   :  { %v650_v19 = vmul.f32 %v649_v14, %v2112_v58  ;;  %v651_v60 = vmul.f32 %v649_v14, %v2114_v59  ;;  %v660_v61 = vstv %s2232_s19  ;;  %v637_v30 = vadd.f32 %v635_v4, %v632_v10  ;;  %s2314_s6 = sld [smem:[#allocation2 + $0x57]] }
  0x70   :  { %v638_v31 = vadd.f32 %v636_v5, %v633_v11  ;;  %v658_v16 = vmul.f32 %v657_v21, %v1864_v0  ;;  %v659_v24 = vmul.f32 %v657_v21, %v1868_v1  ;;  %v661_v25 = vmul.f32 %v660_v61, %v1870_v2  ;;  %s2316_s7 = sld [smem:[#allocation2 + $0x5f]] }
  0x71   :  { %v662_v26 = vmul.f32 %v660_v61, %v1872_v3  ;;  %v665_v58 = vstv %s2238_s20  ;;  %v670_v59 = vstv %s2242_s23  ;;  %v642_v27 = vadd.f32 %v640_v28, %v637_v30  ;;  %s2322_s8 = sld [smem:[#allocation2 + $0x67]] }
  0x72   :  { %v643_v20 = vadd.f32 %v641_v29, %v638_v31  ;;  %v666_v32 = vmul.f32 %v665_v58, %v1881_v12  ;;  %v667_v33 = vmul.f32 %v665_v58, %v1883_v13  ;;  %v663_v34 = vadd.f32 %v661_v25, %v658_v16  ;;  %s2328_s9 = sld [smem:[#allocation2 + $0x6f]] }
  0x73   :  { %v664_v35 = vadd.f32 %v662_v26, %v659_v24  ;;  %v671_v38 = vmul.f32 %v670_v59, %v1894_v22  ;;  %v672_v39 = vmul.f32 %v670_v59, %v1896_v23  ;;  %v647_v40 = vadd.f32 %v645_v6, %v642_v27  ;;  %s2334_s10 = sld [smem:[#allocation2 + $0x50]] }
  0x74   :  { %v648_v41 = vadd.f32 %v646_v7, %v643_v20  ;;  %v675_v42 = vstv %s2254_s0  ;;  %v680_v43 = vstv %s2248_s24  ;;  %v668_v44 = vadd.f32 %v666_v32, %v663_v34  ;;  %s2340_s11 = sld [smem:[#allocation2 + $0x58]] }
  0x75   :  { %v669_v45 = vadd.f32 %v667_v33, %v664_v35  ;;  %v681_v46 = vmul.f32 %v680_v43, %v1864_v0  ;;  %v682_v47 = vmul.f32 %v680_v43, %v1868_v1  ;;  %v652_v52 = vadd.f32 %v650_v19, %v647_v40  ;;  %s2346_s12 = sld [smem:[#allocation2 + $0x60]] }
  0x76   :  { %v653_v53 = vadd.f32 %v651_v60, %v648_v41  ;;  %v683_v48 = vstv %s2260_s25  ;;  %v688_v49 = vstv %s2266_s26  ;;  %v673_v50 = vadd.f32 %v671_v38, %v668_v44  ;;  %s2350_s13 = sld [smem:[#allocation2 + $0x68]] }
  0x77   :  { %v674_v51 = vadd.f32 %v672_v39, %v669_v45  ;;  %v684_v54 = vmul.f32 %v683_v48, %v1870_v2  ;;  %v685_v55 = vmul.f32 %v683_v48, %v1872_v3  ;;  %v2308_v4 = vadd.f32 %v654_v15, %v652_v52  ;;  %s2360_s14 = sld [smem:[#allocation2 + $0x51]]  ;;  %v2362_v48 = vld [vmem:[#allocation6 + $0x10] sm:$0xff] }
  0x78   :  { %v2310_v5 = vadd.f32 %v654_v15, %v653_v53  ;;  %v689_v56 = vmul.f32 %v688_v49, %v1881_v12  ;;  %v690_v36 = vmul.f32 %v688_v49, %v1883_v13  ;;  %v676_v63 = vadd.f32 %v675_v42, %v673_v50  ;;  %s2368_s15 = sld [smem:[#allocation2 + $0x70]] }
  0x79   :  { %v677_v57 = vadd.f32 %v675_v42, %v674_v51  ;;  %v686_v28 = vadd.f32 %v684_v54, %v681_v46  ;;  %v687_v29 = vadd.f32 %v685_v55, %v682_v47  ;;  %v693_v6 = vstv %s2280_s28  ;;  %s2374_s16 = sld [smem:[#allocation2 + $0x59]] }
  0x7a   :  { %v698_v7 = vstv %s2286_s29  ;;  %v703_v10 = vstv %s2270_s1  ;;  %v706_v11 = vstv %s2276_s27  ;;  %v2324_v14 = vmax.f32 %v676_v63, 0.0  ;;  %s2376_s17 = sld [smem:[#allocation2 + $0x61]] }
  0x7b   :  { %v2326_v15 = vmax.f32 %v677_v57, 0.0  ;;  %v691_v19 = vadd.f32 %v689_v56, %v686_v28  ;;  %v692_v60 = vadd.f32 %v690_v36, %v687_v29  ;;  %v694_v21 = vmul.f32 %v693_v6, %v1894_v22  ;;  %s2382_s18 = sld [smem:[#allocation2 + $0x69]] }
  0x7c   :  { %v695_v61 = vmul.f32 %v693_v6, %v1896_v23  ;;  %v704_v30 = vmul.f32 %v703_v10, %v1864_v0  ;;  %v705_v31 = vmul.f32 %v703_v10, %v1868_v1  ;;  %v707_v16 = vmul.f32 %v706_v11, %v1870_v2  ;;  %s2388_s19 = sld [smem:[#allocation2 + $0x71]] }
  0x7d   :  { %v708_v24 = vmul.f32 %v706_v11, %v1872_v3  ;;  %v711_v25 = vstv %s2292_s2  ;;  %v716_v26 = vstv %s2296_s30  ;;  %v696_v58 = vadd.f32 %v694_v21, %v691_v19  ;;  %v2390_v19 = vld [vmem:[#allocation6] sm:$0xff]  ;;  %s2398_s20 = sld [smem:[#allocation2 + $0x52]] }
  0x7e   :  { %v697_v59 = vadd.f32 %v695_v61, %v692_v60  ;;  %v712_v27 = vmul.f32 %v711_v25, %v1881_v12  ;;  %v713_v20 = vmul.f32 %v711_v25, %v1883_v13  ;;  %v709_v32 = vadd.f32 %v707_v16, %v704_v30  ;;  %v2393_v60 = vld [vmem:[#allocation6 + $0x8] sm:$0xff]  ;;  %s2402_s23 = sld [smem:[#allocation2 + $0x5a]] }
  0x7f   :  { %v710_v33 = vadd.f32 %v708_v24, %v705_v31  ;;  %v717_v2 = vmul.f32 %v716_v26, %v1894_v22  ;;  %v718_v34 = vmul.f32 %v716_v26, %v1896_v23  ;;  %v699_v3 = vadd.f32 %v698_v7, %v696_v58  ;;  %v2404_v58 = vld [vmem:[#allocation6 + $0x20] sm:$0xff]  ;;  %s2410_s24 = sld [smem:[#allocation2 + $0x62]] }
  0x80   :  { %v700_v35 = vadd.f32 %v698_v7, %v697_v59  ;;  %v721_v38 = vstv %s2306_s5  ;;  %v726_v39 = vstv %s2302_s4  ;;  %v714_v40 = vadd.f32 %v712_v27, %v709_v32  ;;  %v2407_v27 = vld [vmem:[#allocation6 + $0x28] sm:$0xff]  ;;  %s2418_s0 = sld [smem:[#allocation2 + $0x6a]] }
  0x81   :  { %v715_v41 = vadd.f32 %v713_v20, %v710_v33  ;;  %v727_v42 = vmul.f32 %v726_v39, %v1864_v0  ;;  %v728_v43 = vmul.f32 %v726_v39, %v1868_v1  ;;  %v2354_v44 = vmax.f32 %v699_v3, 0.0  ;;  %v2365_v0 = vld [vmem:[#allocation6 + $0x18] sm:$0xff]  ;;  %s2428_s25 = sld [smem:[#allocation2 + $0x53]] }
  0x82   :  { %v2356_v45 = vmax.f32 %v700_v35, 0.0  ;;  %v729_v46 = vstv %s2314_s6  ;;  %v734_v47 = vstv %s2316_s7  ;;  %v719_v52 = vadd.f32 %v717_v2, %v714_v40  ;;  %v2412_v2 = vld [vmem:[#allocation6 + $0x30] sm:$0xff]  ;;  %v2415_v3 = vld [vmem:[#allocation6 + $0x38] sm:$0xff]  ;;  %s2432_s26 = sld [smem:[#allocation2 + $0x72]] }
  0x83   :  { %v720_v53 = vadd.f32 %v718_v34, %v715_v41  ;;  %v730_v49 = vmul.f32 %v2362_v48, %v729_v46  ;;  %v731_v1 = vmul.f32 %v2365_v0, %v729_v46  ;;  %v735_v50 = vmul.f32 %v734_v47, %v1881_v12  ;;  %s2438_s1 = sld [smem:[#allocation2 + $0x5b]] }
  0x84   :  { %v736_v51 = vmul.f32 %v734_v47, %v1883_v13  ;;  %v739_v54 = vstv %s2322_s8  ;;  %v744_v55 = vstv %s2328_s9  ;;  %v722_v56 = vadd.f32 %v721_v38, %v719_v52  ;;  %s2442_s27 = sld [smem:[#allocation2 + $0x63]] }
  0x85   :  { %v723_v36 = vadd.f32 %v721_v38, %v720_v53  ;;  %v732_v63 = vadd.f32 %v730_v49, %v727_v42  ;;  %v733_v57 = vadd.f32 %v731_v1, %v728_v43  ;;  %v740_v28 = vmul.f32 %v739_v54, %v1894_v22  ;;  %s2446_s28 = sld [smem:[#allocation2 + $0x6b]] }
  0x86   :  { %v741_v29 = vmul.f32 %v739_v54, %v1896_v23  ;;  %v749_v6 = vstv %s2334_s10  ;;  %v752_v7 = vstv %s2340_s11  ;;  %v2384_v12 = vmax.f32 %v722_v56, 0.0  ;;  %s2454_s29 = sld [smem:[#allocation2 + $0x73]] }
  0x87   :  { %v2386_v13 = vmax.f32 %v723_v36, 0.0  ;;  %v737_v10 = vadd.f32 %v735_v50, %v732_v63  ;;  %v738_v11 = vadd.f32 %v736_v51, %v733_v57  ;;  %v750_v22 = vmul.f32 %v2390_v19, %v749_v6  ;;  %s2458_s2 = sld [smem:[#allocation2 + $0x74]] }
  0x88   :  { %v751_v23 = vmul.f32 %v2393_v60, %v749_v6  ;;  %v753_v21 = vmul.f32 %v2362_v48, %v752_v7  ;;  %v754_v61 = vmul.f32 %v2365_v0, %v752_v7  ;;  %v757_v16 = vstv %s2346_s12  ;;  %s2464_s30 = sld [smem:[#allocation2 + $0x78]] }
  0x89   :  { %v742_v30 = vadd.f32 %v740_v28, %v737_v10  ;;  %v743_v31 = vadd.f32 %v741_v29, %v738_v11  ;;  %v762_v24 = vstv %s2350_s13  ;;  %v758_v59 = vmul.f32 %v2404_v58, %v757_v16  ;;  %s2470_s4 = sld [smem:[#allocation2 + $0x7c]] }
  0x8a   :  { %v755_v25 = vadd.f32 %v753_v21, %v750_v22  ;;  %v756_v26 = vadd.f32 %v754_v61, %v751_v23  ;;  %v759_v20 = vmul.f32 %v2407_v27, %v757_v16  ;;  %v763_v34 = vmul.f32 %v2412_v2, %v762_v24  ;;  %s2474_s5 = sld [smem:[#allocation2 + $0x80]] }
  0x8b   :  { %v745_v32 = vadd.f32 %v744_v55, %v742_v30  ;;  %v746_v33 = vadd.f32 %v744_v55, %v743_v31  ;;  %v764_v35 = vmul.f32 %v2415_v3, %v762_v24  ;;  %v767_v40 = vstv %s2368_s15  ;;  %s2478_s6 = sld [smem:[#allocation2 + $0x75]] }
  0x8c   :  { %v760_v38 = vadd.f32 %v758_v59, %v755_v25  ;;  %v761_v39 = vadd.f32 %v759_v20, %v756_v26  ;;  %v772_v41 = vstv %s2360_s14  ;;  %v775_v49 = vstv %s2374_s16  ;;  %s2486_s7 = sld [smem:[#allocation2 + $0x84]] }
  0x8d   :  { %v2422_v42 = vmax.f32 %v745_v32, 0.0  ;;  %v2424_v43 = vmax.f32 %v746_v33, 0.0  ;;  %v773_v46 = vmul.f32 %v2390_v19, %v772_v41  ;;  %v774_v47 = vmul.f32 %v2393_v60, %v772_v41  ;;  %s2490_s8 = sld [smem:[#allocation2 + $0x88]] }
  0x8e   :  { %v765_v52 = vadd.f32 %v763_v34, %v760_v38  ;;  %v766_v53 = vadd.f32 %v764_v35, %v761_v39  ;;  %v780_v1 = vstv %s2376_s17  ;;  %v776_v50 = vmul.f32 %v2362_v48, %v775_v49  ;;  %s2496_s9 = sld [smem:[#allocation2 + $0x8c]] }
  0x8f   :  { %v777_v51 = vmul.f32 %v2365_v0, %v775_v49  ;;  %v781_v54 = vmul.f32 %v2404_v58, %v780_v1  ;;  %v782_v55 = vmul.f32 %v2407_v27, %v780_v1  ;;  %v785_v63 = vstv %s2382_s18  ;;  %s2498_s10 = sld [smem:[#allocation2 + $0x90]] }
  0x90   :  { %v768_v56 = vadd.f32 %v767_v40, %v765_v52  ;;  %v769_v36 = vadd.f32 %v767_v40, %v766_v53  ;;  %v790_v57 = vstv %s2388_s19  ;;  %v778_v28 = vadd.f32 %v776_v50, %v773_v46  ;;  %s2504_s11 = sld [smem:[#allocation2 + $0x94]] }
  0x91   :  { %v779_v29 = vadd.f32 %v777_v51, %v774_v47  ;;  %v786_v6 = vmul.f32 %v2412_v2, %v785_v63  ;;  %v787_v7 = vmul.f32 %v2415_v3, %v785_v63  ;;  %v795_v22 = vstv %s2398_s20  ;;  %s2514_s12 = sld [smem:[#allocation2 + $0x79]] }
  0x92   :  { %v2448_v10 = vmax.f32 %v768_v56, 0.0  ;;  %v2450_v11 = vmax.f32 %v769_v36, 0.0  ;;  %v798_v23 = vstv %s2402_s23  ;;  %v783_v21 = vadd.f32 %v781_v54, %v778_v28  ;;  %s2518_s13 = sld [smem:[#allocation2 + $0x7d]] }
  0x93   :  { %v784_v61 = vadd.f32 %v782_v55, %v779_v29  ;;  %v796_v30 = vmul.f32 %v2390_v19, %v795_v22  ;;  %v797_v31 = vmul.f32 %v2393_v60, %v795_v22  ;;  %v799_v16 = vmul.f32 %v2362_v48, %v798_v23  ;;  %s2522_s14 = sld [smem:[#allocation2 + $0x81]] }
  0x94   :  { %v800_v24 = vmul.f32 %v2365_v0, %v798_v23  ;;  %v803_v25 = vstv %s2410_s24  ;;  %v808_v26 = vstv %s2418_s0  ;;  %v788_v59 = vadd.f32 %v786_v6, %v783_v21  ;;  %s2526_s15 = sld [smem:[#allocation2 + $0x85]] }
  0x95   :  { %v789_v20 = vadd.f32 %v787_v7, %v784_v61  ;;  %v804_v32 = vmul.f32 %v2404_v58, %v803_v25  ;;  %v805_v33 = vmul.f32 %v2407_v27, %v803_v25  ;;  %v801_v34 = vadd.f32 %v799_v16, %v796_v30  ;;  %s2530_s16 = sld [smem:[#allocation2 + $0x76]] }
  0x96   :  { %v802_v35 = vadd.f32 %v800_v24, %v797_v31  ;;  %v809_v38 = vmul.f32 %v2412_v2, %v808_v26  ;;  %v810_v39 = vmul.f32 %v2415_v3, %v808_v26  ;;  %v791_v40 = vadd.f32 %v790_v57, %v788_v59  ;;  %s2538_s17 = sld [smem:[#allocation2 + $0x89]] }
  0x97   :  { %v792_v41 = vadd.f32 %v790_v57, %v789_v20  ;;  %v813_v46 = vstv %s2432_s26  ;;  %v818_v47 = vstv %s2428_s25  ;;  %v806_v52 = vadd.f32 %v804_v32, %v801_v34  ;;  %s2542_s18 = sld [smem:[#allocation2 + $0x8d]] }
  0x98   :  { %v807_v53 = vadd.f32 %v805_v33, %v802_v35  ;;  %v819_v49 = vmul.f32 %v2390_v19, %v818_v47  ;;  %v820_v1 = vmul.f32 %v2393_v60, %v818_v47  ;;  %v2480_v50 = vmax.f32 %v791_v40, 0.0  ;;  %s2548_s19 = sld [smem:[#allocation2 + $0x7a]] }
  0x99   :  { %v2482_v51 = vmax.f32 %v792_v41, 0.0  ;;  %v821_v54 = vstv %s2438_s1  ;;  %v826_v55 = vstv %s2442_s27  ;;  %v811_v56 = vadd.f32 %v809_v38, %v806_v52  ;;  %s2552_s20 = sld [smem:[#allocation2 + $0x91]] }
  0x9a   :  { %v812_v36 = vadd.f32 %v810_v39, %v807_v53  ;;  %v822_v63 = vmul.f32 %v2362_v48, %v821_v54  ;;  %v823_v19 = vmul.f32 %v2365_v0, %v821_v54  ;;  %v827_v60 = vmul.f32 %v2404_v58, %v826_v55  ;;  %s2558_s23 = sld [smem:[#allocation2 + $0x95]] }
  0x9b   :  { %v828_v57 = vmul.f32 %v2407_v27, %v826_v55  ;;  %v831_v28 = vstv %s2446_s28  ;;  %v836_v29 = vstv %s2454_s29  ;;  %v814_v6 = vadd.f32 %v813_v46, %v811_v56  ;;  %s2566_s24 = sld [smem:[#allocation2 + $0x7e]] }
  0x9c   :  { %v815_v7 = vadd.f32 %v813_v46, %v812_v36  ;;  %v824_v22 = vadd.f32 %v822_v63, %v819_v49  ;;  %v825_v23 = vadd.f32 %v823_v19, %v820_v1  ;;  %v832_v48 = vmul.f32 %v2412_v2, %v831_v28  ;;  %s2570_s0 = sld [smem:[#allocation2 + $0x82]] }
  0x9d   :  { %v833_v0 = vmul.f32 %v2415_v3, %v831_v28  ;;  %v841_v21 = vstv %s2458_s2  ;;  %v844_v58 = vstv %s2464_s30  ;;  %v2506_v27 = vmax.f32 %v814_v6, 0.0  ;;  %s2574_s25 = sld [smem:[#allocation2 + $0x77]] }
  0x9e   :  { %v2508_v61 = vmax.f32 %v815_v7, 0.0  ;;  %v829_v30 = vadd.f32 %v827_v60, %v824_v22  ;;  %v830_v31 = vadd.f32 %v828_v57, %v825_v23  ;;  %v842_v16 = vmul.f32 %v841_v21, %v2324_v14  ;;  %s2578_s26 = sld [smem:[#allocation2 + $0x86]] }
  0x9f   :  { %v843_v24 = vmul.f32 %v841_v21, %v2326_v15  ;;  %v845_v2 = vmul.f32 %v844_v58, %v2354_v44  ;;  %v846_v25 = vmul.f32 %v844_v58, %v2356_v45  ;;  %v849_v59 = vstv %s2470_s4  ;;  %s2582_s1 = sld [smem:[#allocation2 + $0x8a]] }
  0xa0   :  { %v834_v3 = vadd.f32 %v832_v48, %v829_v30  ;;  %v835_v26 = vadd.f32 %v833_v0, %v830_v31  ;;  %v854_v20 = vstv %s2474_s5  ;;  %v850_v34 = vmul.f32 %v849_v59, %v2384_v12  ;;  %s2590_s27 = sld [smem:[#allocation2 + $0x7b]] }
  0xa1   :  { %v847_v32 = vadd.f32 %v845_v2, %v842_v16  ;;  %v848_v33 = vadd.f32 %v846_v25, %v843_v24  ;;  %v851_v35 = vmul.f32 %v849_v59, %v2386_v13  ;;  %v855_v40 = vmul.f32 %v854_v20, %v2422_v42  ;;  %s2594_s28 = sld [smem:[#allocation2 + $0x8e]] }
  0xa2   :  { %v837_v38 = vadd.f32 %v836_v29, %v834_v3  ;;  %v838_v39 = vadd.f32 %v836_v29, %v835_v26  ;;  %v856_v41 = vmul.f32 %v854_v20, %v2424_v43  ;;  %v859_v52 = vstv %s2486_s7  ;;  %s2600_s29 = sld [smem:[#allocation2 + $0x92]] }
  0xa3   :  { %v852_v46 = vadd.f32 %v850_v34, %v847_v32  ;;  %v853_v47 = vadd.f32 %v851_v35, %v848_v33  ;;  %v864_v53 = vstv %s2490_s8  ;;  %v860_v54 = vmul.f32 %v859_v52, %v2448_v10  ;;  %s2604_s2 = sld [smem:[#allocation2 + $0x7f]] }
  0xa4   :  { %v2532_v49 = vmax.f32 %v837_v38, 0.0  ;;  %v2534_v1 = vmax.f32 %v838_v39, 0.0  ;;  %v861_v55 = vmul.f32 %v859_v52, %v2450_v11  ;;  %v865_v63 = vmul.f32 %v864_v53, %v2480_v50  ;;  %s2610_s30 = sld [smem:[#allocation2 + $0x96]] }
  0xa5   :  { %v857_v56 = vadd.f32 %v855_v40, %v852_v46  ;;  %v858_v36 = vadd.f32 %v856_v41, %v853_v47  ;;  %v866_v19 = vmul.f32 %v864_v53, %v2482_v51  ;;  %v869_v60 = vstv %s2496_s9  ;;  %s2614_s4 = sld [smem:[#allocation2 + $0x83]] }
  0xa6   :  { %v874_v57 = vstv %s2498_s10  ;;  %v879_v28 = vstv %s2504_s11  ;;  %v882_v29 = vstv %s2478_s6  ;;  %v870_v22 = vmul.f32 %v869_v60, %v2506_v27  ;;  %s2618_s5 = sld [smem:[#allocation2 + $0x87]] }
  0xa7   :  { %v862_v6 = vadd.f32 %v860_v54, %v857_v56  ;;  %v863_v7 = vadd.f32 %v861_v55, %v858_v36  ;;  %v871_v23 = vmul.f32 %v869_v60, %v2508_v61  ;;  %v875_v48 = vmul.f32 %v874_v57, %v2532_v49  ;;  %s2626_s6 = sld [smem:[#allocation2 + $0x8b]] }
  0xa8   :  { %v876_v0 = vmul.f32 %v874_v57, %v2534_v1  ;;  %v883_v21 = vmul.f32 %v882_v29, %v2324_v14  ;;  %v884_v58 = vmul.f32 %v882_v29, %v2326_v15  ;;  %v885_v16 = vstv %s2514_s12  ;;  %s2630_s7 = sld [smem:[#allocation2 + $0x8f]] }
  0xa9   :  { %v867_v30 = vadd.f32 %v865_v63, %v862_v6  ;;  %v868_v31 = vadd.f32 %v866_v19, %v863_v7  ;;  %v890_v24 = vstv %s2518_s13  ;;  %v886_v2 = vmul.f32 %v885_v16, %v2354_v44  ;;  %s2640_s8 = sld [smem:[#allocation2 + $0x93]] }
  0xaa   :  { %v887_v25 = vmul.f32 %v885_v16, %v2356_v45  ;;  %v891_v3 = vmul.f32 %v890_v24, %v2384_v12  ;;  %v892_v26 = vmul.f32 %v890_v24, %v2386_v13  ;;  %v895_v32 = vstv %s2522_s14  ;;  %s2646_s9 = sld [smem:[#allocation2 + $0x97]] }
  0xab   :  { %v872_v59 = vadd.f32 %v870_v22, %v867_v30  ;;  %v873_v20 = vadd.f32 %v871_v23, %v868_v31  ;;  %v900_v33 = vstv %s2526_s15  ;;  %v888_v34 = vadd.f32 %v886_v2, %v883_v21  ;;  %s2654_s10 = sld [smem:[#allocation2 + $0x98]] }
  0xac   :  { %v889_v35 = vadd.f32 %v887_v25, %v884_v58  ;;  %v896_v38 = vmul.f32 %v895_v32, %v2422_v42  ;;  %v897_v39 = vmul.f32 %v895_v32, %v2424_v43  ;;  %v901_v46 = vmul.f32 %v900_v33, %v2448_v10  ;;  %s2658_s11 = sld [smem:[#allocation2 + $0x99]] }
  0xad   :  { %v877_v40 = vadd.f32 %v875_v48, %v872_v59  ;;  %v878_v41 = vadd.f32 %v876_v0, %v873_v20  ;;  %v902_v47 = vmul.f32 %v900_v33, %v2450_v11  ;;  %v893_v52 = vadd.f32 %v891_v3, %v888_v34  ;;  %s2664_s12 = sld [smem:[#allocation2 + $0x9a]] }
  0xae   :  { %v894_v53 = vadd.f32 %v892_v26, %v889_v35  ;;  %v905_v54 = vstv %s2538_s17  ;;  %v910_v55 = vstv %s2542_s18  ;;  %v915_v7 = vstv %s2552_s20  ;;  %s2666_s13 = sld [smem:[#allocation2 + $0xa0]] }
  0xaf   :  { %v2584_v56 = vadd.f32 %v879_v28, %v877_v40  ;;  %v2586_v36 = vadd.f32 %v879_v28, %v878_v41  ;;  %v906_v63 = vmul.f32 %v905_v54, %v2480_v50  ;;  %v907_v19 = vmul.f32 %v905_v54, %v2482_v51  ;;  %s2672_s14 = sld [smem:[#allocation2 + $0xa8]] }
  0xb0   :  { %v898_v60 = vadd.f32 %v896_v38, %v893_v52  ;;  %v899_v57 = vadd.f32 %v897_v39, %v894_v53  ;;  %v911_v29 = vmul.f32 %v910_v55, %v2506_v27  ;;  %v912_v6 = vmul.f32 %v910_v55, %v2508_v61  ;;  %s2674_s15 = sld [smem:[#allocation2 + $0xb0]] }
  0xb1   :  { %v920_v22 = vstv %s2558_s23  ;;  %v923_v23 = vstv %s2530_s16  ;;  %v926_v28 = vstv %s2548_s19  ;;  %v916_v21 = vmul.f32 %v915_v7, %v2532_v49  ;;  %s2680_s16 = sld [smem:[#allocation2 + $0xa1]] }
  0xb2   :  { %v903_v48 = vadd.f32 %v901_v46, %v898_v60  ;;  %v904_v0 = vadd.f32 %v902_v47, %v899_v57  ;;  %v917_v58 = vmul.f32 %v915_v7, %v2534_v1  ;;  %v924_v30 = vmul.f32 %v923_v23, %v2324_v14  ;;  %s2684_s17 = sld [smem:[#allocation2 + $0xb8]] }
  0xb3   :  { %v925_v31 = vmul.f32 %v923_v23, %v2326_v15  ;;  %v927_v16 = vmul.f32 %v926_v28, %v2354_v44  ;;  %v928_v24 = vmul.f32 %v926_v28, %v2356_v45  ;;  %v931_v3 = vstv %s2566_s24  ;;  %s2690_s18 = sld [smem:[#allocation2 + $0xa2]] }
  0xb4   :  { %v908_v2 = vadd.f32 %v906_v63, %v903_v48  ;;  %v909_v25 = vadd.f32 %v907_v19, %v904_v0  ;;  %v936_v26 = vstv %s2570_s0  ;;  %v932_v32 = vmul.f32 %v931_v3, %v2384_v12  ;;  %s2694_s19 = sld [smem:[#allocation2 + $0xa9]] }
  0xb5   :  { %v929_v59 = vadd.f32 %v927_v16, %v924_v30  ;;  %v930_v20 = vadd.f32 %v928_v24, %v925_v31  ;;  %v933_v33 = vmul.f32 %v931_v3, %v2386_v13  ;;  %v937_v38 = vmul.f32 %v936_v26, %v2422_v42  ;;  %s2702_s20 = sld [smem:[#allocation2 + $0xb1]] }
  0xb6   :  { %v913_v34 = vadd.f32 %v911_v29, %v908_v2  ;;  %v914_v35 = vadd.f32 %v912_v6, %v909_v25  ;;  %v938_v39 = vmul.f32 %v936_v26, %v2424_v43  ;;  %v941_v46 = vstv %s2578_s26  ;;  %s2710_s23 = sld [smem:[#allocation2 + $0xb9]] }
  0xb7   :  { %v934_v40 = vadd.f32 %v932_v32, %v929_v59  ;;  %v935_v41 = vadd.f32 %v933_v33, %v930_v20  ;;  %v946_v47 = vstv %s2582_s1  ;;  %v942_v54 = vmul.f32 %v941_v46, %v2448_v10  ;;  %s2720_s24 = sld [smem:[#allocation2 + $0xaa]] }
  0xb8   :  { %v918_v52 = vadd.f32 %v916_v21, %v913_v34  ;;  %v919_v53 = vadd.f32 %v917_v58, %v914_v35  ;;  %v943_v55 = vmul.f32 %v941_v46, %v2450_v11  ;;  %v947_v60 = vmul.f32 %v946_v47, %v2480_v50  ;;  %s2724_s0 = sld [smem:[#allocation2 + $0xb2]] }
  0xb9   :  { %v939_v63 = vadd.f32 %v937_v38, %v934_v40  ;;  %v940_v19 = vadd.f32 %v938_v39, %v935_v41  ;;  %v948_v57 = vmul.f32 %v946_v47, %v2482_v51  ;;  %v951_v7 = vstv %s2594_s28  ;;  %s2742_s26 = sld [smem:[#allocation2 + $0xa3]] }
  0xba   :  { %v2632_v29 = vadd.f32 %v920_v22, %v918_v52  ;;  %v2634_v6 = vadd.f32 %v920_v22, %v919_v53  ;;  %v956_v23 = vstv %s2600_s29  ;;  %v952_v0 = vmul.f32 %v951_v7, %v2506_v27  ;;  %s2748_s1 = sld [smem:[#allocation2 + $0xab]] }
  0xbb   :  { %v944_v28 = vadd.f32 %v942_v54, %v939_v63  ;;  %v945_v48 = vadd.f32 %v943_v55, %v940_v19  ;;  %v953_v21 = vmul.f32 %v951_v7, %v2508_v61  ;;  %v957_v58 = vmul.f32 %v956_v23, %v2532_v49  ;;  %v1005_v54 = vld [vmem:[#allocation7] sm:$0xff]  ;;  %v1006_v55 = vld [vmem:[#allocation7 + $0x8] sm:$0xff]  ;;  %s2762_s28 = sld [smem:[#allocation2 + $0xb3]] }
  0xbc   :  { %v958_v30 = vmul.f32 %v956_v23, %v2534_v1  ;;  %v961_v22 = vstv %s2610_s30  ;;  %v964_v31 = vstv %s2574_s25  ;;  %v967_v3 = vstv %s2590_s27  ;;  %s2738_s25 = sld [smem:[#allocation2 + $0x9b]] }
  0xbd   :  { %v949_v16 = vadd.f32 %v947_v60, %v944_v28  ;;  %v950_v24 = vadd.f32 %v948_v57, %v945_v48  ;;  %v965_v2 = vmul.f32 %v964_v31, %v2324_v14  ;;  %v966_v25 = vmul.f32 %v964_v31, %v2326_v15  ;;  %v1008_v60 = vld [vmem:[#allocation7 + $0x10] sm:$0xff]  ;;  %v1009_v57 = vld [vmem:[#allocation7 + $0x18] sm:$0xff]  ;;  %s2756_s27 = sld [smem:[#allocation2 + $0xba]] }
  0xbe   :  { %v972_v26 = vstv %s2604_s2  ;;  %v977_v59 = vstv %s2614_s4  ;;  %v982_v20 = vstv %s2618_s5  ;;  %v968_v34 = vmul.f32 %v967_v3, %v2354_v44  ;;  %s2766_s29 = sld [smem:[#allocation2 + $0xbb]] }
  0xbf   :  { %v954_v32 = vadd.f32 %v952_v0, %v949_v16  ;;  %v955_v33 = vadd.f32 %v953_v21, %v950_v24  ;;  %v969_v35 = vmul.f32 %v967_v3, %v2356_v45  ;;  %v973_v14 = vmul.f32 %v972_v26, %v2384_v12  ;;  %v1011_v0 = vld [vmem:[#allocation7 + $0x20] sm:$0xff]  ;;  %v1012_v21 = vld [vmem:[#allocation7 + $0x28] sm:$0xff]  ;;  %s2772_s2 = sld [smem:[#allocation2 + $0x9c]] }
  0xc0   :  { %v974_v15 = vmul.f32 %v972_v26, %v2386_v13  ;;  %v978_v38 = vmul.f32 %v977_v59, %v2422_v42  ;;  %v979_v39 = vmul.f32 %v977_v59, %v2424_v43  ;;  %v970_v46 = vadd.f32 %v968_v34, %v965_v2  ;;  %s2776_s30 = sld [smem:[#allocation2 + $0xa4]] }
  0xc1   :  { %v959_v40 = vadd.f32 %v957_v58, %v954_v32  ;;  %v960_v41 = vadd.f32 %v958_v30, %v955_v33  ;;  %v971_v47 = vadd.f32 %v969_v35, %v966_v25  ;;  %v983_v44 = vmul.f32 %v982_v20, %v2448_v10  ;;  %s2780_s4 = sld [smem:[#allocation2 + $0xac]] }
  0xc2   :  { %v984_v45 = vmul.f32 %v982_v20, %v2450_v11  ;;  %v987_v52 = vstv %s2626_s6  ;;  %v992_v12 = vstv %s2630_s7  ;;  %v975_v43 = vadd.f32 %v973_v14, %v970_v46  ;;  %v1014_v14 = vld [vmem:[#allocation7 + $0x30] sm:$0xff]  ;;  %s2782_s5 = sld [smem:[#allocation2 + $0xb4]] }
  0xc3   :  { %v962_v13 = vadd.f32 %v961_v22, %v959_v40  ;;  %v963_v42 = vadd.f32 %v961_v22, %v960_v41  ;;  %v976_v53 = vadd.f32 %v974_v15, %v971_v47  ;;  %v988_v63 = vmul.f32 %v987_v52, %v2480_v50  ;;  %v1015_v15 = vld [vmem:[#allocation7 + $0x38] sm:$0xff]  ;;  %s2796_s6 = sld [smem:[#allocation2 + $0x9d]] }
  0xc4   :  { %v989_v10 = vmul.f32 %v987_v52, %v2482_v51  ;;  %v993_v11 = vmul.f32 %v992_v12, %v2506_v27  ;;  %v994_v19 = vmul.f32 %v992_v12, %v2508_v61  ;;  %v980_v7 = vadd.f32 %v978_v38, %v975_v43  ;;  %s2800_s7 = sld [smem:[#allocation2 + $0xbc]] }
  0xc5   :  { %v981_v23 = vadd.f32 %v979_v39, %v976_v53  ;;  %v997_v28 = vstv %s2640_s8  ;;  %v1002_v48 = vstv %s2646_s9  ;;  %v1016_v27 = vmul.f32 %v1005_v54, %v2584_v56  ;;  %s2806_s8 = sld [smem:[#allocation2 + $0xa5]] }
  0xc6   :  { %v998_v50 = vmul.f32 %v997_v28, %v2532_v49  ;;  %v999_v51 = vmul.f32 %v997_v28, %v2534_v1  ;;  %v1017_v61 = vmul.f32 %v1006_v55, %v2586_v36  ;;  %v985_v58 = vadd.f32 %v983_v44, %v980_v7  ;;  %s2810_s9 = sld [smem:[#allocation2 + $0xad]] }
  0xc7   :  { %v986_v30 = vadd.f32 %v984_v45, %v981_v23  ;;  %v1020_v22 = vmul.f32 %v1008_v60, %v2632_v29  ;;  %v1021_v31 = vmul.f32 %v1009_v57, %v2634_v6  ;;  %v2697_v49 = vadd.f32 %v1016_v27, %v2164_v8 }
  0xc8   :  { %v2700_v1 = vadd.f32 %v1017_v61, %v2166_v9  ;;  %v1024_v56 = vmul.f32 %v1011_v0, %v962_v13  ;;  %v1025_v36 = vmul.f32 %v1012_v21, %v963_v42  ;;  %v990_v16 = vadd.f32 %v988_v63, %v985_v58 }
  0xc9   :  { %v991_v24 = vadd.f32 %v989_v10, %v986_v30  ;;  %v2705_v29 = vadd.f32 %v1020_v22, %v2212_v17  ;;  %v2708_v6 = vadd.f32 %v1021_v31, %v2214_v18  ;;  %v1032_v2 = vstv %s2654_s10  ;;  %s2816_s10 = sld [smem:[#allocation2 + $0x9e]] }
  0xca   :  { %v2713_v8 = vadd.f32 %v1024_v56, %v2256_v37  ;;  %v2716_v9 = vadd.f32 %v1025_v36, %v2258_v62  ;;  %v1035_v25 = vstv %s2666_s13  ;;  %v995_v3 = vadd.f32 %v993_v11, %v990_v16  ;;  %s2832_s13 = sld [smem:[#allocation2 + $0x9f]] }
  0xcb   :  { %v996_v26 = vadd.f32 %v994_v19, %v991_v24  ;;  %v1033_v17 = vmul.f32 %v1032_v2, %v2697_v49  ;;  %v1034_v18 = vmul.f32 %v1032_v2, %v2700_v1  ;;  %v1036_v37 = vmul.f32 %v1035_v25, %v2705_v29 }
  0xcc   :  { %v1037_v59 = vmul.f32 %v1035_v25, %v2708_v6  ;;  %v1040_v62 = vstv %s2672_s14  ;;  %v1045_v20 = vstv %s2674_s15  ;;  %v1000_v32 = vadd.f32 %v998_v50, %v995_v3  ;;  %s2838_s14 = sld [smem:[#allocation2 + $0xa6]] }
  0xcd   :  { %v1001_v33 = vadd.f32 %v999_v51, %v996_v26  ;;  %v1041_v34 = vmul.f32 %v1040_v62, %v2713_v8  ;;  %v1042_v35 = vmul.f32 %v1040_v62, %v2716_v9  ;;  %v1038_v38 = vadd.f32 %v1036_v37, %v1033_v17  ;;  %s2842_s15 = sld [smem:[#allocation2 + $0xae]] }
  0xce   :  { %v1039_v39 = vadd.f32 %v1037_v59, %v1034_v18  ;;  %v1050_v40 = vstv %s2684_s17  ;;  %v1055_v41 = vstv %s2658_s11  ;;  %v1003_v46 = vadd.f32 %v1002_v48, %v1000_v32  ;;  %s2822_s11 = sld [smem:[#allocation2 + $0xb5]] }
  0xcf   :  { %v1004_v47 = vadd.f32 %v1002_v48, %v1001_v33  ;;  %v1056_v44 = vmul.f32 %v1055_v41, %v2697_v49  ;;  %v1057_v45 = vmul.f32 %v1055_v41, %v2700_v1  ;;  %v1043_v52 = vadd.f32 %v1041_v34, %v1038_v38  ;;  %s2850_s17 = sld [smem:[#allocation2 + $0xbe]] }
  0xd0   :  { %v1044_v12 = vadd.f32 %v1042_v35, %v1039_v39  ;;  %v1058_v13 = vstv %s2680_s16  ;;  %v1063_v42 = vstv %s2694_s19  ;;  %v1028_v43 = vmul.f32 %v1014_v14, %v1003_v46  ;;  %s2846_s16 = sld [smem:[#allocation2 + $0xb6]] }
  0xd1   :  { %v1029_v53 = vmul.f32 %v1015_v15, %v1004_v47  ;;  %v1059_v54 = vmul.f32 %v1058_v13, %v2705_v29  ;;  %v1060_v55 = vmul.f32 %v1058_v13, %v2708_v6  ;;  %v1064_v63 = vmul.f32 %v1063_v42, %v2713_v8  ;;  %s2866_s19 = sld [smem:[#allocation2 + $0xaf]] }
  0xd2   :  { %v1065_v10 = vmul.f32 %v1063_v42, %v2716_v9  ;;  %v1068_v11 = vstv %s2702_s20  ;;  %v1073_v19 = vstv %s2710_s23  ;;  %v2751_v60 = vadd.f32 %v1028_v43, %v2308_v4  ;;  %s2870_s20 = sld [smem:[#allocation2 + $0xb7]] }
  0xd3   :  { %v2754_v57 = vadd.f32 %v1029_v53, %v2310_v5  ;;  %v1061_v7 = vadd.f32 %v1059_v54, %v1056_v44  ;;  %v1062_v23 = vadd.f32 %v1060_v55, %v1057_v45  ;;  %v1078_v28 = vstv %s2664_s12  ;;  %s2828_s12 = sld [smem:[#allocation2 + $0xbd]] }
  0xd4   :  { %v1081_v48 = vstv %s2690_s18  ;;  %v1086_v0 = vstv %s2720_s24  ;;  %v1091_v21 = vstv %s2724_s0  ;;  %v1046_v50 = vmul.f32 %v1045_v20, %v2751_v60  ;;  %s2862_s18 = sld [smem:[#allocation2 + $0xa7]] }
  0xd5   :  { %v1047_v51 = vmul.f32 %v1045_v20, %v2754_v57  ;;  %v1066_v27 = vadd.f32 %v1064_v63, %v1061_v7  ;;  %v1067_v4 = vadd.f32 %v1065_v10, %v1062_v23  ;;  %v1069_v5 = vmul.f32 %v1068_v11, %v2751_v60  ;;  %s2874_s23 = sld [smem:[#allocation2 + $0xbf]] }
  0xd6   :  { %v1070_v61 = vmul.f32 %v1068_v11, %v2754_v57  ;;  %v1079_v58 = vmul.f32 %v1078_v28, %v2697_v49  ;;  %v1080_v30 = vmul.f32 %v1078_v28, %v2700_v1  ;;  %v1048_v22 = vadd.f32 %v1046_v50, %v1043_v52  ;;  %s2882_s24 = sld [smem:[#allocation2 + $0xc0]] }
  0xd7   :  { %v1049_v31 = vadd.f32 %v1047_v51, %v1044_v12  ;;  %v1082_v56 = vmul.f32 %v1081_v48, %v2705_v29  ;;  %v1083_v36 = vmul.f32 %v1081_v48, %v2708_v6  ;;  %v1071_v16 = vadd.f32 %v1069_v5, %v1066_v27  ;;  %s2886_s0 = sld [smem:[#allocation2 + $0xc4]] }
  0xd8   :  { %v1072_v24 = vadd.f32 %v1070_v61, %v1067_v4  ;;  %v1087_v2 = vmul.f32 %v1086_v0, %v2713_v8  ;;  %v1088_v25 = vmul.f32 %v1086_v0, %v2716_v9  ;;  %v1051_v3 = vadd.f32 %v1050_v40, %v1048_v22 }
  0xd9   :  { %v1052_v26 = vadd.f32 %v1050_v40, %v1049_v31  ;;  %v1084_v17 = vadd.f32 %v1082_v56, %v1079_v58  ;;  %v1085_v18 = vadd.f32 %v1083_v36, %v1080_v30  ;;  %v1074_v37 = vadd.f32 %v1073_v19, %v1071_v16 }
  0xda   :  { %v1075_v59 = vadd.f32 %v1073_v19, %v1072_v24  ;;  %v1092_v62 = vmul.f32 %v1091_v21, %v2751_v60  ;;  %v1093_v20 = vmul.f32 %v1091_v21, %v2754_v57  ;;  %v2786_v32 = vmax.f32 %v1051_v3, 0.0 }
  0xdb   :  { %v2788_v33 = vmax.f32 %v1052_v26, 0.0  ;;  %v1089_v34 = vadd.f32 %v1087_v2, %v1084_v17  ;;  %v1090_v35 = vadd.f32 %v1088_v25, %v1085_v18  ;;  %v2790_v14 = vmax.f32 %v1074_v37, 0.0 }
  0xdc   :  { %v2792_v15 = vmax.f32 %v1075_v59, 0.0  ;;  %v1096_v38 = vstv %s2756_s27  ;;  %v1101_v39 = vstv %s2738_s25  ;;  %v1104_v44 = vstv %s2742_s26  ;;  %s2892_s25 = sld [smem:[#allocation2 + $0xc8]] }
  0xdd   :  { %v1094_v40 = vadd.f32 %v1092_v62, %v1089_v34  ;;  %v1095_v41 = vadd.f32 %v1093_v20, %v1090_v35  ;;  %v1102_v46 = vmul.f32 %v1101_v39, %v2697_v49  ;;  %v1103_v47 = vmul.f32 %v1101_v39, %v2700_v1  ;;  %s2898_s26 = sld [smem:[#allocation2 + $0xcc]] }
  0xde   :  { %v1109_v45 = vstv %s2748_s1  ;;  %v1114_v52 = vstv %s2762_s28  ;;  %v1119_v12 = vstv %s2766_s29  ;;  %v1105_v43 = vmul.f32 %v1104_v44, %v2705_v29  ;;  %s2906_s1 = sld [smem:[#allocation2 + $0xc1]] }
  0xdf   :  { %v1097_v13 = vadd.f32 %v1096_v38, %v1094_v40  ;;  %v1098_v42 = vadd.f32 %v1096_v38, %v1095_v41  ;;  %v1106_v53 = vmul.f32 %v1104_v44, %v2708_v6  ;;  %v1110_v54 = vmul.f32 %v1109_v45, %v2713_v8  ;;  %s2910_s27 = sld [smem:[#allocation2 + $0xd0]] }
  0xe0   :  { %v1111_v55 = vmul.f32 %v1109_v45, %v2716_v9  ;;  %v1115_v63 = vmul.f32 %v1114_v52, %v2751_v60  ;;  %v1116_v10 = vmul.f32 %v1114_v52, %v2754_v57  ;;  %v1107_v7 = vadd.f32 %v1105_v43, %v1102_v46  ;;  %s2916_s28 = sld [smem:[#allocation2 + $0xd4]] }
  0xe1   :  { %v2818_v11 = vmax.f32 %v1097_v13, 0.0  ;;  %v2820_v19 = vmax.f32 %v1098_v42, 0.0  ;;  %v1108_v23 = vadd.f32 %v1106_v53, %v1103_v47  ;;  %v1124_v28 = vstv %s2772_s2  ;;  %s2920_s29 = sld [smem:[#allocation2 + $0xd8]] }
  0xe2   :  { %v1127_v48 = vstv %s2776_s30  ;;  %v1132_v0 = vstv %s2780_s4  ;;  %v1137_v21 = vstv %s2782_s5  ;;  %v1112_v50 = vadd.f32 %v1110_v54, %v1107_v7  ;;  %s2924_s2 = sld [smem:[#allocation2 + $0xdc]] }
  0xe3   :  { %v1113_v51 = vadd.f32 %v1111_v55, %v1108_v23  ;;  %v1125_v27 = vmul.f32 %v1124_v28, %v2697_v49  ;;  %v1126_v4 = vmul.f32 %v1124_v28, %v2700_v1  ;;  %v1128_v5 = vmul.f32 %v1127_v48, %v2705_v29  ;;  %s2928_s30 = sld [smem:[#allocation2 + $0xe0]] }
  0xe4   :  { %v1129_v61 = vmul.f32 %v1127_v48, %v2708_v6  ;;  %v1133_v58 = vmul.f32 %v1132_v0, %v2713_v8  ;;  %v1134_v30 = vmul.f32 %v1132_v0, %v2716_v9  ;;  %v1117_v22 = vadd.f32 %v1115_v63, %v1112_v50  ;;  %s2938_s4 = sld [smem:[#allocation2 + $0xc5]] }
  0xe5   :  { %v1118_v31 = vadd.f32 %v1116_v10, %v1113_v51  ;;  %v1138_v56 = vmul.f32 %v1137_v21, %v2751_v60  ;;  %v1139_v36 = vmul.f32 %v1137_v21, %v2754_v57  ;;  %v1130_v16 = vadd.f32 %v1128_v5, %v1125_v27  ;;  %s2942_s5 = sld [smem:[#allocation2 + $0xc9]] }
  0xe6   :  { %v1131_v24 = vadd.f32 %v1129_v61, %v1126_v4  ;;  %v1142_v2 = vstv %s2800_s7  ;;  %v1147_v25 = vstv %s2796_s6  ;;  %v1120_v3 = vadd.f32 %v1119_v12, %v1117_v22  ;;  %s2946_s6 = sld [smem:[#allocation2 + $0xcd]] }
  0xe7   :  { %v1121_v26 = vadd.f32 %v1119_v12, %v1118_v31  ;;  %v1148_v17 = vmul.f32 %v1147_v25, %v2697_v49  ;;  %v1149_v18 = vmul.f32 %v1147_v25, %v2700_v1  ;;  %v1135_v37 = vadd.f32 %v1133_v58, %v1130_v16  ;;  %s2950_s7 = sld [smem:[#allocation2 + $0xd1]] }
  0xe8   :  { %v1136_v59 = vadd.f32 %v1134_v30, %v1131_v24  ;;  %v1150_v62 = vstv %s2806_s8  ;;  %v1155_v20 = vstv %s2810_s9  ;;  %v2854_v34 = vmax.f32 %v1120_v3, 0.0  ;;  %s2954_s8 = sld [smem:[#allocation2 + $0xc2]] }
  0xe9   :  { %v2856_v35 = vmax.f32 %v1121_v26, 0.0  ;;  %v1151_v38 = vmul.f32 %v1150_v62, %v2705_v29  ;;  %v1152_v39 = vmul.f32 %v1150_v62, %v2708_v6  ;;  %v1140_v40 = vadd.f32 %v1138_v56, %v1135_v37  ;;  %s2962_s9 = sld [smem:[#allocation2 + $0xd5]] }
  0xea   :  { %v1141_v41 = vadd.f32 %v1139_v36, %v1136_v59  ;;  %v1156_v46 = vmul.f32 %v1155_v20, %v2713_v8  ;;  %v1157_v47 = vmul.f32 %v1155_v20, %v2716_v9  ;;  %v1160_v52 = vstv %s2822_s11  ;;  %s2972_s11 = sld [smem:[#allocation2 + $0xc6]] }
  0xeb   :  { %v1153_v44 = vadd.f32 %v1151_v38, %v1148_v17  ;;  %v1154_v45 = vadd.f32 %v1152_v39, %v1149_v18  ;;  %v1165_v12 = vstv %s2828_s12  ;;  %v1143_v13 = vadd.f32 %v1142_v2, %v1140_v40  ;;  %s2976_s12 = sld [smem:[#allocation2 + $0xdd]] }
  0xec   :  { %v1144_v42 = vadd.f32 %v1142_v2, %v1141_v41  ;;  %v1161_v43 = vmul.f32 %v1160_v52, %v2751_v60  ;;  %v1162_v53 = vmul.f32 %v1160_v52, %v2754_v57  ;;  %v1170_v63 = vstv %s2816_s10  ;;  %s2966_s10 = sld [smem:[#allocation2 + $0xd9]] }
  0xed   :  { %v1158_v54 = vadd.f32 %v1156_v46, %v1153_v44  ;;  %v1159_v55 = vadd.f32 %v1157_v47, %v1154_v45  ;;  %v1173_v10 = vstv %s2838_s14  ;;  %v2876_v7 = vmax.f32 %v1143_v13, 0.0  ;;  %s2986_s14 = sld [smem:[#allocation2 + $0xca]] }
  0xee   :  { %v2878_v23 = vmax.f32 %v1144_v42, 0.0  ;;  %v1171_v28 = vmul.f32 %v1170_v63, %v2697_v49  ;;  %v1172_v48 = vmul.f32 %v1170_v63, %v2700_v1  ;;  %v1174_v50 = vmul.f32 %v1173_v10, %v2705_v29 }
  0xef   :  { %v1163_v0 = vadd.f32 %v1161_v43, %v1158_v54  ;;  %v1164_v21 = vadd.f32 %v1162_v53, %v1159_v55  ;;  %v1175_v51 = vmul.f32 %v1173_v10, %v2708_v6  ;;  %v1178_v27 = vstv %s2842_s15  ;;  %s2992_s15 = sld [smem:[#allocation2 + $0xce]] }
  0xf0   :  { %v1183_v4 = vstv %s2846_s16  ;;  %v1188_v5 = vstv %s2850_s17  ;;  %v1193_v61 = vstv %s2832_s13  ;;  %v1176_v22 = vadd.f32 %v1174_v50, %v1171_v28  ;;  %s2982_s13 = sld [smem:[#allocation2 + $0xe1]] }
  0xf1   :  { %v1166_v58 = vadd.f32 %v1165_v12, %v1163_v0  ;;  %v1167_v30 = vadd.f32 %v1165_v12, %v1164_v21  ;;  %v1177_v31 = vadd.f32 %v1175_v51, %v1172_v48  ;;  %v1179_v56 = vmul.f32 %v1178_v27, %v2713_v8  ;;  %s3000_s16 = sld [smem:[#allocation2 + $0xd2]] }
  0xf2   :  { %v1180_v36 = vmul.f32 %v1178_v27, %v2716_v9  ;;  %v1184_v16 = vmul.f32 %v1183_v4, %v2751_v60  ;;  %v1185_v24 = vmul.f32 %v1183_v4, %v2754_v57  ;;  %v1194_v3 = vmul.f32 %v1193_v61, %v2697_v49  ;;  %s3004_s17 = sld [smem:[#allocation2 + $0xd6]] }
  0xf3   :  { %v2900_v2 = vmax.f32 %v1166_v58, 0.0  ;;  %v2902_v25 = vmax.f32 %v1167_v30, 0.0  ;;  %v1195_v26 = vmul.f32 %v1193_v61, %v2700_v1  ;;  %v1181_v17 = vadd.f32 %v1179_v56, %v1176_v22 }
  0xf4   :  { %v1182_v18 = vadd.f32 %v1180_v36, %v1177_v31  ;;  %v1196_v37 = vstv %s2862_s18  ;;  %v1201_v59 = vstv %s2866_s19  ;;  %v1206_v40 = vstv %s2870_s20  ;;  %s3013_s18 = sld [smem:[#allocation2 + $0xda]] }
  0xf5   :  { %v1197_v62 = vmul.f32 %v1196_v37, %v2705_v29  ;;  %v1198_v20 = vmul.f32 %v1196_v37, %v2708_v6  ;;  %v1202_v38 = vmul.f32 %v1201_v59, %v2713_v8  ;;  %v1203_v49 = vmul.f32 %v1201_v59, %v2716_v9  ;;  %s3019_s19 = sld [smem:[#allocation2 + $0xde]] }
  0xf6   :  { %v1186_v1 = vadd.f32 %v1184_v16, %v1181_v17  ;;  %v1187_v39 = vadd.f32 %v1185_v24, %v1182_v18  ;;  %v1211_v41 = vstv %s2874_s23  ;;  %v1207_v29 = vmul.f32 %v1206_v40, %v2751_v60  ;;  %s3023_s20 = sld [smem:[#allocation2 + $0xc3]] }
  0xf7   :  { %v1199_v46 = vadd.f32 %v1197_v62, %v1194_v3  ;;  %v1200_v47 = vadd.f32 %v1198_v20, %v1195_v26  ;;  %v1208_v6 = vmul.f32 %v1206_v40, %v2754_v57  ;;  %v1216_v9 = vstv %s2882_s24  ;;  %s3029_s23 = sld [smem:[#allocation2 + $0xc7]] }
  0xf8   :  { %v1189_v8 = vadd.f32 %v1188_v5, %v1186_v1  ;;  %v1190_v44 = vadd.f32 %v1188_v5, %v1187_v39  ;;  %v1219_v45 = vstv %s2886_s0  ;;  %v1217_v13 = vmul.f32 %v1216_v9, %v2786_v32  ;;  %s3033_s24 = sld [smem:[#allocation2 + $0xe2]] }
  0xf9   :  { %v1204_v52 = vadd.f32 %v1202_v38, %v1199_v46  ;;  %v1205_v12 = vadd.f32 %v1203_v49, %v1200_v47  ;;  %v1218_v42 = vmul.f32 %v1216_v9, %v2788_v33  ;;  %v1220_v57 = vmul.f32 %v1219_v45, %v2790_v14  ;;  %s3039_s0 = sld [smem:[#allocation2 + $0xcb]] }
  0xfa   :  { %v2932_v43 = vmax.f32 %v1189_v8, 0.0  ;;  %v2934_v60 = vmax.f32 %v1190_v44, 0.0  ;;  %v1221_v53 = vmul.f32 %v1219_v45, %v2792_v15  ;;  %v1224_v63 = vstv %s2892_s25  ;;  %s3043_s25 = sld [smem:[#allocation2 + $0xcf]] }
  0xfb   :  { %v1209_v54 = vadd.f32 %v1207_v29, %v1204_v52  ;;  %v1210_v55 = vadd.f32 %v1208_v6, %v1205_v12  ;;  %v1229_v10 = vstv %s2898_s26  ;;  %v1222_v28 = vadd.f32 %v1220_v57, %v1217_v13  ;;  %s3047_s26 = sld [smem:[#allocation2 + $0xd3]] }
  0xfc   :  { %v1223_v48 = vadd.f32 %v1221_v53, %v1218_v42  ;;  %v1225_v0 = vmul.f32 %v1224_v63, %v2818_v11  ;;  %v1226_v21 = vmul.f32 %v1224_v63, %v2820_v19  ;;  %v1230_v27 = vmul.f32 %v1229_v10, %v2854_v34 }
  0xfd   :  { %v1212_v50 = vadd.f32 %v1211_v41, %v1209_v54  ;;  %v1213_v51 = vadd.f32 %v1211_v41, %v1210_v55  ;;  %v1231_v4 = vmul.f32 %v1229_v10, %v2856_v35  ;;  %v1234_v58 = vstv %s2910_s27  ;;  %s3060_s27 = sld [smem:[#allocation2 + $0xdb]] }
  0xfe   :  { %v1227_v5 = vadd.f32 %v1225_v0, %v1222_v28  ;;  %v1228_v61 = vadd.f32 %v1226_v21, %v1223_v48  ;;  %v1239_v30 = vstv %s2916_s28  ;;  %v1235_v56 = vmul.f32 %v1234_v58, %v2876_v7  ;;  %s3065_s28 = sld [smem:[#allocation2 + $0xdf]] }
  0xff   :  { %v2956_v22 = vmax.f32 %v1212_v50, 0.0  ;;  %v2958_v31 = vmax.f32 %v1213_v51, 0.0  ;;  %v1236_v36 = vmul.f32 %v1234_v58, %v2878_v23  ;;  %v1240_v3 = vmul.f32 %v1239_v30, %v2900_v2 }
 0x100   :  { %v1232_v16 = vadd.f32 %v1230_v27, %v1227_v5  ;;  %v1233_v24 = vadd.f32 %v1231_v4, %v1228_v61  ;;  %v1241_v26 = vmul.f32 %v1239_v30, %v2902_v25  ;;  %v1244_v17 = vstv %s2920_s29  ;;  %s3077_s29 = sld [smem:[#allocation2 + $0xe4]] }
 0x101   :  { %v1249_v18 = vstv %s2924_s2  ;;  %v1254_v37 = vstv %s2928_s30  ;;  %v1259_v59 = vstv %s2906_s1  ;;  %v1245_v38 = vmul.f32 %v1244_v17, %v2932_v43  ;;  %s3053_s1 = sld [smem:[#allocation2 + $0xd7]] }
 0x102   :  { %v1237_v62 = vadd.f32 %v1235_v56, %v1232_v16  ;;  %v1238_v20 = vadd.f32 %v1236_v36, %v1233_v24  ;;  %v1246_v49 = vmul.f32 %v1244_v17, %v2934_v60  ;;  %v1250_v1 = vmul.f32 %v1249_v18, %v2956_v22  ;;  %s3081_s2 = sld [smem:[#allocation2 + $0xe6]] }
 0x103   :  { %v1251_v39 = vmul.f32 %v1249_v18, %v2958_v31  ;;  %v1260_v40 = vmul.f32 %v1259_v59, %v2786_v32  ;;  %v1261_v41 = vmul.f32 %v1259_v59, %v2788_v33  ;;  %v1262_v29 = vstv %s2938_s4  ;;  %s3087_s30 = sld [smem:[#allocation2 + $0xe3]] }
 0x104   :  { %v1242_v46 = vadd.f32 %v1240_v3, %v1237_v62  ;;  %v1243_v47 = vadd.f32 %v1241_v26, %v1238_v20  ;;  %v1267_v6 = vstv %s2942_s5  ;;  %v1263_v8 = vmul.f32 %v1262_v29, %v2790_v14  ;;  %s3089_s4 = sld [smem:[#allocation2 + $0xe8]] }
 0x105   :  { %v1264_v44 = vmul.f32 %v1262_v29, %v2792_v15  ;;  %v1268_v9 = vmul.f32 %v1267_v6, %v2818_v11  ;;  %v1269_v45 = vmul.f32 %v1267_v6, %v2820_v19  ;;  %v1272_v13 = vstv %s2946_s6  ;;  %s3095_s5 = sld [smem:[#allocation2 + $0xe5]] }
 0x106   :  { %v1247_v52 = vadd.f32 %v1245_v38, %v1242_v46  ;;  %v1248_v12 = vadd.f32 %v1246_v49, %v1243_v47  ;;  %v1277_v42 = vstv %s2950_s7  ;;  %v1265_v57 = vadd.f32 %v1263_v8, %v1260_v40  ;;  %s3097_s6 = sld [smem:[#allocation2 + $0xe7]] }
 0x107   :  { %v1266_v53 = vadd.f32 %v1264_v44, %v1261_v41  ;;  %v1273_v54 = vmul.f32 %v1272_v13, %v2854_v34  ;;  %v1274_v55 = vmul.f32 %v1272_v13, %v2856_v35  ;;  %v1278_v28 = vmul.f32 %v1277_v42, %v2876_v7  ;;  %s3103_s7 = sld [smem:[#allocation2 + $0xe9]] }
 0x108   :  { %v1252_v63 = vadd.f32 %v1250_v1, %v1247_v52  ;;  %v1253_v10 = vadd.f32 %v1251_v39, %v1248_v12  ;;  %v1279_v48 = vmul.f32 %v1277_v42, %v2878_v23  ;;  %v1270_v0 = vadd.f32 %v1268_v9, %v1265_v57 }
 0x109   :  { %v1271_v21 = vadd.f32 %v1269_v45, %v1266_v53  ;;  %v1282_v50 = vstv %s2962_s9  ;;  %v1287_v51 = vstv %s2966_s10  ;;  %v1292_v24 = vstv %s2976_s12  ;;  %s3111_s9 = sld [smem:[#allocation2 + $0xeb]]  ;;  %s1816_s12 = smov [#allocation9]  }
 0x10a   :  { %v3006_v27 = vadd.f32 %v1254_v37, %v1252_v63  ;;  %v3008_v4 = vadd.f32 %v1254_v37, %v1253_v10  ;;  %v1283_v5 = vmul.f32 %v1282_v50, %v2900_v2  ;;  %v1275_v61 = vadd.f32 %v1273_v54, %v1270_v0  ;;  %s3125_s10 = sld [smem:[#allocation2 + $0xec]] }
 0x10b   :  { %v1276_v58 = vadd.f32 %v1274_v55, %v1271_v21  ;;  %v1284_v30 = vmul.f32 %v1282_v50, %v2902_v25  ;;  %v1288_v56 = vmul.f32 %v1287_v51, %v2932_v43  ;;  %v1289_v16 = vmul.f32 %v1287_v51, %v2934_v60 }
 0x10c   :  { %v1257_v36 = vmax.f32 %v3006_v27, 0.0  ;;  %v1297_v3 = vstv %s2982_s13  ;;  %v1280_v26 = vadd.f32 %v1278_v28, %v1275_v61  ;;  %v1293_v18 = vmul.f32 %v1292_v24, %v2956_v22  ;;  %s1443_s13 = sshll.u32 %s1816_s12, 4  ;;  %s1444_s13 = int_to_ptr.vmem [resolvable:$true] %s1443_s13 }
 0x10d   :  { %v1281_v17 = vadd.f32 %v1279_v48, %v1276_v58  ;;  %v1294_v37 = vmul.f32 %v1292_v24, %v2958_v31  ;;  %v1302_v59 = vstv %s2954_s8  ;;  %v1305_v62 = vstv %s2972_s11  ;;  %s3105_s8 = sld [smem:[#allocation2 + $0xea]] }
 0x10e   :  { %v1310_v20 = vstv %s2986_s14  ;;  %v1315_v38 = vstv %s2992_s15  ;;  %v1285_v49 = vadd.f32 %v1283_v5, %v1280_v26  ;;  %v1303_v39 = vmul.f32 %v1302_v59, %v2786_v32  ;;  %s3128_s11 = sld [smem:[#allocation2 + $0xed]] }
 0x10f   :  { %v1286_v1 = vadd.f32 %v1284_v30, %v1281_v17  ;;  %v1304_v40 = vmul.f32 %v1302_v59, %v2788_v33  ;;  %v1306_v41 = vmul.f32 %v1305_v62, %v2790_v14  ;;  %v1307_v46 = vmul.f32 %v1305_v62, %v2792_v15 }
 0x110   :  { %v1311_v47 = vmul.f32 %v1310_v20, %v2818_v11  ;;  %v1312_v29 = vmul.f32 %v1310_v20, %v2820_v19  ;;  %v1290_v6 = vadd.f32 %v1288_v56, %v1285_v49  ;;  %v1316_v44 = vmul.f32 %v1315_v38, %v2854_v34 }
 0x111   :  { %v1291_v8 = vadd.f32 %v1289_v16, %v1286_v1  ;;  %v1317_v9 = vmul.f32 %v1315_v38, %v2856_v35  ;;  %v1308_v45 = vadd.f32 %v1306_v41, %v1303_v39  ;;  %v1309_v52 = vadd.f32 %v1307_v46, %v1304_v40 }
 0x112   :  { %v1320_v12 = vstv %s3000_s16  ;;  %v1325_v13 = vstv %s3004_s17  ;;  %v1258_v42 = vmax.f32 %v3008_v4, 0.0  ;;  %v1295_v57 = vadd.f32 %v1293_v18, %v1290_v6  ;;  %s1445_s16 = sshll.u32 %s3151_s3, 4  ;;  %s1446_s16 = int_to_ptr.hbm [resolvable:$true] %s1445_s16 }
 0x113   :  { %v1296_v53 = vadd.f32 %v1294_v37, %v1291_v8  ;;  %v1321_v54 = vmul.f32 %v1320_v12, %v2876_v7  ;;  %v1313_v55 = vadd.f32 %v1311_v47, %v1308_v45  ;;  %v1314_v63 = vadd.f32 %v1312_v29, %v1309_v52 }
 0x114   :  { %v1322_v10 = vmul.f32 %v1320_v12, %v2878_v23  ;;  %v1326_v28 = vmul.f32 %v1325_v13, %v2900_v2  ;;  %v3055_v48 = vadd.f32 %v1297_v3, %v1295_v57  ;;  %v1327_v0 = vmul.f32 %v1325_v13, %v2902_v25 }
 0x115   :  { %v1330_v21 = vstv %s3013_s18  ;;  %v1335_v50 = vstv %s3019_s19  ;;  %v3062_v51 = vadd.f32 %v1297_v3, %v1296_v53  ;;  %v1318_v5 = vadd.f32 %v1316_v44, %v1313_v55 }
 0x116   :  { %v1319_v61 = vadd.f32 %v1317_v9, %v1314_v63  ;;  %v1331_v58 = vmul.f32 %v1330_v21, %v2932_v43  ;;  %v1300_v30 = vmax.f32 %v3055_v48, 0.0  ;;  %v1332_v56 = vmul.f32 %v1330_v21, %v2934_v60 }
 0x117   :  { %v1336_v16 = vmul.f32 %v1335_v50, %v2956_v22  ;;  %v1337_v24 = vmul.f32 %v1335_v50, %v2958_v31  ;;  %v1323_v26 = vadd.f32 %v1321_v54, %v1318_v5  ;;  %v1340_v3 = vstv %s3033_s24 }
 0x118   :  { %v1324_v17 = vadd.f32 %v1322_v10, %v1319_v61  ;;  %v1345_v18 = vstv %s3023_s20  ;;  %v1348_v62 = vstv %s3029_s23  ;;  %v1353_v20 = vstv %s3039_s0 }
 0x119   :  { %v1346_v37 = vmul.f32 %v1345_v18, %v2786_v32  ;;  %v1347_v59 = vmul.f32 %v1345_v18, %v2788_v33  ;;  %v1328_v38 = vadd.f32 %v1326_v28, %v1323_v26  ;;  %v1349_v1 = vmul.f32 %v1348_v62, %v2790_v14 }
 0x11a   :  { %v1329_v49 = vadd.f32 %v1327_v0, %v1324_v17  ;;  %v1350_v39 = vmul.f32 %v1348_v62, %v2792_v15  ;;  %v1354_v40 = vmul.f32 %v1353_v20, %v2818_v11  ;;  %v1355_v41 = vmul.f32 %v1353_v20, %v2820_v19 }
 0x11b   :  { %v1358_v46 = vstv %s3043_s25  ;;  %v1363_v32 = vstv %s3047_s26  ;;  %v1333_v33 = vadd.f32 %v1331_v58, %v1328_v38  ;;  %v1351_v29 = vadd.f32 %v1349_v1, %v1346_v37 }
 0x11c   :  { %v1334_v47 = vadd.f32 %v1332_v56, %v1329_v49  ;;  %v1352_v6 = vadd.f32 %v1350_v39, %v1347_v59  ;;  %v1359_v14 = vmul.f32 %v1358_v46, %v2854_v34  ;;  %v1360_v15 = vmul.f32 %v1358_v46, %v2856_v35 }
 0x11d   :  { %v1364_v11 = vmul.f32 %v1363_v32, %v2876_v7  ;;  %v1365_v19 = vmul.f32 %v1363_v32, %v2878_v23  ;;  %v1338_v8 = vadd.f32 %v1336_v16, %v1333_v33  ;;  %v1356_v9 = vadd.f32 %v1354_v40, %v1351_v29 }
 0x11e   :  { %v1339_v44 = vadd.f32 %v1337_v24, %v1334_v47  ;;  %v1357_v45 = vadd.f32 %v1355_v41, %v1352_v6  ;;  %v1301_v52 = vmax.f32 %v3062_v51, 0.0  ;;  %v1368_v12 = vstv %s3053_s1 }
 0x11f   :  { %v1373_v13 = vstv %s3060_s27  ;;  %v1378_v57 = vstv %s3065_s28  ;;  %v1341_v34 = vadd.f32 %v1340_v3, %v1338_v8  ;;  %v1361_v7 = vadd.f32 %v1359_v14, %v1356_v9 }
 0x120   :  { %v1342_v35 = vadd.f32 %v1340_v3, %v1339_v44  ;;  %v1362_v23 = vadd.f32 %v1360_v15, %v1357_v45  ;;  %v1369_v53 = vmul.f32 %v1368_v12, %v2900_v2  ;;  %v1370_v54 = vmul.f32 %v1368_v12, %v2902_v25 }
 0x121   :  { %v1374_v55 = vmul.f32 %v1373_v13, %v2932_v43  ;;  %v1375_v63 = vmul.f32 %v1373_v13, %v2934_v60  ;;  %v1343_v10 = vmax.f32 %v1341_v34, 0.0  ;;  %v1366_v0 = vadd.f32 %v1364_v11, %v1361_v7 }
 0x122   :  { %v1344_v28 = vmax.f32 %v1342_v35, 0.0  ;;  %v1367_v21 = vadd.f32 %v1365_v19, %v1362_v23  ;;  %v1379_v50 = vmul.f32 %v1378_v57, %v2956_v22  ;;  %v1380_v51 = vmul.f32 %v1378_v57, %v2958_v31 }
 0x123   :  { %v1388_v5 = vstv %s3077_s29  ;;  %v1391_v2 = vstv %s3081_s2  ;;  %v1371_v25 = vadd.f32 %v1369_v53, %v1366_v0  ;;  %v1396_v16 = vstv %s3089_s4 }
 0x124   :  { %v1372_v61 = vadd.f32 %v1370_v54, %v1367_v21  ;;  %v1389_v43 = vmul.f32 %v1388_v5, %v1257_v36  ;;  %v1390_v60 = vmul.f32 %v1388_v5, %v1258_v42  ;;  %v1392_v58 = vmul.f32 %v1391_v2, %v1300_v30 }
 0x125   :  { %v1393_v56 = vmul.f32 %v1391_v2, %v1301_v52  ;;  %v1376_v22 = vadd.f32 %v1374_v55, %v1371_v25  ;;  %v1383_v24 = vstv %s3087_s30  ;;  %v1397_v26 = vmul.f32 %v1396_v16, %v1343_v10 }
 0x126   :  { %v1377_v31 = vadd.f32 %v1375_v63, %v1372_v61  ;;  %v1394_v17 = vadd.f32 %v1392_v58, %v1389_v43  ;;  %v1398_v18 = vmul.f32 %v1396_v16, %v1344_v28  ;;  %v1411_v37 = vstv %s3095_s5 }
 0x127   :  { %v1395_v3 = vadd.f32 %v1393_v56, %v1390_v60  ;;  %v1381_v59 = vadd.f32 %v1379_v50, %v1376_v22  ;;  %v1412_v20 = vmul.f32 %v1411_v37, %v1257_v36  ;;  %v1413_v38 = vmul.f32 %v1411_v37, %v1258_v42 }
 0x128   :  { %v1382_v62 = vadd.f32 %v1380_v51, %v1377_v31  ;;  %v1399_v49 = vadd.f32 %v1397_v26, %v1394_v17  ;;  %v1401_v1 = vstv %s3105_s8  ;;  %v1414_v39 = vstv %s3097_s6 }
 0x129   :  { %v1419_v40 = vstv %s3103_s7  ;;  %v1384_v41 = vadd.f32 %v1383_v24, %v1381_v59  ;;  %v1415_v32 = vmul.f32 %v1414_v39, %v1300_v30  ;;  %v1416_v33 = vmul.f32 %v1414_v39, %v1301_v52 }
 0x12a   :  { %v1385_v46 = vadd.f32 %v1383_v24, %v1382_v62  ;;  %v1400_v47 = vadd.f32 %v1398_v18, %v1395_v3  ;;  %v1420_v29 = vmul.f32 %v1419_v40, %v1343_v10  ;;  %v1421_v6 = vmul.f32 %v1419_v40, %v1344_v28 }
 0x12b   :  { %v1424_v27 = vstv %s3111_s9  ;;  %v1386_v36 = vmax.f32 %v1384_v41, 0.0  ;;  %v1417_v4 = vadd.f32 %v1415_v32, %v1412_v20  ;;  %v1418_v42 = vadd.f32 %v1416_v33, %v1413_v38 }
 0x12c   :  { %v1387_v14 = vmax.f32 %v1385_v46, 0.0  ;;  %v1406_v44 = vstv %s3125_s10  ;;  %v1429_v30 = vstv %s3128_s11 }
 0x12d   :  { %v1402_v15 = vmul.f32 %v1401_v1, %v1386_v36  ;;  %v1422_v19 = vadd.f32 %v1420_v29, %v1417_v4  ;;  %v1423_v8 = vadd.f32 %v1421_v6, %v1418_v42  ;;  %v1425_v9 = vmul.f32 %v1424_v27, %v1386_v36 }
 0x12e   :  { %v1403_v11 = vmul.f32 %v1401_v1, %v1387_v14  ;;  %v1426_v45 = vmul.f32 %v1424_v27, %v1387_v14 }
 0x12f   :  { %v1404_v12 = vadd.f32 %v1402_v15, %v1399_v49  ;;  %v1427_v52 = vadd.f32 %v1425_v9, %v1422_v19 }
 0x130   :  { %v1405_v48 = vadd.f32 %v1403_v11, %v1400_v47  ;;  %v1428_v13 = vadd.f32 %v1426_v45, %v1423_v8 }
 0x131   :  { %v1407_v57 = vadd.f32 %v1406_v44, %v1404_v12  ;;  %v1430_v35 = vadd.f32 %v1429_v30, %v1427_v52 }
 0x132   :  { %v1408_v34 = vadd.f32 %v1406_v44, %v1405_v48  ;;  %v1431_v7 = vadd.f32 %v1429_v30, %v1428_v13 }
 0x133   :  { %1703 = vtanh.f32 %v1407_v57 }
 0x134   :  { %1705 = vtanh.f32 %v1408_v34 }
 0x135   :  { %1707 = vtanh.f32 %v1430_v35 }
 0x136   :  { %1709 = vtanh.f32 %v1431_v7 }
 0x139   :  { %v1704_v23 = vpop.eup %1703 }
 0x13a   :  { %v1706_v53 = vpop.eup %1705  ;;  %1434 = vst [vmem:[#allocation9] sm:$0xff] %v1704_v23 }
 0x13b   :  { %v1708_v54 = vpop.eup %1707  ;;  %1435 = vst [vmem:[#allocation9 + $0x8] sm:$0xff] %v1706_v53 }
 0x13c   :  { %v1710_v55 = vpop.eup %1709  ;;  %1437 = vst [vmem:[#allocation9 + $0x10] sm:$0xff] %v1708_v54 }
 0x13d   :  { %1438 = vst [vmem:[#allocation9 + $0x18] sm:$0xff] %v1710_v55 }
 0x13e   :  { %1451 = dma.vmem_to_hbm [thread:$0]  %s1444_s13, 512, %s1446_s16, [#allocation4], %s1813_s21, %s1813_s21, %s1814_s22  }
 0x13f   :  { %1809 = dma.done.wait [#allocation4], 512  }
 0x140   :  { %1810 = vsyncadd [#allocation4], 4294966784 }
 0x141   :  { %1456 = vsyncpa [#allocation3], 1 }
 0x142   :  { %1457 = vsyncpa [#allocation8], 1 }
 0x143   :  { %1458 = vsyncpa [#allocation4], 1 }
 0x144   :  { %1459 = vsyncpa [#allocation5], 1 }

</bundles_post_ra>
